<compile_context>
chip_gen: v7x
topology: tpu7x:2x2x1
jax: 0.10.0
libtpu: 0.0.40
codegen_flags: <defaults>
</compile_context>

<pallas_src>
import jax
import jax.numpy as jnp
from jax.experimental import pallas as pl
from jax.experimental.pallas import tpu as pltpu

# special token ids
PAD_IDX, UNK_IDX, SOS_IDX, EOS_IDX = 0, 1, 2, 3

# small, TPU-friendly sizes
VOCAB = 128          # lane-dense vocab
EMBED = 32
ENC_HIDDEN = 32      # == hidden_output_size
DEC_HIDDEN = 32
LATENT = 16
BATCH = 8
SEQ = 8
WORD_DROP_P = 0.25


# ---------------------------------------------------------------------------
# fused forward kernel (single grid step, everything in VMEM)
# ---------------------------------------------------------------------------
def svae_kernel(
    all_tok_ref, inp_len_ref, dec_len_ref, tgt_tok_ref,
    emb_ref,
    enc_wih_ref, enc_whh_ref, enc_b_ref, enc_bhn_ref,
    w_musig_ref, b_musig_ref, eps_ref,
    w_l2h_ref, b_l2h_ref,
    dec_wih_ref, dec_whh_ref, dec_b_ref, dec_bhn_ref,
    w_out_ref, b_out_ref,
    rec_ref, kl_ref,
):
    B, T, V = BATCH, SEQ, VOCAB
    H, Hd, L = ENC_HIDDEN, DEC_HIDDEN, LATENT
    n_enc = T * B           # 64 encoder positions
    n_dec = (T - 1) * B     # 56 decoder positions
    bf16, f32 = jnp.bfloat16, jnp.float32

    # ---- one merged embedding lookup for encoder + decoder tokens ----------
    # (PAD rows get embedding row 0 -- benign: hidden updates past length are
    #  frozen and PAD targets are ignored by the loss.)
    all_tok = all_tok_ref[...]                                    # (120, 1) int32
    eq = jax.lax.broadcasted_iota(jnp.int32, (n_enc + n_dec, V), 1) == all_tok
    oh = jnp.where(eq, 1.0, 0.0).astype(bf16)                     # (120, V) bf16
    x_all = jnp.dot(oh, emb_ref[...], preferred_element_type=f32)  # (120, E) f32
    x_all = x_all.astype(bf16)                                    # exact (bf16 table rows)

    # ---- hoisted input-side gate matmuls (off the recurrence chain) --------
    gi_enc = (jnp.dot(x_all[:n_enc], enc_wih_ref[...],
                      preferred_element_type=f32) + enc_b_ref[...])   # (64, 3H) f32
    gi_dec = (jnp.dot(x_all[n_enc:], dec_wih_ref[...],
                      preferred_element_type=f32) + dec_b_ref[...])   # (56, 3H) f32

    # ---- packed-sequence masks, precomputed once ----------------------------
    enc_mask = (inp_len_ref[...] >
                jax.lax.broadcasted_iota(jnp.int32, (B, T), 1)).astype(f32)      # (B, T)
    dec_mask = (dec_len_ref[...] >
                jax.lax.broadcasted_iota(jnp.int32, (B, T - 1), 1)).astype(f32)  # (B, T-1)

    # ---- encoder GRU: only the h-recurrence matmul stays in the loop --------
    enc_whh = enc_whh_ref[...]                                    # (H, 3H) bf16
    enc_bhn = enc_bhn_ref[...]                                    # (1, H)  f32
    h = jnp.zeros((B, H), f32)
    for t in range(T):
        gi = gi_enc[t * B:(t + 1) * B]                            # (B, 3H) static slice
        gh = jnp.dot(h.astype(bf16), enc_whh, preferred_element_type=f32)
        r = jax.nn.sigmoid(gi[:, :H] + gh[:, :H])
        zg = jax.nn.sigmoid(gi[:, H:2 * H] + gh[:, H:2 * H])
        n = jnp.tanh(gi[:, 2 * H:] + r * (gh[:, 2 * H:] + enc_bhn))
        h_new = (1.0 - zg) * n + zg * h
        m = enc_mask[:, t:t + 1]                                  # 1.0 inside length
        h = m * h_new + (1.0 - m) * h                             # freeze past length

    # ---- VAE head: fused code2mu|code2sigma, KL, reparameterisation --------
    musig = (jnp.dot(h.astype(bf16), w_musig_ref[...],
                     preferred_element_type=f32) + b_musig_ref[...])  # (B, 2L)
    mu = musig[:, :L]
    ls = musig[:, L:]
    kl_per = 0.5 * jnp.sum(jnp.exp(ls) + mu * mu - 1.0 - ls, axis=1, keepdims=True)
    kl_ref[...] = jnp.mean(kl_per, axis=0, keepdims=True)         # (1, 1)
    zlat = eps_ref[...] * jnp.exp(0.5 * ls) + mu                  # z = eps*sigma + mu

    # ---- decoder GRU: h0 = latent2hidden(z); hiddens kept in vregs ----------
    h = (jnp.dot(zlat.astype(bf16), w_l2h_ref[...],
                 preferred_element_type=f32) + b_l2h_ref[...])    # (B, Hd)
    dec_whh = dec_whh_ref[...]
    dec_bhn = dec_bhn_ref[...]
    h_steps = []
    for t in range(T - 1):
        gi = gi_dec[t * B:(t + 1) * B]
        gh = jnp.dot(h.astype(bf16), dec_whh, preferred_element_type=f32)
        r = jax.nn.sigmoid(gi[:, :Hd] + gh[:, :Hd])
        zg = jax.nn.sigmoid(gi[:, Hd:2 * Hd] + gh[:, Hd:2 * Hd])
        n = jnp.tanh(gi[:, 2 * Hd:] + r * (gh[:, 2 * Hd:] + dec_bhn))
        h_new = (1.0 - zg) * n + zg * h
        m = dec_mask[:, t:t + 1]
        h = m * h_new + (1.0 - m) * h                             # freeze past length
        # rows past length only ever meet PAD targets below (ignored by loss)
        h_steps.append(h_new)

    dec_out = jnp.concatenate(h_steps, axis=0)                    # ((T-1)*B, Hd) f32

    # ---- out2vocab + log_softmax + NLL for all positions in one shot --------
    # TODO(synk): on v5e a per-step NLL (inside the loop above) may overlap the
    # tail with the recurrence better; kept batched pending a benchmark.
    logits = (jnp.dot(dec_out.astype(bf16), w_out_ref[...],
                      preferred_element_type=f32) + b_out_ref[...])   # ((T-1)*B, V)
    mx = jnp.max(logits, axis=-1, keepdims=True)
    lse = mx + jnp.log(jnp.sum(jnp.exp(logits - mx), axis=-1, keepdims=True))
    tgt = tgt_tok_ref[...]                                        # ((T-1)*B, 1)
    oh_t = jax.lax.broadcasted_iota(jnp.int32, (n_dec, V), 1) == tgt
    picked = jnp.sum(jnp.where(oh_t, logits, 0.0), axis=-1, keepdims=True)
    nll = lse - picked                                            # ((T-1)*B, 1)
    valid = (tgt != PAD_IDX).astype(f32)                          # ignore_index=pad
    # sum over time per sample, mean over batch == total / B
    rec_ref[...] = jnp.sum(nll * valid, axis=0, keepdims=True) * (1.0 / B)


def _full_spec(shape):
    return pl.BlockSpec(shape, lambda i: (0,) * len(shape))


def svae_fused(params, all_tok, inp_len, dec_len, tgt_tok, eps):
    bf = jnp.bfloat16
    enc_wih, enc_whh, enc_b, enc_bhn = params["enc_gru"]
    dec_wih, dec_whh, dec_b, dec_bhn = params["dec_gru"]
    w_l2h, b_l2h = params["latent2hidden"]
    w_out, b_out = params["out2vocab"]

    args = [
        all_tok, inp_len, dec_len, tgt_tok,
        params["embedding"].astype(bf),
        enc_wih.astype(bf), enc_whh.astype(bf), enc_b, enc_bhn,
        params["w_musig"].astype(bf), params["b_musig"], eps,
        w_l2h.astype(bf), b_l2h,
        dec_wih.astype(bf), dec_whh.astype(bf), dec_b, dec_bhn,
        w_out.astype(bf), b_out,
    ]
    return pl.pallas_call(
        svae_kernel,
        out_shape=(jax.ShapeDtypeStruct((1, 1), jnp.float32),   # rec_loss
                   jax.ShapeDtypeStruct((1, 1), jnp.float32)),  # kl_loss
        grid_spec=pltpu.PrefetchScalarGridSpec(
            num_scalar_prefetch=0,
            grid=(1,),
            in_specs=[_full_spec(a.shape) for a in args],
            out_specs=[pl.BlockSpec((1, 1), lambda i: (0, 0)),
                       pl.BlockSpec((1, 1), lambda i: (0, 0))],
        ),
        compiler_params=pltpu.CompilerParams(
            dimension_semantics=("arbitrary",)),
    )(*args)


# ---------------------------------------------------------------------------
# deterministic parameter init (shapes follow RecurrentVAE.__init__)
# ---------------------------------------------------------------------------
def init_linear(key, fan_in, fan_out):
    k1, k2 = jax.random.split(key)
    bound = 1.0 / (fan_in ** 0.5)
    w = jax.random.uniform(k1, (fan_in, fan_out), jnp.float32, -bound, bound)
    b = jax.random.uniform(k2, (1, fan_out), jnp.float32, -bound, bound)
    return w, b


def init_gru(key, input_size, hidden):
    """Fused-gate layout: wih (in,3H), whh (H,3H); gate order = [r, z, n].
    r/z biases are pre-folded (bih+bhh); bhh_n stays separate."""
    ks = jax.random.split(key, 4)
    bound = 1.0 / (hidden ** 0.5)
    wih = jax.random.uniform(ks[0], (input_size, 3 * hidden), jnp.float32, -bound, bound)
    whh = jax.random.uniform(ks[1], (hidden, 3 * hidden), jnp.float32, -bound, bound)
    bih = jax.random.uniform(ks[2], (1, 3 * hidden), jnp.float32, -bound, bound)
    bhh = jax.random.uniform(ks[3], (1, 3 * hidden), jnp.float32, -bound, bound)
    b_fused = jnp.concatenate(
        [bih[:, :2 * hidden] + bhh[:, :2 * hidden], bih[:, 2 * hidden:]], axis=1)
    b_hn = bhh[:, 2 * hidden:]
    return wih, whh, b_fused, b_hn


# ---------------------------------------------------------------------------
# full forward pass (jax.random glue + scalar annealing outside the kernel)
# ---------------------------------------------------------------------------
def recurrent_vae_forward(params, inp, inp_lengths, trg, trg_lengths, key, kl_step):
    T, B = inp.shape

    key, k_eps, k_drop = jax.random.split(key, 3)
    eps = jax.random.normal(k_eps, (B, LATENT), jnp.float32)

    # word dropout on decoder inputs (special tokens never dropped)
    trg_inp, trg_out = trg[:-1], trg[1:]
    drop_probs = jax.random.uniform(k_drop, trg_inp.shape)
    special = (trg_inp == SOS_IDX) | (trg_inp == EOS_IDX) | (trg_inp == PAD_IDX)
    drop_probs = jnp.where(special, 1.0, drop_probs)
    trg_inp = jnp.where(drop_probs < WORD_DROP_P, UNK_IDX, trg_inp)

    # time-major row order: row = t*B + b (matches in-kernel slicing);
    # encoder tokens and decoder-input tokens are concatenated for one fused
    # embedding lookup in the kernel.
    inp_tok = inp.reshape(T * B, 1).astype(jnp.int32)
    dec_tok = trg_inp.reshape((T - 1) * B, 1).astype(jnp.int32)
    all_tok = jnp.concatenate([inp_tok, dec_tok], axis=0)          # (T*B+(T-1)*B, 1)
    tgt_tok = trg_out.reshape((T - 1) * B, 1).astype(jnp.int32)
    inp_len = inp_lengths.reshape(B, 1).astype(jnp.int32)
    dec_len = (trg_lengths - 1).reshape(B, 1).astype(jnp.int32)

    rec, kl = svae_fused(params, all_tok, inp_len, dec_len, tgt_tok, eps)
    rec_loss = rec[0, 0]
    kl_loss = kl[0, 0]

    # logistic KL annealing (scalar glue)
    k_anneal, x0 = 0.0025, 2500.0
    kl_coeff = 1.0 / (1.0 + jnp.exp(-k_anneal * (kl_step - x0)))

    loss = rec_loss + kl_coeff * kl_loss
    return {"loss": loss, "rec_loss": rec_loss, "kl_loss": kl_loss,
            "kl_weight": kl_coeff}


# TODO(synk): .item()-based metric accumulation (AverageMetric) and the
# autoregressive sample()/generation path are host-side / data-dependent
# control flow and are not translated to Pallas.

if __name__ == "__main__":
    root = jax.random.PRNGKey(0)
    k_emb, k_enc, k_mu, k_sig, k_l2h, k_dec, k_out, k_data, k_fwd = \
        jax.random.split(root, 9)

    wmu, bmu = init_linear(k_mu, ENC_HIDDEN, LATENT)
    wls, bls = init_linear(k_sig, ENC_HIDDEN, LATENT)

    params = {
        "embedding": jax.random.normal(k_emb, (VOCAB, EMBED), jnp.float32) * 0.1,
        "enc_gru": init_gru(k_enc, EMBED, ENC_HIDDEN),
        # code2mu | code2sigma fused along the output (lane) axis
        "w_musig": jnp.concatenate([wmu, wls], axis=1),
        "b_musig": jnp.concatenate([bmu, bls], axis=1),
        "latent2hidden": init_linear(k_l2h, LATENT, DEC_HIDDEN),
        "dec_gru": init_gru(k_dec, EMBED, DEC_HIDDEN),
        "out2vocab": init_linear(k_out, DEC_HIDDEN, VOCAB),   # tie_weights=False
    }

    # build a deterministic toy batch: SOS ... tokens ... EOS PAD*
    lengths = jnp.array([8, 8, 7, 6, 8, 5, 8, 8], dtype=jnp.int32)    # (B,)
    body = jax.random.randint(k_data, (SEQ, BATCH), 4, VOCAB, dtype=jnp.int32)
    t_idx = jnp.arange(SEQ)[:, None]
    inp = jnp.where(t_idx == 0, SOS_IDX,
          jnp.where(t_idx == (lengths[None, :] - 1), EOS_IDX,
          jnp.where(t_idx >= lengths[None, :], PAD_IDX, body))).astype(jnp.int32)
    trg = inp                                   # VAE reconstructs its input

    out = recurrent_vae_forward(params, inp, lengths, trg, lengths,
                                key=k_fwd, kl_step=1000.0)
    out = jax.tree_util.tree_map(jax.block_until_ready, out)

    assert bool(jnp.isfinite(out["loss"])), "non-finite loss"
    assert bool(jnp.isfinite(out["rec_loss"])), "non-finite rec_loss"
    assert bool(jnp.isfinite(out["kl_loss"])), "non-finite kl_loss"
    print("KERNEL_OK")
</pallas_src>

<mosaic_0001>
module attributes {stable_mosaic.version = 11 : i64} {
  func.func @svae_kernel(%arg0: i32, %arg1: memref<120x1xi32, #tpu.memory_space<vmem>>, %arg2: memref<8x1xi32, #tpu.memory_space<vmem>>, %arg3: memref<8x1xi32, #tpu.memory_space<vmem>>, %arg4: memref<56x1xi32, #tpu.memory_space<vmem>>, %arg5: memref<128x32xbf16, #tpu.memory_space<vmem>>, %arg6: memref<32x96xbf16, #tpu.memory_space<vmem>>, %arg7: memref<32x96xbf16, #tpu.memory_space<vmem>>, %arg8: memref<1x96xf32, #tpu.memory_space<vmem>>, %arg9: memref<1x32xf32, #tpu.memory_space<vmem>>, %arg10: memref<32x32xbf16, #tpu.memory_space<vmem>>, %arg11: memref<1x32xf32, #tpu.memory_space<vmem>>, %arg12: memref<8x16xf32, #tpu.memory_space<vmem>>, %arg13: memref<16x32xbf16, #tpu.memory_space<vmem>>, %arg14: memref<1x32xf32, #tpu.memory_space<vmem>>, %arg15: memref<32x96xbf16, #tpu.memory_space<vmem>>, %arg16: memref<32x96xbf16, #tpu.memory_space<vmem>>, %arg17: memref<1x96xf32, #tpu.memory_space<vmem>>, %arg18: memref<1x32xf32, #tpu.memory_space<vmem>>, %arg19: memref<32x128xbf16, #tpu.memory_space<vmem>>, %arg20: memref<1x128xf32, #tpu.memory_space<vmem>>, %arg21: memref<1x1xf32, #tpu.memory_space<vmem>>, %arg22: memref<1x1xf32, #tpu.memory_space<vmem>>) attributes {dimension_semantics = [#tpu.dimension_semantics<arbitrary>], iteration_bounds = array<i64: 1>, scalar_prefetch = 0 : i64, scratch_operands = 0 : i64, tpu.core_type = #tpu.core_type<tc>, window_params = [{pipeline_mode = #tpu.pipeline_mode<synchronous>, transform_indices = @transform_0, window_bounds = array<i64: 120, 1>}, {pipeline_mode = #tpu.pipeline_mode<synchronous>, transform_indices = @transform_1, window_bounds = array<i64: 8, 1>}, {pipeline_mode = #tpu.pipeline_mode<synchronous>, transform_indices = @transform_2, window_bounds = array<i64: 8, 1>}, {pipeline_mode = #tpu.pipeline_mode<synchronous>, transform_indices = @transform_3, window_bounds = array<i64: 56, 1>}, {pipeline_mode = #tpu.pipeline_mode<synchronous>, transform_indices = @transform_4, window_bounds = array<i64: 128, 32>}, {pipeline_mode = #tpu.pipeline_mode<synchronous>, transform_indices = @transform_5, window_bounds = array<i64: 32, 96>}, {pipeline_mode = #tpu.pipeline_mode<synchronous>, transform_indices = @transform_6, window_bounds = array<i64: 32, 96>}, {pipeline_mode = #tpu.pipeline_mode<synchronous>, transform_indices = @transform_7, window_bounds = array<i64: 1, 96>}, {pipeline_mode = #tpu.pipeline_mode<synchronous>, transform_indices = @transform_8, window_bounds = array<i64: 1, 32>}, {pipeline_mode = #tpu.pipeline_mode<synchronous>, transform_indices = @transform_9, window_bounds = array<i64: 32, 32>}, {pipeline_mode = #tpu.pipeline_mode<synchronous>, transform_indices = @transform_10, window_bounds = array<i64: 1, 32>}, {pipeline_mode = #tpu.pipeline_mode<synchronous>, transform_indices = @transform_11, window_bounds = array<i64: 8, 16>}, {pipeline_mode = #tpu.pipeline_mode<synchronous>, transform_indices = @transform_12, window_bounds = array<i64: 16, 32>}, {pipeline_mode = #tpu.pipeline_mode<synchronous>, transform_indices = @transform_13, window_bounds = array<i64: 1, 32>}, {pipeline_mode = #tpu.pipeline_mode<synchronous>, transform_indices = @transform_14, window_bounds = array<i64: 32, 96>}, {pipeline_mode = #tpu.pipeline_mode<synchronous>, transform_indices = @transform_15, window_bounds = array<i64: 32, 96>}, {pipeline_mode = #tpu.pipeline_mode<synchronous>, transform_indices = @transform_16, window_bounds = array<i64: 1, 96>}, {pipeline_mode = #tpu.pipeline_mode<synchronous>, transform_indices = @transform_17, window_bounds = array<i64: 1, 32>}, {pipeline_mode = #tpu.pipeline_mode<synchronous>, transform_indices = @transform_18, window_bounds = array<i64: 32, 128>}, {pipeline_mode = #tpu.pipeline_mode<synchronous>, transform_indices = @transform_19, window_bounds = array<i64: 1, 128>}, {pipeline_mode = #tpu.pipeline_mode<synchronous>, transform_indices = @transform_20, window_bounds = array<i64: 1, 1>}, {pipeline_mode = #tpu.pipeline_mode<synchronous>, transform_indices = @transform_21, window_bounds = array<i64: 1, 1>}]} {
    %c0 = arith.constant 0 : index
    %c0_0 = arith.constant 0 : index
    %0 = vector.load %arg1[%c0, %c0_0] : memref<120x1xi32, #tpu.memory_space<vmem>>, vector<120x1xi32>
    %1 = tpu.iota {dimensions = array<i32: 1>} : vector<120x128xi32>
    %2 = vector.broadcast %0 : vector<120x1xi32> to vector<120x128xi32>
    %3 = arith.cmpi eq, %1, %2 : vector<120x128xi32>
    %cst = arith.constant 1.000000e+00 : f32
    %cst_1 = arith.constant 0.000000e+00 : f32
    %4 = vector.broadcast %cst : f32 to vector<120x128xf32>
    %5 = vector.broadcast %cst_1 : f32 to vector<120x128xf32>
    %6 = arith.select %3, %4, %5 : vector<120x128xi1>, vector<120x128xf32>
    %7 = arith.truncf %6 : vector<120x128xf32> to vector<120x128xbf16>
    %c0_2 = arith.constant 0 : index
    %c0_3 = arith.constant 0 : index
    %8 = vector.load %arg5[%c0_2, %c0_3] : memref<128x32xbf16, #tpu.memory_space<vmem>>, vector<128x32xbf16>
    %cst_4 = arith.constant dense<0.000000e+00> : vector<120x32xf32>
    %9 = tpu.matmul %7, %8, %cst_4 {dimension_numbers = #tpu.dot_dimension_numbers<[1], [0], [0], [1], [0, 0, 1, 1], [], []>} : vector<120x128xbf16>, vector<128x32xbf16>, vector<120x32xf32> -> vector<120x32xf32>
    %10 = arith.truncf %9 : vector<120x32xf32> to vector<120x32xbf16>
    %11 = vector.extract_strided_slice %10 {offsets = [0, 0], sizes = [64, 32], strides = [1, 1]} : vector<120x32xbf16> to vector<64x32xbf16>
    %c0_5 = arith.constant 0 : index
    %c0_6 = arith.constant 0 : index
    %12 = vector.load %arg6[%c0_5, %c0_6] : memref<32x96xbf16, #tpu.memory_space<vmem>>, vector<32x96xbf16>
    %cst_7 = arith.constant dense<0.000000e+00> : vector<64x96xf32>
    %13 = tpu.matmul %11, %12, %cst_7 {dimension_numbers = #tpu.dot_dimension_numbers<[1], [0], [0], [1], [0, 0, 1, 1], [], []>} : vector<64x32xbf16>, vector<32x96xbf16>, vector<64x96xf32> -> vector<64x96xf32>
    %c0_8 = arith.constant 0 : index
    %c0_9 = arith.constant 0 : index
    %14 = vector.load %arg8[%c0_8, %c0_9] : memref<1x96xf32, #tpu.memory_space<vmem>>, vector<1x96xf32>
    %15 = vector.broadcast %14 : vector<1x96xf32> to vector<64x96xf32>
    %16 = arith.addf %13, %15 : vector<64x96xf32>
    %17 = vector.extract_strided_slice %10 {offsets = [64, 0], sizes = [56, 32], strides = [1, 1]} : vector<120x32xbf16> to vector<56x32xbf16>
    %c0_10 = arith.constant 0 : index
    %c0_11 = arith.constant 0 : index
    %18 = vector.load %arg15[%c0_10, %c0_11] : memref<32x96xbf16, #tpu.memory_space<vmem>>, vector<32x96xbf16>
    %cst_12 = arith.constant dense<0.000000e+00> : vector<56x96xf32>
    %19 = tpu.matmul %17, %18, %cst_12 {dimension_numbers = #tpu.dot_dimension_numbers<[1], [0], [0], [1], [0, 0, 1, 1], [], []>} : vector<56x32xbf16>, vector<32x96xbf16>, vector<56x96xf32> -> vector<56x96xf32>
    %c0_13 = arith.constant 0 : index
    %c0_14 = arith.constant 0 : index
    %20 = vector.load %arg17[%c0_13, %c0_14] : memref<1x96xf32, #tpu.memory_space<vmem>>, vector<1x96xf32>
    %21 = vector.broadcast %20 : vector<1x96xf32> to vector<56x96xf32>
    %22 = arith.addf %19, %21 : vector<56x96xf32>
    %c0_15 = arith.constant 0 : index
    %c0_16 = arith.constant 0 : index
    %23 = vector.load %arg2[%c0_15, %c0_16] : memref<8x1xi32, #tpu.memory_space<vmem>>, vector<8x1xi32>
    %24 = tpu.iota {dimensions = array<i32: 1>} : vector<8x8xi32>
    %25 = vector.broadcast %23 : vector<8x1xi32> to vector<8x8xi32>
    %26 = arith.cmpi sgt, %25, %24 : vector<8x8xi32>
    %27 = arith.extui %26 : vector<8x8xi1> to vector<8x8xi32>
    %28 = arith.sitofp %27 : vector<8x8xi32> to vector<8x8xf32>
    %c0_17 = arith.constant 0 : index
    %c0_18 = arith.constant 0 : index
    %29 = vector.load %arg3[%c0_17, %c0_18] : memref<8x1xi32, #tpu.memory_space<vmem>>, vector<8x1xi32>
    %30 = tpu.iota {dimensions = array<i32: 1>} : vector<8x7xi32>
    %31 = vector.broadcast %29 : vector<8x1xi32> to vector<8x7xi32>
    %32 = arith.cmpi sgt, %31, %30 : vector<8x7xi32>
    %33 = arith.extui %32 : vector<8x7xi1> to vector<8x7xi32>
    %34 = arith.sitofp %33 : vector<8x7xi32> to vector<8x7xf32>
    %c0_19 = arith.constant 0 : index
    %c0_20 = arith.constant 0 : index
    %35 = vector.load %arg7[%c0_19, %c0_20] : memref<32x96xbf16, #tpu.memory_space<vmem>>, vector<32x96xbf16>
    %c0_21 = arith.constant 0 : index
    %c0_22 = arith.constant 0 : index
    %36 = vector.load %arg9[%c0_21, %c0_22] : memref<1x32xf32, #tpu.memory_space<vmem>>, vector<1x32xf32>
    %cst_23 = arith.constant 0.000000e+00 : f32
    %37 = vector.broadcast %cst_23 : f32 to vector<8x32xf32>
    %38 = vector.extract_strided_slice %16 {offsets = [0, 0], sizes = [8, 96], strides = [1, 1]} : vector<64x96xf32> to vector<8x96xf32>
    %39 = arith.truncf %37 : vector<8x32xf32> to vector<8x32xbf16>
    %cst_24 = arith.constant dense<0.000000e+00> : vector<8x96xf32>
    %40 = tpu.matmul %39, %35, %cst_24 {dimension_numbers = #tpu.dot_dimension_numbers<[1], [0], [0], [1], [0, 0, 1, 1], [], []>} : vector<8x32xbf16>, vector<32x96xbf16>, vector<8x96xf32> -> vector<8x96xf32>
    %41 = vector.extract_strided_slice %38 {offsets = [0, 0], sizes = [8, 32], strides = [1, 1]} : vector<8x96xf32> to vector<8x32xf32>
    %42 = vector.extract_strided_slice %40 {offsets = [0, 0], sizes = [8, 32], strides = [1, 1]} : vector<8x96xf32> to vector<8x32xf32>
    %43 = arith.addf %41, %42 : vector<8x32xf32>
    %44 = arith.negf %43 : vector<8x32xf32>
    %45 = math.exp %44 : vector<8x32xf32>
    %cst_25 = arith.constant 1.000000e+00 : f32
    %46 = vector.broadcast %cst_25 : f32 to vector<8x32xf32>
    %47 = arith.addf %46, %45 : vector<8x32xf32>
    %48 = arith.divf %46, %47 : vector<8x32xf32>
    %49 = vector.extract_strided_slice %38 {offsets = [0, 32], sizes = [8, 32], strides = [1, 1]} : vector<8x96xf32> to vector<8x32xf32>
    %50 = vector.extract_strided_slice %40 {offsets = [0, 32], sizes = [8, 32], strides = [1, 1]} : vector<8x96xf32> to vector<8x32xf32>
    %51 = arith.addf %49, %50 : vector<8x32xf32>
    %52 = arith.negf %51 : vector<8x32xf32>
    %53 = math.exp %52 : vector<8x32xf32>
    %cst_26 = arith.constant 1.000000e+00 : f32
    %54 = vector.broadcast %cst_26 : f32 to vector<8x32xf32>
    %55 = arith.addf %54, %53 : vector<8x32xf32>
    %56 = arith.divf %54, %55 : vector<8x32xf32>
    %57 = vector.extract_strided_slice %38 {offsets = [0, 64], sizes = [8, 32], strides = [1, 1]} : vector<8x96xf32> to vector<8x32xf32>
    %58 = vector.extract_strided_slice %40 {offsets = [0, 64], sizes = [8, 32], strides = [1, 1]} : vector<8x96xf32> to vector<8x32xf32>
    %59 = vector.broadcast %36 : vector<1x32xf32> to vector<8x32xf32>
    %60 = arith.addf %58, %59 : vector<8x32xf32>
    %61 = arith.mulf %48, %60 : vector<8x32xf32>
    %62 = arith.addf %57, %61 : vector<8x32xf32>
    %63 = math.tanh %62 : vector<8x32xf32>
    %cst_27 = arith.constant 1.000000e+00 : f32
    %64 = vector.broadcast %cst_27 : f32 to vector<8x32xf32>
    %65 = arith.subf %64, %56 : vector<8x32xf32>
    %66 = arith.mulf %65, %63 : vector<8x32xf32>
    %67 = arith.mulf %56, %37 : vector<8x32xf32>
    %68 = arith.addf %66, %67 : vector<8x32xf32>
    %69 = vector.extract_strided_slice %28 {offsets = [0, 0], sizes = [8, 1], strides = [1, 1]} : vector<8x8xf32> to vector<8x1xf32>
    %70 = vector.broadcast %69 : vector<8x1xf32> to vector<8x32xf32>
    %71 = arith.mulf %70, %68 : vector<8x32xf32>
    %cst_28 = arith.constant 1.000000e+00 : f32
    %72 = vector.broadcast %cst_28 : f32 to vector<8x1xf32>
    %73 = arith.subf %72, %69 : vector<8x1xf32>
    %74 = vector.broadcast %73 : vector<8x1xf32> to vector<8x32xf32>
    %75 = arith.mulf %74, %37 : vector<8x32xf32>
    %76 = arith.addf %71, %75 : vector<8x32xf32>
    %77 = vector.extract_strided_slice %16 {offsets = [8, 0], sizes = [8, 96], strides = [1, 1]} : vector<64x96xf32> to vector<8x96xf32>
    %78 = arith.truncf %76 : vector<8x32xf32> to vector<8x32xbf16>
    %cst_29 = arith.constant dense<0.000000e+00> : vector<8x96xf32>
    %79 = tpu.matmul %78, %35, %cst_29 {dimension_numbers = #tpu.dot_dimension_numbers<[1], [0], [0], [1], [0, 0, 1, 1], [], []>} : vector<8x32xbf16>, vector<32x96xbf16>, vector<8x96xf32> -> vector<8x96xf32>
    %80 = vector.extract_strided_slice %77 {offsets = [0, 0], sizes = [8, 32], strides = [1, 1]} : vector<8x96xf32> to vector<8x32xf32>
    %81 = vector.extract_strided_slice %79 {offsets = [0, 0], sizes = [8, 32], strides = [1, 1]} : vector<8x96xf32> to vector<8x32xf32>
    %82 = arith.addf %80, %81 : vector<8x32xf32>
    %83 = arith.negf %82 : vector<8x32xf32>
    %84 = math.exp %83 : vector<8x32xf32>
    %cst_30 = arith.constant 1.000000e+00 : f32
    %85 = vector.broadcast %cst_30 : f32 to vector<8x32xf32>
    %86 = arith.addf %85, %84 : vector<8x32xf32>
    %87 = arith.divf %85, %86 : vector<8x32xf32>
    %88 = vector.extract_strided_slice %77 {offsets = [0, 32], sizes = [8, 32], strides = [1, 1]} : vector<8x96xf32> to vector<8x32xf32>
    %89 = vector.extract_strided_slice %79 {offsets = [0, 32], sizes = [8, 32], strides = [1, 1]} : vector<8x96xf32> to vector<8x32xf32>
    %90 = arith.addf %88, %89 : vector<8x32xf32>
    %91 = arith.negf %90 : vector<8x32xf32>
    %92 = math.exp %91 : vector<8x32xf32>
    %cst_31 = arith.constant 1.000000e+00 : f32
    %93 = vector.broadcast %cst_31 : f32 to vector<8x32xf32>
    %94 = arith.addf %93, %92 : vector<8x32xf32>
    %95 = arith.divf %93, %94 : vector<8x32xf32>
    %96 = vector.extract_strided_slice %77 {offsets = [0, 64], sizes = [8, 32], strides = [1, 1]} : vector<8x96xf32> to vector<8x32xf32>
    %97 = vector.extract_strided_slice %79 {offsets = [0, 64], sizes = [8, 32], strides = [1, 1]} : vector<8x96xf32> to vector<8x32xf32>
    %98 = vector.broadcast %36 : vector<1x32xf32> to vector<8x32xf32>
    %99 = arith.addf %97, %98 : vector<8x32xf32>
    %100 = arith.mulf %87, %99 : vector<8x32xf32>
    %101 = arith.addf %96, %100 : vector<8x32xf32>
    %102 = math.tanh %101 : vector<8x32xf32>
    %cst_32 = arith.constant 1.000000e+00 : f32
    %103 = vector.broadcast %cst_32 : f32 to vector<8x32xf32>
    %104 = arith.subf %103, %95 : vector<8x32xf32>
    %105 = arith.mulf %104, %102 : vector<8x32xf32>
    %106 = arith.mulf %95, %76 : vector<8x32xf32>
    %107 = arith.addf %105, %106 : vector<8x32xf32>
    %108 = vector.extract_strided_slice %28 {offsets = [0, 1], sizes = [8, 1], strides = [1, 1]} : vector<8x8xf32> to vector<8x1xf32>
    %109 = vector.broadcast %108 : vector<8x1xf32> to vector<8x32xf32>
    %110 = arith.mulf %109, %107 : vector<8x32xf32>
    %cst_33 = arith.constant 1.000000e+00 : f32
    %111 = vector.broadcast %cst_33 : f32 to vector<8x1xf32>
    %112 = arith.subf %111, %108 : vector<8x1xf32>
    %113 = vector.broadcast %112 : vector<8x1xf32> to vector<8x32xf32>
    %114 = arith.mulf %113, %76 : vector<8x32xf32>
    %115 = arith.addf %110, %114 : vector<8x32xf32>
    %116 = vector.extract_strided_slice %16 {offsets = [16, 0], sizes = [8, 96], strides = [1, 1]} : vector<64x96xf32> to vector<8x96xf32>
    %117 = arith.truncf %115 : vector<8x32xf32> to vector<8x32xbf16>
    %cst_34 = arith.constant dense<0.000000e+00> : vector<8x96xf32>
    %118 = tpu.matmul %117, %35, %cst_34 {dimension_numbers = #tpu.dot_dimension_numbers<[1], [0], [0], [1], [0, 0, 1, 1], [], []>} : vector<8x32xbf16>, vector<32x96xbf16>, vector<8x96xf32> -> vector<8x96xf32>
    %119 = vector.extract_strided_slice %116 {offsets = [0, 0], sizes = [8, 32], strides = [1, 1]} : vector<8x96xf32> to vector<8x32xf32>
    %120 = vector.extract_strided_slice %118 {offsets = [0, 0], sizes = [8, 32], strides = [1, 1]} : vector<8x96xf32> to vector<8x32xf32>
    %121 = arith.addf %119, %120 : vector<8x32xf32>
    %122 = arith.negf %121 : vector<8x32xf32>
    %123 = math.exp %122 : vector<8x32xf32>
    %cst_35 = arith.constant 1.000000e+00 : f32
    %124 = vector.broadcast %cst_35 : f32 to vector<8x32xf32>
    %125 = arith.addf %124, %123 : vector<8x32xf32>
    %126 = arith.divf %124, %125 : vector<8x32xf32>
    %127 = vector.extract_strided_slice %116 {offsets = [0, 32], sizes = [8, 32], strides = [1, 1]} : vector<8x96xf32> to vector<8x32xf32>
    %128 = vector.extract_strided_slice %118 {offsets = [0, 32], sizes = [8, 32], strides = [1, 1]} : vector<8x96xf32> to vector<8x32xf32>
    %129 = arith.addf %127, %128 : vector<8x32xf32>
    %130 = arith.negf %129 : vector<8x32xf32>
    %131 = math.exp %130 : vector<8x32xf32>
    %cst_36 = arith.constant 1.000000e+00 : f32
    %132 = vector.broadcast %cst_36 : f32 to vector<8x32xf32>
    %133 = arith.addf %132, %131 : vector<8x32xf32>
    %134 = arith.divf %132, %133 : vector<8x32xf32>
    %135 = vector.extract_strided_slice %116 {offsets = [0, 64], sizes = [8, 32], strides = [1, 1]} : vector<8x96xf32> to vector<8x32xf32>
    %136 = vector.extract_strided_slice %118 {offsets = [0, 64], sizes = [8, 32], strides = [1, 1]} : vector<8x96xf32> to vector<8x32xf32>
    %137 = vector.broadcast %36 : vector<1x32xf32> to vector<8x32xf32>
    %138 = arith.addf %136, %137 : vector<8x32xf32>
    %139 = arith.mulf %126, %138 : vector<8x32xf32>
    %140 = arith.addf %135, %139 : vector<8x32xf32>
    %141 = math.tanh %140 : vector<8x32xf32>
    %cst_37 = arith.constant 1.000000e+00 : f32
    %142 = vector.broadcast %cst_37 : f32 to vector<8x32xf32>
    %143 = arith.subf %142, %134 : vector<8x32xf32>
    %144 = arith.mulf %143, %141 : vector<8x32xf32>
    %145 = arith.mulf %134, %115 : vector<8x32xf32>
    %146 = arith.addf %144, %145 : vector<8x32xf32>
    %147 = vector.extract_strided_slice %28 {offsets = [0, 2], sizes = [8, 1], strides = [1, 1]} : vector<8x8xf32> to vector<8x1xf32>
    %148 = vector.broadcast %147 : vector<8x1xf32> to vector<8x32xf32>
    %149 = arith.mulf %148, %146 : vector<8x32xf32>
    %cst_38 = arith.constant 1.000000e+00 : f32
    %150 = vector.broadcast %cst_38 : f32 to vector<8x1xf32>
    %151 = arith.subf %150, %147 : vector<8x1xf32>
    %152 = vector.broadcast %151 : vector<8x1xf32> to vector<8x32xf32>
    %153 = arith.mulf %152, %115 : vector<8x32xf32>
    %154 = arith.addf %149, %153 : vector<8x32xf32>
    %155 = vector.extract_strided_slice %16 {offsets = [24, 0], sizes = [8, 96], strides = [1, 1]} : vector<64x96xf32> to vector<8x96xf32>
    %156 = arith.truncf %154 : vector<8x32xf32> to vector<8x32xbf16>
    %cst_39 = arith.constant dense<0.000000e+00> : vector<8x96xf32>
    %157 = tpu.matmul %156, %35, %cst_39 {dimension_numbers = #tpu.dot_dimension_numbers<[1], [0], [0], [1], [0, 0, 1, 1], [], []>} : vector<8x32xbf16>, vector<32x96xbf16>, vector<8x96xf32> -> vector<8x96xf32>
    %158 = vector.extract_strided_slice %155 {offsets = [0, 0], sizes = [8, 32], strides = [1, 1]} : vector<8x96xf32> to vector<8x32xf32>
    %159 = vector.extract_strided_slice %157 {offsets = [0, 0], sizes = [8, 32], strides = [1, 1]} : vector<8x96xf32> to vector<8x32xf32>
    %160 = arith.addf %158, %159 : vector<8x32xf32>
    %161 = arith.negf %160 : vector<8x32xf32>
    %162 = math.exp %161 : vector<8x32xf32>
    %cst_40 = arith.constant 1.000000e+00 : f32
    %163 = vector.broadcast %cst_40 : f32 to vector<8x32xf32>
    %164 = arith.addf %163, %162 : vector<8x32xf32>
    %165 = arith.divf %163, %164 : vector<8x32xf32>
    %166 = vector.extract_strided_slice %155 {offsets = [0, 32], sizes = [8, 32], strides = [1, 1]} : vector<8x96xf32> to vector<8x32xf32>
    %167 = vector.extract_strided_slice %157 {offsets = [0, 32], sizes = [8, 32], strides = [1, 1]} : vector<8x96xf32> to vector<8x32xf32>
    %168 = arith.addf %166, %167 : vector<8x32xf32>
    %169 = arith.negf %168 : vector<8x32xf32>
    %170 = math.exp %169 : vector<8x32xf32>
    %cst_41 = arith.constant 1.000000e+00 : f32
    %171 = vector.broadcast %cst_41 : f32 to vector<8x32xf32>
    %172 = arith.addf %171, %170 : vector<8x32xf32>
    %173 = arith.divf %171, %172 : vector<8x32xf32>
    %174 = vector.extract_strided_slice %155 {offsets = [0, 64], sizes = [8, 32], strides = [1, 1]} : vector<8x96xf32> to vector<8x32xf32>
    %175 = vector.extract_strided_slice %157 {offsets = [0, 64], sizes = [8, 32], strides = [1, 1]} : vector<8x96xf32> to vector<8x32xf32>
    %176 = vector.broadcast %36 : vector<1x32xf32> to vector<8x32xf32>
    %177 = arith.addf %175, %176 : vector<8x32xf32>
    %178 = arith.mulf %165, %177 : vector<8x32xf32>
    %179 = arith.addf %174, %178 : vector<8x32xf32>
    %180 = math.tanh %179 : vector<8x32xf32>
    %cst_42 = arith.constant 1.000000e+00 : f32
    %181 = vector.broadcast %cst_42 : f32 to vector<8x32xf32>
    %182 = arith.subf %181, %173 : vector<8x32xf32>
    %183 = arith.mulf %182, %180 : vector<8x32xf32>
    %184 = arith.mulf %173, %154 : vector<8x32xf32>
    %185 = arith.addf %183, %184 : vector<8x32xf32>
    %186 = vector.extract_strided_slice %28 {offsets = [0, 3], sizes = [8, 1], strides = [1, 1]} : vector<8x8xf32> to vector<8x1xf32>
    %187 = vector.broadcast %186 : vector<8x1xf32> to vector<8x32xf32>
    %188 = arith.mulf %187, %185 : vector<8x32xf32>
    %cst_43 = arith.constant 1.000000e+00 : f32
    %189 = vector.broadcast %cst_43 : f32 to vector<8x1xf32>
    %190 = arith.subf %189, %186 : vector<8x1xf32>
    %191 = vector.broadcast %190 : vector<8x1xf32> to vector<8x32xf32>
    %192 = arith.mulf %191, %154 : vector<8x32xf32>
    %193 = arith.addf %188, %192 : vector<8x32xf32>
    %194 = vector.extract_strided_slice %16 {offsets = [32, 0], sizes = [8, 96], strides = [1, 1]} : vector<64x96xf32> to vector<8x96xf32>
    %195 = arith.truncf %193 : vector<8x32xf32> to vector<8x32xbf16>
    %cst_44 = arith.constant dense<0.000000e+00> : vector<8x96xf32>
    %196 = tpu.matmul %195, %35, %cst_44 {dimension_numbers = #tpu.dot_dimension_numbers<[1], [0], [0], [1], [0, 0, 1, 1], [], []>} : vector<8x32xbf16>, vector<32x96xbf16>, vector<8x96xf32> -> vector<8x96xf32>
    %197 = vector.extract_strided_slice %194 {offsets = [0, 0], sizes = [8, 32], strides = [1, 1]} : vector<8x96xf32> to vector<8x32xf32>
    %198 = vector.extract_strided_slice %196 {offsets = [0, 0], sizes = [8, 32], strides = [1, 1]} : vector<8x96xf32> to vector<8x32xf32>
    %199 = arith.addf %197, %198 : vector<8x32xf32>
    %200 = arith.negf %199 : vector<8x32xf32>
    %201 = math.exp %200 : vector<8x32xf32>
    %cst_45 = arith.constant 1.000000e+00 : f32
    %202 = vector.broadcast %cst_45 : f32 to vector<8x32xf32>
    %203 = arith.addf %202, %201 : vector<8x32xf32>
    %204 = arith.divf %202, %203 : vector<8x32xf32>
    %205 = vector.extract_strided_slice %194 {offsets = [0, 32], sizes = [8, 32], strides = [1, 1]} : vector<8x96xf32> to vector<8x32xf32>
    %206 = vector.extract_strided_slice %196 {offsets = [0, 32], sizes = [8, 32], strides = [1, 1]} : vector<8x96xf32> to vector<8x32xf32>
    %207 = arith.addf %205, %206 : vector<8x32xf32>
    %208 = arith.negf %207 : vector<8x32xf32>
    %209 = math.exp %208 : vector<8x32xf32>
    %cst_46 = arith.constant 1.000000e+00 : f32
    %210 = vector.broadcast %cst_46 : f32 to vector<8x32xf32>
    %211 = arith.addf %210, %209 : vector<8x32xf32>
    %212 = arith.divf %210, %211 : vector<8x32xf32>
    %213 = vector.extract_strided_slice %194 {offsets = [0, 64], sizes = [8, 32], strides = [1, 1]} : vector<8x96xf32> to vector<8x32xf32>
    %214 = vector.extract_strided_slice %196 {offsets = [0, 64], sizes = [8, 32], strides = [1, 1]} : vector<8x96xf32> to vector<8x32xf32>
    %215 = vector.broadcast %36 : vector<1x32xf32> to vector<8x32xf32>
    %216 = arith.addf %214, %215 : vector<8x32xf32>
    %217 = arith.mulf %204, %216 : vector<8x32xf32>
    %218 = arith.addf %213, %217 : vector<8x32xf32>
    %219 = math.tanh %218 : vector<8x32xf32>
    %cst_47 = arith.constant 1.000000e+00 : f32
    %220 = vector.broadcast %cst_47 : f32 to vector<8x32xf32>
    %221 = arith.subf %220, %212 : vector<8x32xf32>
    %222 = arith.mulf %221, %219 : vector<8x32xf32>
    %223 = arith.mulf %212, %193 : vector<8x32xf32>
    %224 = arith.addf %222, %223 : vector<8x32xf32>
    %225 = vector.extract_strided_slice %28 {offsets = [0, 4], sizes = [8, 1], strides = [1, 1]} : vector<8x8xf32> to vector<8x1xf32>
    %226 = vector.broadcast %225 : vector<8x1xf32> to vector<8x32xf32>
    %227 = arith.mulf %226, %224 : vector<8x32xf32>
    %cst_48 = arith.constant 1.000000e+00 : f32
    %228 = vector.broadcast %cst_48 : f32 to vector<8x1xf32>
    %229 = arith.subf %228, %225 : vector<8x1xf32>
    %230 = vector.broadcast %229 : vector<8x1xf32> to vector<8x32xf32>
    %231 = arith.mulf %230, %193 : vector<8x32xf32>
    %232 = arith.addf %227, %231 : vector<8x32xf32>
    %233 = vector.extract_strided_slice %16 {offsets = [40, 0], sizes = [8, 96], strides = [1, 1]} : vector<64x96xf32> to vector<8x96xf32>
    %234 = arith.truncf %232 : vector<8x32xf32> to vector<8x32xbf16>
    %cst_49 = arith.constant dense<0.000000e+00> : vector<8x96xf32>
    %235 = tpu.matmul %234, %35, %cst_49 {dimension_numbers = #tpu.dot_dimension_numbers<[1], [0], [0], [1], [0, 0, 1, 1], [], []>} : vector<8x32xbf16>, vector<32x96xbf16>, vector<8x96xf32> -> vector<8x96xf32>
    %236 = vector.extract_strided_slice %233 {offsets = [0, 0], sizes = [8, 32], strides = [1, 1]} : vector<8x96xf32> to vector<8x32xf32>
    %237 = vector.extract_strided_slice %235 {offsets = [0, 0], sizes = [8, 32], strides = [1, 1]} : vector<8x96xf32> to vector<8x32xf32>
    %238 = arith.addf %236, %237 : vector<8x32xf32>
    %239 = arith.negf %238 : vector<8x32xf32>
    %240 = math.exp %239 : vector<8x32xf32>
    %cst_50 = arith.constant 1.000000e+00 : f32
    %241 = vector.broadcast %cst_50 : f32 to vector<8x32xf32>
    %242 = arith.addf %241, %240 : vector<8x32xf32>
    %243 = arith.divf %241, %242 : vector<8x32xf32>
    %244 = vector.extract_strided_slice %233 {offsets = [0, 32], sizes = [8, 32], strides = [1, 1]} : vector<8x96xf32> to vector<8x32xf32>
    %245 = vector.extract_strided_slice %235 {offsets = [0, 32], sizes = [8, 32], strides = [1, 1]} : vector<8x96xf32> to vector<8x32xf32>
    %246 = arith.addf %244, %245 : vector<8x32xf32>
    %247 = arith.negf %246 : vector<8x32xf32>
    %248 = math.exp %247 : vector<8x32xf32>
    %cst_51 = arith.constant 1.000000e+00 : f32
    %249 = vector.broadcast %cst_51 : f32 to vector<8x32xf32>
    %250 = arith.addf %249, %248 : vector<8x32xf32>
    %251 = arith.divf %249, %250 : vector<8x32xf32>
    %252 = vector.extract_strided_slice %233 {offsets = [0, 64], sizes = [8, 32], strides = [1, 1]} : vector<8x96xf32> to vector<8x32xf32>
    %253 = vector.extract_strided_slice %235 {offsets = [0, 64], sizes = [8, 32], strides = [1, 1]} : vector<8x96xf32> to vector<8x32xf32>
    %254 = vector.broadcast %36 : vector<1x32xf32> to vector<8x32xf32>
    %255 = arith.addf %253, %254 : vector<8x32xf32>
    %256 = arith.mulf %243, %255 : vector<8x32xf32>
    %257 = arith.addf %252, %256 : vector<8x32xf32>
    %258 = math.tanh %257 : vector<8x32xf32>
    %cst_52 = arith.constant 1.000000e+00 : f32
    %259 = vector.broadcast %cst_52 : f32 to vector<8x32xf32>
    %260 = arith.subf %259, %251 : vector<8x32xf32>
    %261 = arith.mulf %260, %258 : vector<8x32xf32>
    %262 = arith.mulf %251, %232 : vector<8x32xf32>
    %263 = arith.addf %261, %262 : vector<8x32xf32>
    %264 = vector.extract_strided_slice %28 {offsets = [0, 5], sizes = [8, 1], strides = [1, 1]} : vector<8x8xf32> to vector<8x1xf32>
    %265 = vector.broadcast %264 : vector<8x1xf32> to vector<8x32xf32>
    %266 = arith.mulf %265, %263 : vector<8x32xf32>
    %cst_53 = arith.constant 1.000000e+00 : f32
    %267 = vector.broadcast %cst_53 : f32 to vector<8x1xf32>
    %268 = arith.subf %267, %264 : vector<8x1xf32>
    %269 = vector.broadcast %268 : vector<8x1xf32> to vector<8x32xf32>
    %270 = arith.mulf %269, %232 : vector<8x32xf32>
    %271 = arith.addf %266, %270 : vector<8x32xf32>
    %272 = vector.extract_strided_slice %16 {offsets = [48, 0], sizes = [8, 96], strides = [1, 1]} : vector<64x96xf32> to vector<8x96xf32>
    %273 = arith.truncf %271 : vector<8x32xf32> to vector<8x32xbf16>
    %cst_54 = arith.constant dense<0.000000e+00> : vector<8x96xf32>
    %274 = tpu.matmul %273, %35, %cst_54 {dimension_numbers = #tpu.dot_dimension_numbers<[1], [0], [0], [1], [0, 0, 1, 1], [], []>} : vector<8x32xbf16>, vector<32x96xbf16>, vector<8x96xf32> -> vector<8x96xf32>
    %275 = vector.extract_strided_slice %272 {offsets = [0, 0], sizes = [8, 32], strides = [1, 1]} : vector<8x96xf32> to vector<8x32xf32>
    %276 = vector.extract_strided_slice %274 {offsets = [0, 0], sizes = [8, 32], strides = [1, 1]} : vector<8x96xf32> to vector<8x32xf32>
    %277 = arith.addf %275, %276 : vector<8x32xf32>
    %278 = arith.negf %277 : vector<8x32xf32>
    %279 = math.exp %278 : vector<8x32xf32>
    %cst_55 = arith.constant 1.000000e+00 : f32
    %280 = vector.broadcast %cst_55 : f32 to vector<8x32xf32>
    %281 = arith.addf %280, %279 : vector<8x32xf32>
    %282 = arith.divf %280, %281 : vector<8x32xf32>
    %283 = vector.extract_strided_slice %272 {offsets = [0, 32], sizes = [8, 32], strides = [1, 1]} : vector<8x96xf32> to vector<8x32xf32>
    %284 = vector.extract_strided_slice %274 {offsets = [0, 32], sizes = [8, 32], strides = [1, 1]} : vector<8x96xf32> to vector<8x32xf32>
    %285 = arith.addf %283, %284 : vector<8x32xf32>
    %286 = arith.negf %285 : vector<8x32xf32>
    %287 = math.exp %286 : vector<8x32xf32>
    %cst_56 = arith.constant 1.000000e+00 : f32
    %288 = vector.broadcast %cst_56 : f32 to vector<8x32xf32>
    %289 = arith.addf %288, %287 : vector<8x32xf32>
    %290 = arith.divf %288, %289 : vector<8x32xf32>
    %291 = vector.extract_strided_slice %272 {offsets = [0, 64], sizes = [8, 32], strides = [1, 1]} : vector<8x96xf32> to vector<8x32xf32>
    %292 = vector.extract_strided_slice %274 {offsets = [0, 64], sizes = [8, 32], strides = [1, 1]} : vector<8x96xf32> to vector<8x32xf32>
    %293 = vector.broadcast %36 : vector<1x32xf32> to vector<8x32xf32>
    %294 = arith.addf %292, %293 : vector<8x32xf32>
    %295 = arith.mulf %282, %294 : vector<8x32xf32>
    %296 = arith.addf %291, %295 : vector<8x32xf32>
    %297 = math.tanh %296 : vector<8x32xf32>
    %cst_57 = arith.constant 1.000000e+00 : f32
    %298 = vector.broadcast %cst_57 : f32 to vector<8x32xf32>
    %299 = arith.subf %298, %290 : vector<8x32xf32>
    %300 = arith.mulf %299, %297 : vector<8x32xf32>
    %301 = arith.mulf %290, %271 : vector<8x32xf32>
    %302 = arith.addf %300, %301 : vector<8x32xf32>
    %303 = vector.extract_strided_slice %28 {offsets = [0, 6], sizes = [8, 1], strides = [1, 1]} : vector<8x8xf32> to vector<8x1xf32>
    %304 = vector.broadcast %303 : vector<8x1xf32> to vector<8x32xf32>
    %305 = arith.mulf %304, %302 : vector<8x32xf32>
    %cst_58 = arith.constant 1.000000e+00 : f32
    %306 = vector.broadcast %cst_58 : f32 to vector<8x1xf32>
    %307 = arith.subf %306, %303 : vector<8x1xf32>
    %308 = vector.broadcast %307 : vector<8x1xf32> to vector<8x32xf32>
    %309 = arith.mulf %308, %271 : vector<8x32xf32>
    %310 = arith.addf %305, %309 : vector<8x32xf32>
    %311 = vector.extract_strided_slice %16 {offsets = [56, 0], sizes = [8, 96], strides = [1, 1]} : vector<64x96xf32> to vector<8x96xf32>
    %312 = arith.truncf %310 : vector<8x32xf32> to vector<8x32xbf16>
    %cst_59 = arith.constant dense<0.000000e+00> : vector<8x96xf32>
    %313 = tpu.matmul %312, %35, %cst_59 {dimension_numbers = #tpu.dot_dimension_numbers<[1], [0], [0], [1], [0, 0, 1, 1], [], []>} : vector<8x32xbf16>, vector<32x96xbf16>, vector<8x96xf32> -> vector<8x96xf32>
    %314 = vector.extract_strided_slice %311 {offsets = [0, 0], sizes = [8, 32], strides = [1, 1]} : vector<8x96xf32> to vector<8x32xf32>
    %315 = vector.extract_strided_slice %313 {offsets = [0, 0], sizes = [8, 32], strides = [1, 1]} : vector<8x96xf32> to vector<8x32xf32>
    %316 = arith.addf %314, %315 : vector<8x32xf32>
    %317 = arith.negf %316 : vector<8x32xf32>
    %318 = math.exp %317 : vector<8x32xf32>
    %cst_60 = arith.constant 1.000000e+00 : f32
    %319 = vector.broadcast %cst_60 : f32 to vector<8x32xf32>
    %320 = arith.addf %319, %318 : vector<8x32xf32>
    %321 = arith.divf %319, %320 : vector<8x32xf32>
    %322 = vector.extract_strided_slice %311 {offsets = [0, 32], sizes = [8, 32], strides = [1, 1]} : vector<8x96xf32> to vector<8x32xf32>
    %323 = vector.extract_strided_slice %313 {offsets = [0, 32], sizes = [8, 32], strides = [1, 1]} : vector<8x96xf32> to vector<8x32xf32>
    %324 = arith.addf %322, %323 : vector<8x32xf32>
    %325 = arith.negf %324 : vector<8x32xf32>
    %326 = math.exp %325 : vector<8x32xf32>
    %cst_61 = arith.constant 1.000000e+00 : f32
    %327 = vector.broadcast %cst_61 : f32 to vector<8x32xf32>
    %328 = arith.addf %327, %326 : vector<8x32xf32>
    %329 = arith.divf %327, %328 : vector<8x32xf32>
    %330 = vector.extract_strided_slice %311 {offsets = [0, 64], sizes = [8, 32], strides = [1, 1]} : vector<8x96xf32> to vector<8x32xf32>
    %331 = vector.extract_strided_slice %313 {offsets = [0, 64], sizes = [8, 32], strides = [1, 1]} : vector<8x96xf32> to vector<8x32xf32>
    %332 = vector.broadcast %36 : vector<1x32xf32> to vector<8x32xf32>
    %333 = arith.addf %331, %332 : vector<8x32xf32>
    %334 = arith.mulf %321, %333 : vector<8x32xf32>
    %335 = arith.addf %330, %334 : vector<8x32xf32>
    %336 = math.tanh %335 : vector<8x32xf32>
    %cst_62 = arith.constant 1.000000e+00 : f32
    %337 = vector.broadcast %cst_62 : f32 to vector<8x32xf32>
    %338 = arith.subf %337, %329 : vector<8x32xf32>
    %339 = arith.mulf %338, %336 : vector<8x32xf32>
    %340 = arith.mulf %329, %310 : vector<8x32xf32>
    %341 = arith.addf %339, %340 : vector<8x32xf32>
    %342 = vector.extract_strided_slice %28 {offsets = [0, 7], sizes = [8, 1], strides = [1, 1]} : vector<8x8xf32> to vector<8x1xf32>
    %343 = vector.broadcast %342 : vector<8x1xf32> to vector<8x32xf32>
    %344 = arith.mulf %343, %341 : vector<8x32xf32>
    %cst_63 = arith.constant 1.000000e+00 : f32
    %345 = vector.broadcast %cst_63 : f32 to vector<8x1xf32>
    %346 = arith.subf %345, %342 : vector<8x1xf32>
    %347 = vector.broadcast %346 : vector<8x1xf32> to vector<8x32xf32>
    %348 = arith.mulf %347, %310 : vector<8x32xf32>
    %349 = arith.addf %344, %348 : vector<8x32xf32>
    %350 = arith.truncf %349 : vector<8x32xf32> to vector<8x32xbf16>
    %c0_64 = arith.constant 0 : index
    %c0_65 = arith.constant 0 : index
    %351 = vector.load %arg10[%c0_64, %c0_65] : memref<32x32xbf16, #tpu.memory_space<vmem>>, vector<32x32xbf16>
    %cst_66 = arith.constant dense<0.000000e+00> : vector<8x32xf32>
    %352 = tpu.matmul %350, %351, %cst_66 {dimension_numbers = #tpu.dot_dimension_numbers<[1], [0], [0], [1], [0, 0, 1, 1], [], []>} : vector<8x32xbf16>, vector<32x32xbf16>, vector<8x32xf32> -> vector<8x32xf32>
    %c0_67 = arith.constant 0 : index
    %c0_68 = arith.constant 0 : index
    %353 = vector.load %arg11[%c0_67, %c0_68] : memref<1x32xf32, #tpu.memory_space<vmem>>, vector<1x32xf32>
    %354 = vector.broadcast %353 : vector<1x32xf32> to vector<8x32xf32>
    %355 = arith.addf %352, %354 : vector<8x32xf32>
    %356 = vector.extract_strided_slice %355 {offsets = [0, 0], sizes = [8, 16], strides = [1, 1]} : vector<8x32xf32> to vector<8x16xf32>
    %357 = vector.extract_strided_slice %355 {offsets = [0, 16], sizes = [8, 16], strides = [1, 1]} : vector<8x32xf32> to vector<8x16xf32>
    %358 = math.exp %357 : vector<8x16xf32>
    %359 = arith.mulf %356, %356 : vector<8x16xf32>
    %360 = arith.addf %358, %359 : vector<8x16xf32>
    %cst_69 = arith.constant 1.000000e+00 : f32
    %361 = vector.broadcast %cst_69 : f32 to vector<8x16xf32>
    %362 = arith.subf %360, %361 : vector<8x16xf32>
    %363 = arith.subf %362, %357 : vector<8x16xf32>
    %cst_70 = arith.constant dense<0.000000e+00> : vector<8xf32>
    %364 = vector.multi_reduction <add>, %363, %cst_70 [1] : vector<8x16xf32> to vector<8xf32>
    %365 = vector.shape_cast %364 : vector<8xf32> to vector<8x1xf32>
    %cst_71 = arith.constant 5.000000e-01 : f32
    %366 = vector.broadcast %cst_71 : f32 to vector<8x1xf32>
    %367 = arith.mulf %366, %365 : vector<8x1xf32>
    %cst_72 = arith.constant dense<0.000000e+00> : vector<1xf32>
    %368 = vector.multi_reduction <add>, %367, %cst_72 [0] : vector<8x1xf32> to vector<1xf32>
    %369 = vector.shape_cast %368 : vector<1xf32> to vector<1x1xf32>
    %cst_73 = arith.constant 8.000000e+00 : f32
    %370 = vector.broadcast %cst_73 : f32 to vector<1x1xf32>
    %371 = arith.divf %369, %370 : vector<1x1xf32>
    %c0_74 = arith.constant 0 : index
    %c0_75 = arith.constant 0 : index
    %372 = vector.load %arg22[%c0_74, %c0_75] : memref<1x1xf32, #tpu.memory_space<vmem>>, vector<1x1xf32>
    tpu.vector_store %arg22[%c0_74, %c0_75], %371 {strides = array<i32>} : memref<1x1xf32, #tpu.memory_space<vmem>>, vector<1x1xf32>,
    %c0_76 = arith.constant 0 : index
    %c0_77 = arith.constant 0 : index
    %373 = vector.load %arg12[%c0_76, %c0_77] : memref<8x16xf32, #tpu.memory_space<vmem>>, vector<8x16xf32>
    %cst_78 = arith.constant 5.000000e-01 : f32
    %374 = vector.broadcast %cst_78 : f32 to vector<8x16xf32>
    %375 = arith.mulf %374, %357 : vector<8x16xf32>
    %376 = math.exp %375 : vector<8x16xf32>
    %377 = arith.mulf %373, %376 : vector<8x16xf32>
    %378 = arith.addf %377, %356 : vector<8x16xf32>
    %379 = arith.truncf %378 : vector<8x16xf32> to vector<8x16xbf16>
    %c0_79 = arith.constant 0 : index
    %c0_80 = arith.constant 0 : index
    %380 = vector.load %arg13[%c0_79, %c0_80] : memref<16x32xbf16, #tpu.memory_space<vmem>>, vector<16x32xbf16>
    %cst_81 = arith.constant dense<0.000000e+00> : vector<8x32xf32>
    %381 = tpu.matmul %379, %380, %cst_81 {dimension_numbers = #tpu.dot_dimension_numbers<[1], [0], [0], [1], [0, 0, 1, 1], [], []>} : vector<8x16xbf16>, vector<16x32xbf16>, vector<8x32xf32> -> vector<8x32xf32>
    %c0_82 = arith.constant 0 : index
    %c0_83 = arith.constant 0 : index
    %382 = vector.load %arg14[%c0_82, %c0_83] : memref<1x32xf32, #tpu.memory_space<vmem>>, vector<1x32xf32>
    %383 = vector.broadcast %382 : vector<1x32xf32> to vector<8x32xf32>
    %384 = arith.addf %381, %383 : vector<8x32xf32>
    %c0_84 = arith.constant 0 : index
    %c0_85 = arith.constant 0 : index
    %385 = vector.load %arg16[%c0_84, %c0_85] : memref<32x96xbf16, #tpu.memory_space<vmem>>, vector<32x96xbf16>
    %c0_86 = arith.constant 0 : index
    %c0_87 = arith.constant 0 : index
    %386 = vector.load %arg18[%c0_86, %c0_87] : memref<1x32xf32, #tpu.memory_space<vmem>>, vector<1x32xf32>
    %387 = vector.extract_strided_slice %22 {offsets = [0, 0], sizes = [8, 96], strides = [1, 1]} : vector<56x96xf32> to vector<8x96xf32>
    %388 = arith.truncf %384 : vector<8x32xf32> to vector<8x32xbf16>
    %cst_88 = arith.constant dense<0.000000e+00> : vector<8x96xf32>
    %389 = tpu.matmul %388, %385, %cst_88 {dimension_numbers = #tpu.dot_dimension_numbers<[1], [0], [0], [1], [0, 0, 1, 1], [], []>} : vector<8x32xbf16>, vector<32x96xbf16>, vector<8x96xf32> -> vector<8x96xf32>
    %390 = vector.extract_strided_slice %387 {offsets = [0, 0], sizes = [8, 32], strides = [1, 1]} : vector<8x96xf32> to vector<8x32xf32>
    %391 = vector.extract_strided_slice %389 {offsets = [0, 0], sizes = [8, 32], strides = [1, 1]} : vector<8x96xf32> to vector<8x32xf32>
    %392 = arith.addf %390, %391 : vector<8x32xf32>
    %393 = arith.negf %392 : vector<8x32xf32>
    %394 = math.exp %393 : vector<8x32xf32>
    %cst_89 = arith.constant 1.000000e+00 : f32
    %395 = vector.broadcast %cst_89 : f32 to vector<8x32xf32>
    %396 = arith.addf %395, %394 : vector<8x32xf32>
    %397 = arith.divf %395, %396 : vector<8x32xf32>
    %398 = vector.extract_strided_slice %387 {offsets = [0, 32], sizes = [8, 32], strides = [1, 1]} : vector<8x96xf32> to vector<8x32xf32>
    %399 = vector.extract_strided_slice %389 {offsets = [0, 32], sizes = [8, 32], strides = [1, 1]} : vector<8x96xf32> to vector<8x32xf32>
    %400 = arith.addf %398, %399 : vector<8x32xf32>
    %401 = arith.negf %400 : vector<8x32xf32>
    %402 = math.exp %401 : vector<8x32xf32>
    %cst_90 = arith.constant 1.000000e+00 : f32
    %403 = vector.broadcast %cst_90 : f32 to vector<8x32xf32>
    %404 = arith.addf %403, %402 : vector<8x32xf32>
    %405 = arith.divf %403, %404 : vector<8x32xf32>
    %406 = vector.extract_strided_slice %387 {offsets = [0, 64], sizes = [8, 32], strides = [1, 1]} : vector<8x96xf32> to vector<8x32xf32>
    %407 = vector.extract_strided_slice %389 {offsets = [0, 64], sizes = [8, 32], strides = [1, 1]} : vector<8x96xf32> to vector<8x32xf32>
    %408 = vector.broadcast %386 : vector<1x32xf32> to vector<8x32xf32>
    %409 = arith.addf %407, %408 : vector<8x32xf32>
    %410 = arith.mulf %397, %409 : vector<8x32xf32>
    %411 = arith.addf %406, %410 : vector<8x32xf32>
    %412 = math.tanh %411 : vector<8x32xf32>
    %cst_91 = arith.constant 1.000000e+00 : f32
    %413 = vector.broadcast %cst_91 : f32 to vector<8x32xf32>
    %414 = arith.subf %413, %405 : vector<8x32xf32>
    %415 = arith.mulf %414, %412 : vector<8x32xf32>
    %416 = arith.mulf %405, %384 : vector<8x32xf32>
    %417 = arith.addf %415, %416 : vector<8x32xf32>
    %418 = vector.extract_strided_slice %34 {offsets = [0, 0], sizes = [8, 1], strides = [1, 1]} : vector<8x7xf32> to vector<8x1xf32>
    %419 = vector.broadcast %418 : vector<8x1xf32> to vector<8x32xf32>
    %420 = arith.mulf %419, %417 : vector<8x32xf32>
    %cst_92 = arith.constant 1.000000e+00 : f32
    %421 = vector.broadcast %cst_92 : f32 to vector<8x1xf32>
    %422 = arith.subf %421, %418 : vector<8x1xf32>
    %423 = vector.broadcast %422 : vector<8x1xf32> to vector<8x32xf32>
    %424 = arith.mulf %423, %384 : vector<8x32xf32>
    %425 = arith.addf %420, %424 : vector<8x32xf32>
    %426 = vector.extract_strided_slice %22 {offsets = [8, 0], sizes = [8, 96], strides = [1, 1]} : vector<56x96xf32> to vector<8x96xf32>
    %427 = arith.truncf %425 : vector<8x32xf32> to vector<8x32xbf16>
    %cst_93 = arith.constant dense<0.000000e+00> : vector<8x96xf32>
    %428 = tpu.matmul %427, %385, %cst_93 {dimension_numbers = #tpu.dot_dimension_numbers<[1], [0], [0], [1], [0, 0, 1, 1], [], []>} : vector<8x32xbf16>, vector<32x96xbf16>, vector<8x96xf32> -> vector<8x96xf32>
    %429 = vector.extract_strided_slice %426 {offsets = [0, 0], sizes = [8, 32], strides = [1, 1]} : vector<8x96xf32> to vector<8x32xf32>
    %430 = vector.extract_strided_slice %428 {offsets = [0, 0], sizes = [8, 32], strides = [1, 1]} : vector<8x96xf32> to vector<8x32xf32>
    %431 = arith.addf %429, %430 : vector<8x32xf32>
    %432 = arith.negf %431 : vector<8x32xf32>
    %433 = math.exp %432 : vector<8x32xf32>
    %cst_94 = arith.constant 1.000000e+00 : f32
    %434 = vector.broadcast %cst_94 : f32 to vector<8x32xf32>
    %435 = arith.addf %434, %433 : vector<8x32xf32>
    %436 = arith.divf %434, %435 : vector<8x32xf32>
    %437 = vector.extract_strided_slice %426 {offsets = [0, 32], sizes = [8, 32], strides = [1, 1]} : vector<8x96xf32> to vector<8x32xf32>
    %438 = vector.extract_strided_slice %428 {offsets = [0, 32], sizes = [8, 32], strides = [1, 1]} : vector<8x96xf32> to vector<8x32xf32>
    %439 = arith.addf %437, %438 : vector<8x32xf32>
    %440 = arith.negf %439 : vector<8x32xf32>
    %441 = math.exp %440 : vector<8x32xf32>
    %cst_95 = arith.constant 1.000000e+00 : f32
    %442 = vector.broadcast %cst_95 : f32 to vector<8x32xf32>
    %443 = arith.addf %442, %441 : vector<8x32xf32>
    %444 = arith.divf %442, %443 : vector<8x32xf32>
    %445 = vector.extract_strided_slice %426 {offsets = [0, 64], sizes = [8, 32], strides = [1, 1]} : vector<8x96xf32> to vector<8x32xf32>
    %446 = vector.extract_strided_slice %428 {offsets = [0, 64], sizes = [8, 32], strides = [1, 1]} : vector<8x96xf32> to vector<8x32xf32>
    %447 = vector.broadcast %386 : vector<1x32xf32> to vector<8x32xf32>
    %448 = arith.addf %446, %447 : vector<8x32xf32>
    %449 = arith.mulf %436, %448 : vector<8x32xf32>
    %450 = arith.addf %445, %449 : vector<8x32xf32>
    %451 = math.tanh %450 : vector<8x32xf32>
    %cst_96 = arith.constant 1.000000e+00 : f32
    %452 = vector.broadcast %cst_96 : f32 to vector<8x32xf32>
    %453 = arith.subf %452, %444 : vector<8x32xf32>
    %454 = arith.mulf %453, %451 : vector<8x32xf32>
    %455 = arith.mulf %444, %425 : vector<8x32xf32>
    %456 = arith.addf %454, %455 : vector<8x32xf32>
    %457 = vector.extract_strided_slice %34 {offsets = [0, 1], sizes = [8, 1], strides = [1, 1]} : vector<8x7xf32> to vector<8x1xf32>
    %458 = vector.broadcast %457 : vector<8x1xf32> to vector<8x32xf32>
    %459 = arith.mulf %458, %456 : vector<8x32xf32>
    %cst_97 = arith.constant 1.000000e+00 : f32
    %460 = vector.broadcast %cst_97 : f32 to vector<8x1xf32>
    %461 = arith.subf %460, %457 : vector<8x1xf32>
    %462 = vector.broadcast %461 : vector<8x1xf32> to vector<8x32xf32>
    %463 = arith.mulf %462, %425 : vector<8x32xf32>
    %464 = arith.addf %459, %463 : vector<8x32xf32>
    %465 = vector.extract_strided_slice %22 {offsets = [16, 0], sizes = [8, 96], strides = [1, 1]} : vector<56x96xf32> to vector<8x96xf32>
    %466 = arith.truncf %464 : vector<8x32xf32> to vector<8x32xbf16>
    %cst_98 = arith.constant dense<0.000000e+00> : vector<8x96xf32>
    %467 = tpu.matmul %466, %385, %cst_98 {dimension_numbers = #tpu.dot_dimension_numbers<[1], [0], [0], [1], [0, 0, 1, 1], [], []>} : vector<8x32xbf16>, vector<32x96xbf16>, vector<8x96xf32> -> vector<8x96xf32>
    %468 = vector.extract_strided_slice %465 {offsets = [0, 0], sizes = [8, 32], strides = [1, 1]} : vector<8x96xf32> to vector<8x32xf32>
    %469 = vector.extract_strided_slice %467 {offsets = [0, 0], sizes = [8, 32], strides = [1, 1]} : vector<8x96xf32> to vector<8x32xf32>
    %470 = arith.addf %468, %469 : vector<8x32xf32>
    %471 = arith.negf %470 : vector<8x32xf32>
    %472 = math.exp %471 : vector<8x32xf32>
    %cst_99 = arith.constant 1.000000e+00 : f32
    %473 = vector.broadcast %cst_99 : f32 to vector<8x32xf32>
    %474 = arith.addf %473, %472 : vector<8x32xf32>
    %475 = arith.divf %473, %474 : vector<8x32xf32>
    %476 = vector.extract_strided_slice %465 {offsets = [0, 32], sizes = [8, 32], strides = [1, 1]} : vector<8x96xf32> to vector<8x32xf32>
    %477 = vector.extract_strided_slice %467 {offsets = [0, 32], sizes = [8, 32], strides = [1, 1]} : vector<8x96xf32> to vector<8x32xf32>
    %478 = arith.addf %476, %477 : vector<8x32xf32>
    %479 = arith.negf %478 : vector<8x32xf32>
    %480 = math.exp %479 : vector<8x32xf32>
    %cst_100 = arith.constant 1.000000e+00 : f32
    %481 = vector.broadcast %cst_100 : f32 to vector<8x32xf32>
    %482 = arith.addf %481, %480 : vector<8x32xf32>
    %483 = arith.divf %481, %482 : vector<8x32xf32>
    %484 = vector.extract_strided_slice %465 {offsets = [0, 64], sizes = [8, 32], strides = [1, 1]} : vector<8x96xf32> to vector<8x32xf32>
    %485 = vector.extract_strided_slice %467 {offsets = [0, 64], sizes = [8, 32], strides = [1, 1]} : vector<8x96xf32> to vector<8x32xf32>
    %486 = vector.broadcast %386 : vector<1x32xf32> to vector<8x32xf32>
    %487 = arith.addf %485, %486 : vector<8x32xf32>
    %488 = arith.mulf %475, %487 : vector<8x32xf32>
    %489 = arith.addf %484, %488 : vector<8x32xf32>
    %490 = math.tanh %489 : vector<8x32xf32>
    %cst_101 = arith.constant 1.000000e+00 : f32
    %491 = vector.broadcast %cst_101 : f32 to vector<8x32xf32>
    %492 = arith.subf %491, %483 : vector<8x32xf32>
    %493 = arith.mulf %492, %490 : vector<8x32xf32>
    %494 = arith.mulf %483, %464 : vector<8x32xf32>
    %495 = arith.addf %493, %494 : vector<8x32xf32>
    %496 = vector.extract_strided_slice %34 {offsets = [0, 2], sizes = [8, 1], strides = [1, 1]} : vector<8x7xf32> to vector<8x1xf32>
    %497 = vector.broadcast %496 : vector<8x1xf32> to vector<8x32xf32>
    %498 = arith.mulf %497, %495 : vector<8x32xf32>
    %cst_102 = arith.constant 1.000000e+00 : f32
    %499 = vector.broadcast %cst_102 : f32 to vector<8x1xf32>
    %500 = arith.subf %499, %496 : vector<8x1xf32>
    %501 = vector.broadcast %500 : vector<8x1xf32> to vector<8x32xf32>
    %502 = arith.mulf %501, %464 : vector<8x32xf32>
    %503 = arith.addf %498, %502 : vector<8x32xf32>
    %504 = vector.extract_strided_slice %22 {offsets = [24, 0], sizes = [8, 96], strides = [1, 1]} : vector<56x96xf32> to vector<8x96xf32>
    %505 = arith.truncf %503 : vector<8x32xf32> to vector<8x32xbf16>
    %cst_103 = arith.constant dense<0.000000e+00> : vector<8x96xf32>
    %506 = tpu.matmul %505, %385, %cst_103 {dimension_numbers = #tpu.dot_dimension_numbers<[1], [0], [0], [1], [0, 0, 1, 1], [], []>} : vector<8x32xbf16>, vector<32x96xbf16>, vector<8x96xf32> -> vector<8x96xf32>
    %507 = vector.extract_strided_slice %504 {offsets = [0, 0], sizes = [8, 32], strides = [1, 1]} : vector<8x96xf32> to vector<8x32xf32>
    %508 = vector.extract_strided_slice %506 {offsets = [0, 0], sizes = [8, 32], strides = [1, 1]} : vector<8x96xf32> to vector<8x32xf32>
    %509 = arith.addf %507, %508 : vector<8x32xf32>
    %510 = arith.negf %509 : vector<8x32xf32>
    %511 = math.exp %510 : vector<8x32xf32>
    %cst_104 = arith.constant 1.000000e+00 : f32
    %512 = vector.broadcast %cst_104 : f32 to vector<8x32xf32>
    %513 = arith.addf %512, %511 : vector<8x32xf32>
    %514 = arith.divf %512, %513 : vector<8x32xf32>
    %515 = vector.extract_strided_slice %504 {offsets = [0, 32], sizes = [8, 32], strides = [1, 1]} : vector<8x96xf32> to vector<8x32xf32>
    %516 = vector.extract_strided_slice %506 {offsets = [0, 32], sizes = [8, 32], strides = [1, 1]} : vector<8x96xf32> to vector<8x32xf32>
    %517 = arith.addf %515, %516 : vector<8x32xf32>
    %518 = arith.negf %517 : vector<8x32xf32>
    %519 = math.exp %518 : vector<8x32xf32>
    %cst_105 = arith.constant 1.000000e+00 : f32
    %520 = vector.broadcast %cst_105 : f32 to vector<8x32xf32>
    %521 = arith.addf %520, %519 : vector<8x32xf32>
    %522 = arith.divf %520, %521 : vector<8x32xf32>
    %523 = vector.extract_strided_slice %504 {offsets = [0, 64], sizes = [8, 32], strides = [1, 1]} : vector<8x96xf32> to vector<8x32xf32>
    %524 = vector.extract_strided_slice %506 {offsets = [0, 64], sizes = [8, 32], strides = [1, 1]} : vector<8x96xf32> to vector<8x32xf32>
    %525 = vector.broadcast %386 : vector<1x32xf32> to vector<8x32xf32>
    %526 = arith.addf %524, %525 : vector<8x32xf32>
    %527 = arith.mulf %514, %526 : vector<8x32xf32>
    %528 = arith.addf %523, %527 : vector<8x32xf32>
    %529 = math.tanh %528 : vector<8x32xf32>
    %cst_106 = arith.constant 1.000000e+00 : f32
    %530 = vector.broadcast %cst_106 : f32 to vector<8x32xf32>
    %531 = arith.subf %530, %522 : vector<8x32xf32>
    %532 = arith.mulf %531, %529 : vector<8x32xf32>
    %533 = arith.mulf %522, %503 : vector<8x32xf32>
    %534 = arith.addf %532, %533 : vector<8x32xf32>
    %535 = vector.extract_strided_slice %34 {offsets = [0, 3], sizes = [8, 1], strides = [1, 1]} : vector<8x7xf32> to vector<8x1xf32>
    %536 = vector.broadcast %535 : vector<8x1xf32> to vector<8x32xf32>
    %537 = arith.mulf %536, %534 : vector<8x32xf32>
    %cst_107 = arith.constant 1.000000e+00 : f32
    %538 = vector.broadcast %cst_107 : f32 to vector<8x1xf32>
    %539 = arith.subf %538, %535 : vector<8x1xf32>
    %540 = vector.broadcast %539 : vector<8x1xf32> to vector<8x32xf32>
    %541 = arith.mulf %540, %503 : vector<8x32xf32>
    %542 = arith.addf %537, %541 : vector<8x32xf32>
    %543 = vector.extract_strided_slice %22 {offsets = [32, 0], sizes = [8, 96], strides = [1, 1]} : vector<56x96xf32> to vector<8x96xf32>
    %544 = arith.truncf %542 : vector<8x32xf32> to vector<8x32xbf16>
    %cst_108 = arith.constant dense<0.000000e+00> : vector<8x96xf32>
    %545 = tpu.matmul %544, %385, %cst_108 {dimension_numbers = #tpu.dot_dimension_numbers<[1], [0], [0], [1], [0, 0, 1, 1], [], []>} : vector<8x32xbf16>, vector<32x96xbf16>, vector<8x96xf32> -> vector<8x96xf32>
    %546 = vector.extract_strided_slice %543 {offsets = [0, 0], sizes = [8, 32], strides = [1, 1]} : vector<8x96xf32> to vector<8x32xf32>
    %547 = vector.extract_strided_slice %545 {offsets = [0, 0], sizes = [8, 32], strides = [1, 1]} : vector<8x96xf32> to vector<8x32xf32>
    %548 = arith.addf %546, %547 : vector<8x32xf32>
    %549 = arith.negf %548 : vector<8x32xf32>
    %550 = math.exp %549 : vector<8x32xf32>
    %cst_109 = arith.constant 1.000000e+00 : f32
    %551 = vector.broadcast %cst_109 : f32 to vector<8x32xf32>
    %552 = arith.addf %551, %550 : vector<8x32xf32>
    %553 = arith.divf %551, %552 : vector<8x32xf32>
    %554 = vector.extract_strided_slice %543 {offsets = [0, 32], sizes = [8, 32], strides = [1, 1]} : vector<8x96xf32> to vector<8x32xf32>
    %555 = vector.extract_strided_slice %545 {offsets = [0, 32], sizes = [8, 32], strides = [1, 1]} : vector<8x96xf32> to vector<8x32xf32>
    %556 = arith.addf %554, %555 : vector<8x32xf32>
    %557 = arith.negf %556 : vector<8x32xf32>
    %558 = math.exp %557 : vector<8x32xf32>
    %cst_110 = arith.constant 1.000000e+00 : f32
    %559 = vector.broadcast %cst_110 : f32 to vector<8x32xf32>
    %560 = arith.addf %559, %558 : vector<8x32xf32>
    %561 = arith.divf %559, %560 : vector<8x32xf32>
    %562 = vector.extract_strided_slice %543 {offsets = [0, 64], sizes = [8, 32], strides = [1, 1]} : vector<8x96xf32> to vector<8x32xf32>
    %563 = vector.extract_strided_slice %545 {offsets = [0, 64], sizes = [8, 32], strides = [1, 1]} : vector<8x96xf32> to vector<8x32xf32>
    %564 = vector.broadcast %386 : vector<1x32xf32> to vector<8x32xf32>
    %565 = arith.addf %563, %564 : vector<8x32xf32>
    %566 = arith.mulf %553, %565 : vector<8x32xf32>
    %567 = arith.addf %562, %566 : vector<8x32xf32>
    %568 = math.tanh %567 : vector<8x32xf32>
    %cst_111 = arith.constant 1.000000e+00 : f32
    %569 = vector.broadcast %cst_111 : f32 to vector<8x32xf32>
    %570 = arith.subf %569, %561 : vector<8x32xf32>
    %571 = arith.mulf %570, %568 : vector<8x32xf32>
    %572 = arith.mulf %561, %542 : vector<8x32xf32>
    %573 = arith.addf %571, %572 : vector<8x32xf32>
    %574 = vector.extract_strided_slice %34 {offsets = [0, 4], sizes = [8, 1], strides = [1, 1]} : vector<8x7xf32> to vector<8x1xf32>
    %575 = vector.broadcast %574 : vector<8x1xf32> to vector<8x32xf32>
    %576 = arith.mulf %575, %573 : vector<8x32xf32>
    %cst_112 = arith.constant 1.000000e+00 : f32
    %577 = vector.broadcast %cst_112 : f32 to vector<8x1xf32>
    %578 = arith.subf %577, %574 : vector<8x1xf32>
    %579 = vector.broadcast %578 : vector<8x1xf32> to vector<8x32xf32>
    %580 = arith.mulf %579, %542 : vector<8x32xf32>
    %581 = arith.addf %576, %580 : vector<8x32xf32>
    %582 = vector.extract_strided_slice %22 {offsets = [40, 0], sizes = [8, 96], strides = [1, 1]} : vector<56x96xf32> to vector<8x96xf32>
    %583 = arith.truncf %581 : vector<8x32xf32> to vector<8x32xbf16>
    %cst_113 = arith.constant dense<0.000000e+00> : vector<8x96xf32>
    %584 = tpu.matmul %583, %385, %cst_113 {dimension_numbers = #tpu.dot_dimension_numbers<[1], [0], [0], [1], [0, 0, 1, 1], [], []>} : vector<8x32xbf16>, vector<32x96xbf16>, vector<8x96xf32> -> vector<8x96xf32>
    %585 = vector.extract_strided_slice %582 {offsets = [0, 0], sizes = [8, 32], strides = [1, 1]} : vector<8x96xf32> to vector<8x32xf32>
    %586 = vector.extract_strided_slice %584 {offsets = [0, 0], sizes = [8, 32], strides = [1, 1]} : vector<8x96xf32> to vector<8x32xf32>
    %587 = arith.addf %585, %586 : vector<8x32xf32>
    %588 = arith.negf %587 : vector<8x32xf32>
    %589 = math.exp %588 : vector<8x32xf32>
    %cst_114 = arith.constant 1.000000e+00 : f32
    %590 = vector.broadcast %cst_114 : f32 to vector<8x32xf32>
    %591 = arith.addf %590, %589 : vector<8x32xf32>
    %592 = arith.divf %590, %591 : vector<8x32xf32>
    %593 = vector.extract_strided_slice %582 {offsets = [0, 32], sizes = [8, 32], strides = [1, 1]} : vector<8x96xf32> to vector<8x32xf32>
    %594 = vector.extract_strided_slice %584 {offsets = [0, 32], sizes = [8, 32], strides = [1, 1]} : vector<8x96xf32> to vector<8x32xf32>
    %595 = arith.addf %593, %594 : vector<8x32xf32>
    %596 = arith.negf %595 : vector<8x32xf32>
    %597 = math.exp %596 : vector<8x32xf32>
    %cst_115 = arith.constant 1.000000e+00 : f32
    %598 = vector.broadcast %cst_115 : f32 to vector<8x32xf32>
    %599 = arith.addf %598, %597 : vector<8x32xf32>
    %600 = arith.divf %598, %599 : vector<8x32xf32>
    %601 = vector.extract_strided_slice %582 {offsets = [0, 64], sizes = [8, 32], strides = [1, 1]} : vector<8x96xf32> to vector<8x32xf32>
    %602 = vector.extract_strided_slice %584 {offsets = [0, 64], sizes = [8, 32], strides = [1, 1]} : vector<8x96xf32> to vector<8x32xf32>
    %603 = vector.broadcast %386 : vector<1x32xf32> to vector<8x32xf32>
    %604 = arith.addf %602, %603 : vector<8x32xf32>
    %605 = arith.mulf %592, %604 : vector<8x32xf32>
    %606 = arith.addf %601, %605 : vector<8x32xf32>
    %607 = math.tanh %606 : vector<8x32xf32>
    %cst_116 = arith.constant 1.000000e+00 : f32
    %608 = vector.broadcast %cst_116 : f32 to vector<8x32xf32>
    %609 = arith.subf %608, %600 : vector<8x32xf32>
    %610 = arith.mulf %609, %607 : vector<8x32xf32>
    %611 = arith.mulf %600, %581 : vector<8x32xf32>
    %612 = arith.addf %610, %611 : vector<8x32xf32>
    %613 = vector.extract_strided_slice %34 {offsets = [0, 5], sizes = [8, 1], strides = [1, 1]} : vector<8x7xf32> to vector<8x1xf32>
    %614 = vector.broadcast %613 : vector<8x1xf32> to vector<8x32xf32>
    %615 = arith.mulf %614, %612 : vector<8x32xf32>
    %cst_117 = arith.constant 1.000000e+00 : f32
    %616 = vector.broadcast %cst_117 : f32 to vector<8x1xf32>
    %617 = arith.subf %616, %613 : vector<8x1xf32>
    %618 = vector.broadcast %617 : vector<8x1xf32> to vector<8x32xf32>
    %619 = arith.mulf %618, %581 : vector<8x32xf32>
    %620 = arith.addf %615, %619 : vector<8x32xf32>
    %621 = vector.extract_strided_slice %22 {offsets = [48, 0], sizes = [8, 96], strides = [1, 1]} : vector<56x96xf32> to vector<8x96xf32>
    %622 = arith.truncf %620 : vector<8x32xf32> to vector<8x32xbf16>
    %cst_118 = arith.constant dense<0.000000e+00> : vector<8x96xf32>
    %623 = tpu.matmul %622, %385, %cst_118 {dimension_numbers = #tpu.dot_dimension_numbers<[1], [0], [0], [1], [0, 0, 1, 1], [], []>} : vector<8x32xbf16>, vector<32x96xbf16>, vector<8x96xf32> -> vector<8x96xf32>
    %624 = vector.extract_strided_slice %621 {offsets = [0, 0], sizes = [8, 32], strides = [1, 1]} : vector<8x96xf32> to vector<8x32xf32>
    %625 = vector.extract_strided_slice %623 {offsets = [0, 0], sizes = [8, 32], strides = [1, 1]} : vector<8x96xf32> to vector<8x32xf32>
    %626 = arith.addf %624, %625 : vector<8x32xf32>
    %627 = arith.negf %626 : vector<8x32xf32>
    %628 = math.exp %627 : vector<8x32xf32>
    %cst_119 = arith.constant 1.000000e+00 : f32
    %629 = vector.broadcast %cst_119 : f32 to vector<8x32xf32>
    %630 = arith.addf %629, %628 : vector<8x32xf32>
    %631 = arith.divf %629, %630 : vector<8x32xf32>
    %632 = vector.extract_strided_slice %621 {offsets = [0, 32], sizes = [8, 32], strides = [1, 1]} : vector<8x96xf32> to vector<8x32xf32>
    %633 = vector.extract_strided_slice %623 {offsets = [0, 32], sizes = [8, 32], strides = [1, 1]} : vector<8x96xf32> to vector<8x32xf32>
    %634 = arith.addf %632, %633 : vector<8x32xf32>
    %635 = arith.negf %634 : vector<8x32xf32>
    %636 = math.exp %635 : vector<8x32xf32>
    %cst_120 = arith.constant 1.000000e+00 : f32
    %637 = vector.broadcast %cst_120 : f32 to vector<8x32xf32>
    %638 = arith.addf %637, %636 : vector<8x32xf32>
    %639 = arith.divf %637, %638 : vector<8x32xf32>
    %640 = vector.extract_strided_slice %621 {offsets = [0, 64], sizes = [8, 32], strides = [1, 1]} : vector<8x96xf32> to vector<8x32xf32>
    %641 = vector.extract_strided_slice %623 {offsets = [0, 64], sizes = [8, 32], strides = [1, 1]} : vector<8x96xf32> to vector<8x32xf32>
    %642 = vector.broadcast %386 : vector<1x32xf32> to vector<8x32xf32>
    %643 = arith.addf %641, %642 : vector<8x32xf32>
    %644 = arith.mulf %631, %643 : vector<8x32xf32>
    %645 = arith.addf %640, %644 : vector<8x32xf32>
    %646 = math.tanh %645 : vector<8x32xf32>
    %cst_121 = arith.constant 1.000000e+00 : f32
    %647 = vector.broadcast %cst_121 : f32 to vector<8x32xf32>
    %648 = arith.subf %647, %639 : vector<8x32xf32>
    %649 = arith.mulf %648, %646 : vector<8x32xf32>
    %650 = arith.mulf %639, %620 : vector<8x32xf32>
    %651 = arith.addf %649, %650 : vector<8x32xf32>
    %652 = tpu.concatenate %417, %456, %495, %534, %573, %612, %651 in 0 : vector<8x32xf32>, vector<8x32xf32>, vector<8x32xf32>, vector<8x32xf32>, vector<8x32xf32>, vector<8x32xf32>, vector<8x32xf32> -> vector<56x32xf32>
    %653 = arith.truncf %652 : vector<56x32xf32> to vector<56x32xbf16>
    %c0_122 = arith.constant 0 : index
    %c0_123 = arith.constant 0 : index
    %654 = vector.load %arg19[%c0_122, %c0_123] : memref<32x128xbf16, #tpu.memory_space<vmem>>, vector<32x128xbf16>
    %cst_124 = arith.constant dense<0.000000e+00> : vector<56x128xf32>
    %655 = tpu.matmul %653, %654, %cst_124 {dimension_numbers = #tpu.dot_dimension_numbers<[1], [0], [0], [1], [0, 0, 1, 1], [], []>} : vector<56x32xbf16>, vector<32x128xbf16>, vector<56x128xf32> -> vector<56x128xf32>
    %c0_125 = arith.constant 0 : index
    %c0_126 = arith.constant 0 : index
    %656 = vector.load %arg20[%c0_125, %c0_126] : memref<1x128xf32, #tpu.memory_space<vmem>>, vector<1x128xf32>
    %657 = vector.broadcast %656 : vector<1x128xf32> to vector<56x128xf32>
    %658 = arith.addf %655, %657 : vector<56x128xf32>
    %cst_127 = arith.constant dense<0xFF800000> : vector<56xf32>
    %659 = vector.multi_reduction <maximumf>, %658, %cst_127 [1] : vector<56x128xf32> to vector<56xf32>
    %660 = vector.shape_cast %659 : vector<56xf32> to vector<56x1xf32>
    %661 = vector.broadcast %660 : vector<56x1xf32> to vector<56x128xf32>
    %662 = arith.subf %658, %661 : vector<56x128xf32>
    %663 = math.exp %662 : vector<56x128xf32>
    %cst_128 = arith.constant dense<0.000000e+00> : vector<56xf32>
    %664 = vector.multi_reduction <add>, %663, %cst_128 [1] : vector<56x128xf32> to vector<56xf32>
    %665 = vector.shape_cast %664 : vector<56xf32> to vector<56x1xf32>
    %666 = math.log %665 : vector<56x1xf32>
    %667 = arith.addf %660, %666 : vector<56x1xf32>
    %c0_129 = arith.constant 0 : index
    %c0_130 = arith.constant 0 : index
    %668 = vector.load %arg4[%c0_129, %c0_130] : memref<56x1xi32, #tpu.memory_space<vmem>>, vector<56x1xi32>
    %669 = tpu.iota {dimensions = array<i32: 1>} : vector<56x128xi32>
    %670 = vector.broadcast %668 : vector<56x1xi32> to vector<56x128xi32>
    %671 = arith.cmpi eq, %669, %670 : vector<56x128xi32>
    %cst_131 = arith.constant 0.000000e+00 : f32
    %672 = vector.broadcast %cst_131 : f32 to vector<56x128xf32>
    %673 = arith.select %671, %658, %672 : vector<56x128xi1>, vector<56x128xf32>
    %cst_132 = arith.constant dense<0.000000e+00> : vector<56xf32>
    %674 = vector.multi_reduction <add>, %673, %cst_132 [1] : vector<56x128xf32> to vector<56xf32>
    %675 = vector.shape_cast %674 : vector<56xf32> to vector<56x1xf32>
    %676 = arith.subf %667, %675 : vector<56x1xf32>
    %c0_i32 = arith.constant 0 : i32
    %677 = vector.broadcast %c0_i32 : i32 to vector<56x1xi32>
    %678 = arith.cmpi ne, %668, %677 : vector<56x1xi32>
    %679 = arith.extui %678 : vector<56x1xi1> to vector<56x1xi32>
    %680 = arith.sitofp %679 : vector<56x1xi32> to vector<56x1xf32>
    %681 = arith.mulf %676, %680 : vector<56x1xf32>
    %cst_133 = arith.constant dense<0.000000e+00> : vector<1xf32>
    %682 = vector.multi_reduction <add>, %681, %cst_133 [0] : vector<56x1xf32> to vector<1xf32>
    %683 = vector.shape_cast %682 : vector<1xf32> to vector<1x1xf32>
    %cst_134 = arith.constant 1.250000e-01 : f32
    %684 = vector.broadcast %cst_134 : f32 to vector<1x1xf32>
    %685 = arith.mulf %683, %684 : vector<1x1xf32>
    %c0_135 = arith.constant 0 : index
    %c0_136 = arith.constant 0 : index
    %686 = vector.load %arg21[%c0_135, %c0_136] : memref<1x1xf32, #tpu.memory_space<vmem>>, vector<1x1xf32>
    tpu.vector_store %arg21[%c0_135, %c0_136], %685 {strides = array<i32>} : memref<1x1xf32, #tpu.memory_space<vmem>>, vector<1x1xf32>,
    return
  }
  func.func @transform_0(%arg0: i32) -> (i32, i32) {
    %c0_i32 = arith.constant 0 : i32
    %c0_i32_0 = arith.constant 0 : i32
    %c0_i32_1 = arith.constant 0 : i32
    return %c0_i32, %c0_i32_0 : i32, i32
  }
  func.func @transform_1(%arg0: i32) -> (i32, i32) {
    %c0_i32 = arith.constant 0 : i32
    %c0_i32_0 = arith.constant 0 : i32
    %c0_i32_1 = arith.constant 0 : i32
    return %c0_i32, %c0_i32_0 : i32, i32
  }
  func.func @transform_2(%arg0: i32) -> (i32, i32) {
    %c0_i32 = arith.constant 0 : i32
    %c0_i32_0 = arith.constant 0 : i32
    %c0_i32_1 = arith.constant 0 : i32
    return %c0_i32, %c0_i32_0 : i32, i32
  }
  func.func @transform_3(%arg0: i32) -> (i32, i32) {
    %c0_i32 = arith.constant 0 : i32
    %c0_i32_0 = arith.constant 0 : i32
    %c0_i32_1 = arith.constant 0 : i32
    return %c0_i32, %c0_i32_0 : i32, i32
  }
  func.func @transform_4(%arg0: i32) -> (i32, i32) {
    %c0_i32 = arith.constant 0 : i32
    %c0_i32_0 = arith.constant 0 : i32
    %c0_i32_1 = arith.constant 0 : i32
    return %c0_i32, %c0_i32_0 : i32, i32
  }
  func.func @transform_5(%arg0: i32) -> (i32, i32) {
    %c0_i32 = arith.constant 0 : i32
    %c0_i32_0 = arith.constant 0 : i32
    %c0_i32_1 = arith.constant 0 : i32
    return %c0_i32, %c0_i32_0 : i32, i32
  }
  func.func @transform_6(%arg0: i32) -> (i32, i32) {
    %c0_i32 = arith.constant 0 : i32
    %c0_i32_0 = arith.constant 0 : i32
    %c0_i32_1 = arith.constant 0 : i32
    return %c0_i32, %c0_i32_0 : i32, i32
  }
  func.func @transform_7(%arg0: i32) -> (i32, i32) {
    %c0_i32 = arith.constant 0 : i32
    %c0_i32_0 = arith.constant 0 : i32
    %c0_i32_1 = arith.constant 0 : i32
    return %c0_i32, %c0_i32_0 : i32, i32
  }
  func.func @transform_8(%arg0: i32) -> (i32, i32) {
    %c0_i32 = arith.constant 0 : i32
    %c0_i32_0 = arith.constant 0 : i32
    %c0_i32_1 = arith.constant 0 : i32
    return %c0_i32, %c0_i32_0 : i32, i32
  }
  func.func @transform_9(%arg0: i32) -> (i32, i32) {
    %c0_i32 = arith.constant 0 : i32
    %c0_i32_0 = arith.constant 0 : i32
    %c0_i32_1 = arith.constant 0 : i32
    return %c0_i32, %c0_i32_0 : i32, i32
  }
  func.func @transform_10(%arg0: i32) -> (i32, i32) {
    %c0_i32 = arith.constant 0 : i32
    %c0_i32_0 = arith.constant 0 : i32
    %c0_i32_1 = arith.constant 0 : i32
    return %c0_i32, %c0_i32_0 : i32, i32
  }
  func.func @transform_11(%arg0: i32) -> (i32, i32) {
    %c0_i32 = arith.constant 0 : i32
    %c0_i32_0 = arith.constant 0 : i32
    %c0_i32_1 = arith.constant 0 : i32
    return %c0_i32, %c0_i32_0 : i32, i32
  }
  func.func @transform_12(%arg0: i32) -> (i32, i32) {
    %c0_i32 = arith.constant 0 : i32
    %c0_i32_0 = arith.constant 0 : i32
    %c0_i32_1 = arith.constant 0 : i32
    return %c0_i32, %c0_i32_0 : i32, i32
  }
  func.func @transform_13(%arg0: i32) -> (i32, i32) {
    %c0_i32 = arith.constant 0 : i32
    %c0_i32_0 = arith.constant 0 : i32
    %c0_i32_1 = arith.constant 0 : i32
    return %c0_i32, %c0_i32_0 : i32, i32
  }
  func.func @transform_14(%arg0: i32) -> (i32, i32) {
    %c0_i32 = arith.constant 0 : i32
    %c0_i32_0 = arith.constant 0 : i32
    %c0_i32_1 = arith.constant 0 : i32
    return %c0_i32, %c0_i32_0 : i32, i32
  }
  func.func @transform_15(%arg0: i32) -> (i32, i32) {
    %c0_i32 = arith.constant 0 : i32
    %c0_i32_0 = arith.constant 0 : i32
    %c0_i32_1 = arith.constant 0 : i32
    return %c0_i32, %c0_i32_0 : i32, i32
  }
  func.func @transform_16(%arg0: i32) -> (i32, i32) {
    %c0_i32 = arith.constant 0 : i32
    %c0_i32_0 = arith.constant 0 : i32
    %c0_i32_1 = arith.constant 0 : i32
    return %c0_i32, %c0_i32_0 : i32, i32
  }
  func.func @transform_17(%arg0: i32) -> (i32, i32) {
    %c0_i32 = arith.constant 0 : i32
    %c0_i32_0 = arith.constant 0 : i32
    %c0_i32_1 = arith.constant 0 : i32
    return %c0_i32, %c0_i32_0 : i32, i32
  }
  func.func @transform_18(%arg0: i32) -> (i32, i32) {
    %c0_i32 = arith.constant 0 : i32
    %c0_i32_0 = arith.constant 0 : i32
    %c0_i32_1 = arith.constant 0 : i32
    return %c0_i32, %c0_i32_0 : i32, i32
  }
  func.func @transform_19(%arg0: i32) -> (i32, i32) {
    %c0_i32 = arith.constant 0 : i32
    %c0_i32_0 = arith.constant 0 : i32
    %c0_i32_1 = arith.constant 0 : i32
    return %c0_i32, %c0_i32_0 : i32, i32
  }
  func.func @transform_20(%arg0: i32) -> (i32, i32) {
    %c0_i32 = arith.constant 0 : i32
    %c0_i32_0 = arith.constant 0 : i32
    %c0_i32_1 = arith.constant 0 : i32
    return %c0_i32, %c0_i32_0 : i32, i32
  }
  func.func @transform_21(%arg0: i32) -> (i32, i32) {
    %c0_i32 = arith.constant 0 : i32
    %c0_i32_0 = arith.constant 0 : i32
    %c0_i32_1 = arith.constant 0 : i32
    return %c0_i32, %c0_i32_0 : i32, i32
  }
}

</mosaic_0001>

<bundles_post_ra>
// kernel: tpu_custom_call.1
= control target key start
LH: loop header
LB: loop body
LE: loop exit
PB: predicated region body
PF: predicated region fallthrough
CT: control target
= control target key end

     0   :  { %s3812_s0 = inlined_call_operand.vmem [shape: s32[120,1], index: 0, kind: input, shape index: {}]   ;;  %s3813_s1 = inlined_call_operand.vmem [shape: s32[8,1], index: 1, kind: input, shape index: {}]   ;;  %s3814_s2 = inlined_call_operand.vmem [shape: s32[8,1], index: 2, kind: input, shape index: {}]   ;;  %s3815_s3 = inlined_call_operand.vmem [shape: s32[56,1], index: 3, kind: input, shape index: {}]   ;;  %s3816_s4 = inlined_call_operand.vmem [shape: bf16[128,32], index: 4, kind: input, shape index: {}]   ;;  %s3817_s5 = inlined_call_operand.vmem [shape: bf16[32,96], index: 5, kind: input, shape index: {}]   ;;  %s3818_s6 = inlined_call_operand.vmem [shape: bf16[32,96], index: 6, kind: input, shape index: {}]   ;;  %s3819_s7 = inlined_call_operand.vmem [shape: f32[1,96], index: 7, kind: input, shape index: {}]   ;;  %s3820_s8 = inlined_call_operand.vmem [shape: f32[1,32], index: 8, kind: input, shape index: {}]   ;;  %s3821_s9 = inlined_call_operand.vmem [shape: bf16[32,32], index: 9, kind: input, shape index: {}]   ;;  %s3822_s10 = inlined_call_operand.vmem [shape: f32[1,32], index: 10, kind: input, shape index: {}]   ;;  %s3823_s11 = inlined_call_operand.vmem [shape: f32[8,16], index: 11, kind: input, shape index: {}]   ;;  %s3824_s12 = inlined_call_operand.vmem [shape: bf16[16,32], index: 12, kind: input, shape index: {}]   ;;  %s3825_s13 = inlined_call_operand.vmem [shape: f32[1,32], index: 13, kind: input, shape index: {}]   ;;  %s3826_s14 = inlined_call_operand.vmem [shape: bf16[32,96], index: 14, kind: input, shape index: {}]   ;;  %s3827_s15 = inlined_call_operand.vmem [shape: bf16[32,96], index: 15, kind: input, shape index: {}]   ;;  %s3828_s16 = inlined_call_operand.vmem [shape: f32[1,96], index: 16, kind: input, shape index: {}]   ;;  %s3829_s17 = inlined_call_operand.vmem [shape: f32[1,32], index: 17, kind: input, shape index: {}]   ;;  %s3830_s18 = inlined_call_operand.vmem [shape: bf16[32,128], index: 18, kind: input, shape index: {}]   ;;  %s3831_s19 = inlined_call_operand.vmem [shape: f32[1,128], index: 19, kind: input, shape index: {}]   ;;  %s3832_s20 = inlined_call_operand.hbm [shape: f32[1,1], index: 20, kind: output, shape index: {0}]   ;;  %s3833_s21 = inlined_call_operand.hbm [shape: f32[1,1], index: 21, kind: output, shape index: {1}]  }
   0x1   :  { %3838 = sst [smem:[#allocation8_spill]] %s3812_s0 }
   0x2   :  { %3839 = sst [smem:[#allocation9_spill]] %s3813_s1 }
   0x3   :  { %3840 = sst [smem:[#allocation10_spill]] %s3814_s2 }
   0x4   :  { %3841 = sst [smem:[#allocation11_spill]] %s3815_s3 }
   0x5   :  { %3842 = sst [smem:[#allocation12_spill]] %s3816_s4 }
   0x6   :  { %3843 = sst [smem:[#allocation13_spill]] %s3817_s5 }
   0x7   :  { %27 = vsyncpa [#allocation3], 0  ;;  %s3844_s26 = sld [smem:[#allocation8_spill]]  ;;  %v2989_v2 = vmov 0   ;;  %s3845_s2 = sld [smem:[#allocation12_spill]] }
   0x8   :  { %2769 = vset.pattern.permute.xlu1 %v2989_v2  ;;  %2768 = vset.pattern.permute.xlu0 %v2989_v2 }
   0xd   :  { %v72_v0 = vld [vmem:[%s3844_s26 + $0x10] sm:$0xff]  ;;  %v70_v1 = vld [vmem:[%s3844_s26] sm:$0xff]  ;;  %v73_v3 = vld [vmem:[%s3844_s26 + $0x18] sm:$0xff] }
   0xe   :  { %94 = vperm.xlu1 %2769, %v72_v0   ;;  %88 = vperm.xlu0 %2768, %v70_v1   ;;  %v71_v4 = vld [vmem:[%s3844_s26 + $0x8] sm:$0xff]  ;;  %v74_v6 = vld [vmem:[%s3844_s26 + $0x20] sm:$0xff]  ;;  %v77_v9 = vld [vmem:[%s3844_s26 + $0x38] sm:$0xff] }
   0xf   :  { %v75_v5 = vld [vmem:[%s3844_s26 + $0x28] sm:$0xff]  ;;  %v2798_v7 = vld [vmem:[%s3845_s2] sm:$0xff]   ;;  %v76_v10 = vld [vmem:[%s3844_s26 + $0x30] sm:$0xff] }
  0x10   :  { %v2799_v8 = vld [vmem:[%s3845_s2 + $0x8] sm:$0xff]   ;;  %2548 = vmatprep.subr.bf16.mxu0 %v2798_v7  ;;  %v2800_v11 = vld [vmem:[%s3845_s2 + $0x10] sm:$0xff]   ;;  %v78_v13 = vld [vmem:[%s3844_s26 + $0x40] sm:$0xff] }
  0x11   :  { %2549 = vmatpush3.bf16.msra.mxu0 %v2798_v7  ;;  %v79_v12 = vld [vmem:[%s3844_s26 + $0x48] sm:$0xff]  ;;  %v2801_v14 = vld [vmem:[%s3845_s2 + $0x18] sm:$0xff]   ;;  %v80_v16 = vld [vmem:[%s3844_s26 + $0x50] sm:$0xff] }
  0x12   :  { %97 = vperm.xlu1 %2769, %v73_v3   ;;  %91 = vperm.xlu0 %2768, %v71_v4   ;;  %v81_v15 = vld [vmem:[%s3844_s26 + $0x58] sm:$0xff]  ;;  %v2802_v17 = vld [vmem:[%s3845_s2 + $0x20] sm:$0xff]  }
  0x13   :  { %2550 = vmatprep.subr.bf16.mxu0 %v2799_v8 }
  0x15   :  { %2551 = vmatpush3.bf16.msra.mxu0 %v2799_v8 }
  0x16   :  { %103 = vperm.xlu1 %2769, %v75_v5   ;;  %100 = vperm.xlu0 %2768, %v74_v6  }
  0x17   :  { %2552 = vmatprep.subr.bf16.mxu0 %v2800_v11 }
  0x19   :  { %2553 = vmatpush3.bf16.msra.mxu0 %v2800_v11 }
  0x1a   :  { %109 = vperm.xlu1 %2769, %v77_v9   ;;  %106 = vperm.xlu0 %2768, %v76_v10  }
  0x1b   :  { %2554 = vmatprep.subr.bf16.mxu0 %v2801_v14 }
  0x1d   :  { %2555 = vmatpush3.bf16.msra.mxu0 %v2801_v14 }
  0x1e   :  { %115 = vperm.xlu1 %2769, %v79_v12   ;;  %112 = vperm.xlu0 %2768, %v78_v13  }
  0x22   :  { %121 = vperm.xlu1 %2769, %v81_v15   ;;  %118 = vperm.xlu0 %2768, %v80_v16  }
  0x23   :  { %28 = vsyncpa [#allocation5], 0  ;;  %v83_v18 = vld [vmem:[%s3844_s26 + $0x68] sm:$0xff]  ;;  %v82_v19 = vld [vmem:[%s3844_s26 + $0x60] sm:$0xff]  ;;  %2556 = vmatprep.subr.bf16.mxu0 %v2802_v17  ;;  %s2990_s4 = smov 64   ;;  %s3846_s23 = sld [smem:[#allocation9_spill]]  ;;  %v85_v27 = vlaneseq }
  0x24   :  { %v2803_v20 = vld [vmem:[%s3845_s2 + $0x28] sm:$0xff]   ;;  %2557 = vmatpush3.bf16.msra.mxu0 %v2802_v17  ;;  %v2410_v21 = vld [vmem:[%s3820_s8] ss:$0 sm:$0xff]  ;;  %v84_v22 = vld [vmem:[%s3844_s26 + $0x70] sm:$0xff]  ;;  %v2991_v26 = vmov 0.0   ;;  %s3847_s1 = sld [smem:[#allocation13_spill]] }
  0x25   :  { %2558 = vmatprep.subr.bf16.mxu0 %v2803_v20  ;;  %v2804_v23 = vld [vmem:[%s3845_s2 + $0x30] sm:$0xff]   ;;  %v2805_v24 = vld [vmem:[%s3845_s2 + $0x38] sm:$0xff]   ;;  %v3196_v30 = vand.u32 127, %v85_v27  ;;  %v2992_v33 = vmov 1.0|1.0   ;;  %v2808_v50 = vld [vmem:[%s3826_s14] sm:$0xff]  }
  0x26   :  { %127 = vperm.xlu1 %2769, %v83_v18   ;;  %124 = vperm.xlu0 %2768, %v82_v19   ;;  %v3232_v51 = vld [vmem:[%s3818_s6] sm:$0xff]   ;;  %v3239_v52 = vld [vmem:[%s3818_s6 + $0x8] sm:$0xff]   ;;  %s3848_s29 = sld [smem:[#allocation10_spill]]  ;;  %s3006_s6 = smov [#allocation2]  }
  0x27   :  { %v2809_v59 = vld [vmem:[%s3826_s14 + $0x8] sm:$0xff]   ;;  %v2391_v15 = vld [vmem:[%s3819_s7] ss:$0 sm:$0xff]  ;;  %s2345_s14 = sshll.u32 %s3006_s6, 4  ;;  %s2346_s14 = int_to_ptr.vmem [resolvable:$true] %s2345_s14 }
  0x28   :  { %2559 = vmatpush3.bf16.msra.mxu0 %v2803_v20 }
  0x29   :  { %v538_v25 = vld [vmem:[%s3846_s23] sm:$0xff]  ;;  %2560 = vmatprep.subr.bf16.mxu0 %v2804_v23  ;;  %s3004_s23 = smov 16  }
  0x2a   :  { %624 = vrot.lane.b32.xlu1 %v2410_v21, %s2990_s4  ;;  %130 = vperm.xlu0 %2768, %v84_v22   ;;  %v2806_v48 = vld [vmem:[%s3847_s1] sm:$0xff]   ;;  %v2807_v49 = vld [vmem:[%s3847_s1 + $0x8] sm:$0xff]   ;;  %s3849_s1 = sld [smem:[#allocation11_spill]] }
  0x2b   :  { %2580 = vmatprep.subr.bf16.mxu1 %v2806_v48 }
  0x2c   :  { %2561 = vmatpush3.bf16.msra.mxu0 %v2804_v23  ;;  %2581 = vmatpush3.bf16.msra.mxu1 %v2806_v48 }
  0x2d   :  { %2562 = vmatprep.subr.bf16.mxu0 %v2805_v24  ;;  %2582 = vmatprep.subr.bf16.mxu1 %v2807_v49 }
  0x2e   :  { %540 = vperm.xlu1 %2769, %v538_v25  }
  0x30   :  { %2563 = vmatpush3.bf16.msra.mxu0 %v2805_v24  ;;  %2583 = vmatpush3.bf16.msra.mxu1 %v2807_v49 }
  0x31   :  { %2644 = vmatprep.subr.bf16.mxu0 %v2991_v26  ;;  %2592 = vmatprep.subr.bf16.mxu1 %v2808_v50 }
  0x8d   :  { %v95_v28 = vpop.permute.xlu1 %94  ;;  %v89_v29 = vpop.permute.xlu0 %88 }
  0x8e   :  { %vm134_vm0 = vcmp.eq.s32.totalorder %v3196_v30, %v95_v28  ;;  %vm132_vm4 = vcmp.eq.s32.totalorder %v3196_v30, %v89_v29 }
  0x91   :  { %v98_v31 = vpop.permute.xlu1 %97  ;;  %v92_v32 = vpop.permute.xlu0 %91 }
  0x92   :  { %vm135_vm1 = vcmp.eq.s32.totalorder %v3196_v30, %v98_v31  ;;  %vm133_vm2 = vcmp.eq.s32.totalorder %v3196_v30, %v92_v32 }
  0x93   :  { %vm2377_vm3 = vmpackc.low %vm135_vm1, %vm134_vm0 }
  0x94   :  { %vm2375_vm5 = vmpackc.low %vm133_vm2, %vm132_vm4 }
  0x95   :  { %2564 = vmatprep.mubr.msk.bf16.mxu0 %vm2375_vm5, %v2992_v33  ;;  %v104_v34 = vpop.permute.xlu1 %103  ;;  %v101_v35 = vpop.permute.xlu0 %100 }
  0x96   :  { %vm137_vm6 = vcmp.eq.s32.totalorder %v3196_v30, %v104_v34  ;;  %2565 = vmatmul.mubr.msk.bf16.vlgmr.msra.gmra.mrb[0].mxu0 %vm2377_vm3, %v2992_v33  ;;  %vm136_vm7 = vcmp.eq.s32.totalorder %v3196_v30, %v101_v35 }
  0x97   :  { %vm2379_vm8 = vmpackc.low %vm137_vm6, %vm136_vm7  ;;  %2645 = vmatpush3.bf16.msra.mxu0 %v3232_v51 }
  0x98   :  { %2568 = vmatprep.mubr.msk.bf16.mxu0 %vm2379_vm8, %v2992_v33  ;;  %2646 = vmatprep.subr.bf16.mxu0 %v2991_v26  ;;  %vm2993_vm8 = vmmov 0  }
  0x99   :  { %v110_v36 = vpop.permute.xlu1 %109  ;;  %v107_v37 = vpop.permute.xlu0 %106 }
  0x9a   :  { %vm139_vm9 = vcmp.eq.s32.totalorder %v3196_v30, %v110_v36  ;;  %vm138_vm10 = vcmp.eq.s32.totalorder %v3196_v30, %v107_v37 }
  0x9b   :  { %vm2381_vm11 = vmpackc.low %vm139_vm9, %vm138_vm10  ;;  %2647 = vmatpush3.bf16.msra.mxu0 %v3239_v52  ;;  %vm361_vm9 = vcmask 261120  }
  0x9c   :  { %2660 = vmatprep.subr.bf16.mxu0 %v2991_v26 }
  0x9d   :  { %v116_v38 = vpop.permute.xlu1 %115  ;;  %v113_v39 = vpop.permute.xlu0 %112 }
  0x9e   :  { %vm141_vm12 = vcmp.eq.s32.totalorder %v3196_v30, %v116_v38  ;;  %2569 = vmatmul.mubr.msk.bf16.gmra.mrb[4].mxu0 %vm2381_vm11, %v2992_v33  ;;  %vm140_vm13 = vcmp.eq.s32.totalorder %v3196_v30, %v113_v39  ;;  %vm1340_vm11 = vcmask 130048  }
  0x9f   :  { %vm2383_vm14 = vmpackc.low %vm141_vm12, %vm140_vm13 }
  0xa0   :  { %2572 = vmatprep.mubr.msk.bf16.mxu0 %vm2383_vm14, %v2992_v33 }
  0xa1   :  { %v122_v40 = vpop.permute.xlu1 %121  ;;  %v119_v41 = vpop.permute.xlu0 %118 }
  0xa2   :  { %vm143_vm15 = vcmp.eq.s32.totalorder %v3196_v30, %v122_v40  ;;  %vm142_vm0 = vcmp.eq.s32.totalorder %v3196_v30, %v119_v41 }
  0xa3   :  { %vm2385_vm1 = vmpackc.low %vm143_vm15, %vm142_vm0 }
  0xa5   :  { %v128_v42 = vpop.permute.xlu1 %127  ;;  %v125_v43 = vpop.permute.xlu0 %124 }
  0xa6   :  { %vm145_vm2 = vcmp.eq.s32.totalorder %v3196_v30, %v128_v42  ;;  %2573 = vmatmul.mubr.msk.bf16.gmra.mrb[8].mxu0 %vm2385_vm1, %v2992_v33  ;;  %vm144_vm3 = vcmp.eq.s32.totalorder %v3196_v30, %v125_v43 }
  0xa7   :  { %vm2387_vm4 = vmpackc.low %vm145_vm2, %vm144_vm3 }
  0xa8   :  { %2576 = vmatprep.mubr.msk.bf16.mxu0 %vm2387_vm4, %v2992_v33 }
  0xa9   :  { %v3212_v44 = vpop.permute.xlu1 %624  ;;  %v131_v45 = vpop.permute.xlu0 %130 }
  0xaa   :  { %vm146_vm5 = vcmp.eq.s32.totalorder %v3196_v30, %v131_v45 }
  0xab   :  { %vm2389_vm6 = vmpackc.low %vm146_vm5, %vm146_vm5 }
  0xad   :  { %v541_v46 = vpop.permute.xlu1 %540 }
  0xae   :  { %vm542_vm7 = vcmp.gt.s32.totalorder %v541_v46, %v3196_v30  ;;  %2577 = vmatmul.mubr.msk.bf16.gmra.mrb[12].mxu0 %vm2389_vm6, %v2992_v33  ;;  %v3290_v33 = vld [vmem:[%s3828_s16] ss:$0 sm:$0xff]  ;;  %s2994_s16 = smov 96  }
  0xaf   :  { %v3217_v47 = vsel %vm542_vm7, 1.0, %v2991_v26  ;;  %2648 = vmatprep.mubr.msk.bf16.mxu0 %vm2993_vm8, %v2991_v26  ;;  %vm2317_vm7 = vcmask 7168  }
  0xb0   :  { %649 = vperm.xlu1 %2769, %v3217_v47  }
 0x169   :  { %v2566_v53 = vpop.f32.mrb[0].mxu0 }
 0x16a   :  { %v268_v54 = vpop.f32.mrb[1].mxu0 }
 0x16b   :  { %v2567_v55 = vpop.f32.mrb[2].mxu0 }
 0x16c   :  { %v331_v56 = vpack.c.bf16 %v2567_v55, %v2566_v53  ;;  %v271_v57 = vpop.f32.mrb[3].mxu0 }
 0x16d   :  { %v330_v58 = vpack.c.bf16 %v271_v57, %v268_v54 }
 0x16f   :  { %2584 = vmatprep.mubr.msk.bf16.mxu1 %vm361_vm9, %v330_v58 }
 0x170   :  { %2585 = vmatmul.mubr.msk.bf16.vlgmr.msra.gmra.mrb[0].mxu1 %vm361_vm9, %v331_v56 }
 0x171   :  { %2593 = vmatpush3.bf16.msra.mxu1 %v2808_v50  ;;  %v2570_v60 = vpop.f32.mrb[4].mxu0 }
 0x172   :  { %v284_v61 = vpop.f32.mrb[5].mxu0  ;;  %2594 = vmatprep.subr.bf16.mxu1 %v2809_v59 }
 0x173   :  { %v2571_v62 = vpop.f32.mrb[6].mxu0 }
 0x174   :  { %v333_v63 = vpack.c.bf16 %v2571_v62, %v2570_v60  ;;  %v287_v0 = vpop.f32.mrb[7].mxu0 }
 0x175   :  { %v332_v1 = vpack.c.bf16 %v287_v0, %v284_v61  ;;  %2595 = vmatpush3.bf16.msra.mxu1 %v2809_v59 }
 0x176   :  { %2604 = vmatprep.subr.bf16.mxu1 %v2991_v26 }
 0x177   :  { %2588 = vmatprep.mubr.msk.bf16.mxu1 %vm361_vm9, %v332_v1  ;;  %v3316_v1 = vsub.f32 1.0, %v3217_v47 }
 0x178   :  { %2589 = vmatmul.mubr.msk.bf16.gmra.mrb[4].mxu1 %vm361_vm9, %v333_v63 }
 0x179   :  { %v2574_v3 = vpop.f32.mrb[8].mxu0 }
 0x17a   :  { %v300_v4 = vpop.f32.mrb[9].mxu0 }
 0x17b   :  { %v2575_v5 = vpop.f32.mrb[10].mxu0 }
 0x17c   :  { %v335_v6 = vpack.c.bf16 %v2575_v5, %v2574_v3  ;;  %v303_v7 = vpop.f32.mrb[11].mxu0 }
 0x17d   :  { %v334_v8 = vpack.c.bf16 %v303_v7, %v300_v4 }
 0x17f   :  { %2596 = vmatprep.mubr.msk.bf16.mxu1 %vm361_vm9, %v334_v8 }
 0x180   :  { %2597 = vmatmul.mubr.msk.bf16.vlgmr.msra.gmra.mrb[8].mxu1 %vm361_vm9, %v335_v6  ;;  %v650_v6 = vpop.permute.xlu1 %649 }
 0x181   :  { %2605 = vmatpush3.bf16.msra.mxu1 %v3232_v51  ;;  %v2578_v9 = vpop.f32.mrb[12].mxu0 }
 0x182   :  { %v316_v10 = vpop.f32.mrb[13].mxu0  ;;  %2606 = vmatprep.subr.bf16.mxu1 %v2991_v26  ;;  %v337_v14 = vpack.c.bf16 %v2578_v9, %v2578_v9 }
 0x183   :  { %v2579_v11 = vpop.f32.mrb[14].mxu0 }
 0x184   :  { %v319_v12 = vpop.f32.mrb[15].mxu0 }
 0x185   :  { %v336_v13 = vpack.c.bf16 %v319_v12, %v316_v10  ;;  %2607 = vmatpush3.bf16.msra.mxu1 %v3239_v52 }
 0x186   :  { %2612 = vmatprep.subr.bf16.mxu1 %v2991_v26 }
 0x187   :  { %2600 = vmatprep.mubr.msk.bf16.mxu1 %vm361_vm9, %v336_v13 }
 0x188   :  { %2601 = vmatmul.mubr.msk.bf16.gmra.mrb[12].mxu1 %vm361_vm9, %v337_v14 }
 0x189   :  { %2608 = vmatprep.mubr.msk.bf16.mxu1 %vm2993_vm8, %v2991_v26 }
 0x190   :  { %2609 = vmatmul.mubr.bf16.vlgmr.msra.gmra.mrb[16].mxu1 %v2989_v2 }
 0x191   :  { %2613 = vmatpush3.bf16.msra.mxu1 %v3232_v51  ;;  %2616 = vmatprep.mubr.msk.bf16.mxu1 %vm2993_vm8, %v2991_v26 }
 0x192   :  { %2614 = vmatprep.subr.bf16.mxu1 %v2991_v26 }
 0x195   :  { %2615 = vmatpush3.bf16.msra.mxu1 %v3239_v52 }
 0x196   :  { %2620 = vmatprep.subr.bf16.mxu1 %v2991_v26 }
 0x243   :  { %v2586_v16 = vpop.f32.mrb[0].mxu1 }
 0x244   :  { %v3273_v17 = vadd.f32 %v2586_v16, %v2391_v15  ;;  %v408_v18 = vpop.f32.mrb[1].mxu1 }
 0x245   :  { %v2587_v19 = vpop.f32.mrb[2].mxu1  ;;  %v409_v57 = vadd.f32 %v2391_v15, %v408_v18 }
 0x246   :  { %v3275_v20 = vadd.f32 %v2587_v19, %v2391_v15  ;;  %v411_v21 = vpop.f32.mrb[3].mxu1  ;;  %v2995_v19 = vmov 1  }
 0x247   :  { %v3277_v22 = vadd.f32 %v2391_v15, %v411_v21  ;;  %2770 = vset.pattern.permute.xlu1 %v2995_v19 }
 0x24b   :  { %v2590_v23 = vpop.f32.mrb[4].mxu1 }
 0x24c   :  { %v3279_v24 = vadd.f32 %v2590_v23, %v2391_v15  ;;  %v424_v25 = vpop.f32.mrb[5].mxu1 }
 0x24d   :  { %v3281_v27 = vadd.f32 %v2391_v15, %v424_v25  ;;  %v2591_v28 = vpop.f32.mrb[6].mxu1 }
 0x24e   :  { %v3283_v29 = vadd.f32 %v2591_v28, %v2391_v15  ;;  %v427_v31 = vpop.f32.mrb[7].mxu1 }
 0x24f   :  { %v3285_v32 = vadd.f32 %v2391_v15, %v427_v31 }
 0x253   :  { %v2598_v34 = vpop.f32.mrb[8].mxu1 }
 0x254   :  { %v3293_v35 = vadd.f32 %v2598_v34, %v3290_v33  ;;  %v3295_v36 = vpop.f32.mrb[9].mxu1 }
 0x255   :  { %v2599_v37 = vpop.f32.mrb[10].mxu1 }
 0x256   :  { %v3298_v38 = vadd.f32 %v2599_v37, %v3290_v33  ;;  %v511_v39 = vpop.f32.mrb[11].mxu1 }
 0x257   :  { %v3301_v40 = vadd.f32 %v3290_v33, %v511_v39 }
 0x25b   :  { %v2602_v41 = vpop.f32.mrb[12].mxu1 }
 0x25c   :  { %v3304_v42 = vadd.f32 %v2602_v41, %v3290_v33  ;;  %v524_v43 = vpop.f32.mrb[13].mxu1 }
 0x25d   :  { %v3307_v45 = vadd.f32 %v3290_v33, %v524_v43  ;;  %v2603_v46 = vpop.f32.mrb[14].mxu1 }
 0x25e   :  { %v527_v48 = vpop.f32.mrb[15].mxu1 }
 0x25f   :  { %v3310_v49 = vadd.f32 %v3290_v33, %v527_v48 }
 0x263   :  { %v606_v50 = vpop.f32.mrb[16].mxu1 }
 0x264   :  { %v627_v53 = vadd.f32 %v3212_v44, %v606_v50  ;;  %v2610_v54 = vpop.f32.mrb[17].mxu1  ;;  %v612_v58 = vadd.f32 %v606_v50, %v409_v57 }
 0x265   :  { %v609_v55 = vpop.f32.mrb[18].mxu1 }
 0x266   :  { %629 = vrot.lane.b32.xlu0 %v627_v53, %s2990_s4  ;;  %v2611_v56 = vpop.f32.mrb[19].mxu1  ;;  %v2409_v59 = vmul.f32 -1.442695, %v612_v58 }
 0x268   :  { %2819 = vpow2.f32 %v2409_v59 }
 0x272   :  { %v2820_v60 = vpop.eup %2819 }
 0x273   :  { %v616_v61 = vadd.f32 1.0, %v2820_v60 }
 0x275   :  { %2821 = vrcp.f32 %v616_v61 }
 0x27f   :  { %v2822_v62 = vpop.eup %2821 }
 0x280   :  { %v639_v7 = vsub.f32 1.0, %v2822_v62  ;;  %v645_v9 = vmul.f32 0.0, %v2822_v62 }
 0x2d8   :  { %v630_v63 = vpop.permute.xlu0 %629 }
 0x2d9   :  { %v632_v0 = vmul.f32 %v2822_v62, %v630_v63 }
 0x2db   :  { %634 = vrot.lane.b32.xlu0 %v632_v0, %s2990_s4 }
 0x2df   :  { %656 = vperm.xlu0 %2768, %v3316_v1  }
 0x2e3   :  { %2771 = vset.pattern.permute.xlu0 %v2995_v19 }
 0x34d   :  { %v635_v3 = vpop.permute.xlu0 %634 }
 0x34e   :  { %v637_v4 = vadd.f32 %v635_v3, %v409_v57 }
 0x350   :  { %2823 = vtanh.f32 %v637_v4 }
 0x35a   :  { %v2824_v5 = vpop.eup %2823 }
 0x35b   :  { %641 = vrot.lane.b32.xlu1 %v2824_v5, %s2994_s16 }
 0x35e   :  { %v657_v11 = vpop.permute.xlu0 %656 }
 0x35f   :  { %v659_v13 = vmul.f32 0.0, %v657_v11 }
 0x3cd   :  { %v642_v8 = vpop.permute.xlu1 %641 }
 0x3ce   :  { %v644_v10 = vmul.f32 %v642_v8, %v639_v7 }
 0x3d0   :  { %v646_v12 = vadd.f32 %v645_v9, %v644_v10 }
 0x3d2   :  { %v652_v14 = vmul.f32 %v650_v6, %v646_v12 }
 0x3d4   :  { %v660_v15 = vadd.f32 %v659_v13, %v652_v14 }
 0x3d6   :  { %v661_v16 = vpack.c.bf16 %v660_v15, %v660_v15 }
 0x3d8   :  { %663 = vrot.lane.b32.xlu0 %v661_v16, %s2994_s16 }
 0x44a   :  { %v664_v18 = vpop.permute.xlu0 %663 }
 0x44b   :  { %2617 = vmatmul.mubr.msk.bf16.vlgmr.msra.gmra.mrb[20].mxu1 %vm361_vm9, %v664_v18 }
 0x44c   :  { %2621 = vmatpush3.bf16.msra.mxu1 %v3232_v51  ;;  %2624 = vmatprep.mubr.msk.bf16.mxu1 %vm2993_vm8, %v2991_v26 }
 0x44d   :  { %2622 = vmatprep.subr.bf16.mxu1 %v2991_v26 }
 0x450   :  { %2623 = vmatpush3.bf16.msra.mxu1 %v3239_v52 }
 0x451   :  { %2628 = vmatprep.subr.bf16.mxu1 %v2991_v26 }
 0x51e   :  { %v702_v21 = vpop.f32.mrb[20].mxu1 }
 0x51f   :  { %v715_v23 = vadd.f32 %v702_v21, %v3212_v44  ;;  %v2618_v25 = vpop.f32.mrb[21].mxu1  ;;  %v708_v34 = vadd.f32 %v702_v21, %v3277_v22 }
 0x520   :  { %v705_v28 = vpop.f32.mrb[22].mxu1 }
 0x521   :  { %717 = vrot.lane.b32.xlu1 %v715_v23, %s2990_s4  ;;  %v2619_v31 = vpop.f32.mrb[23].mxu1  ;;  %v2412_v37 = vmul.f32 -1.442695, %v708_v34 }
 0x523   :  { %2825 = vpow2.f32 %v2412_v37 }
 0x525   :  { %736 = vperm.xlu1 %2770, %v3217_v47  }
 0x52d   :  { %v2826_v39 = vpop.eup %2825 }
 0x52e   :  { %v712_v41 = vadd.f32 1.0, %v2826_v39 }
 0x530   :  { %2827 = vrcp.f32 %v712_v41 }
 0x53a   :  { %v2828_v43 = vpop.eup %2827 }
 0x53b   :  { %v727_v56 = vsub.f32 1.0, %v2828_v43  ;;  %v733_v58 = vmul.f32 %v2828_v43, %v660_v15 }
 0x593   :  { %v718_v46 = vpop.permute.xlu1 %717 }
 0x594   :  { %v720_v48 = vmul.f32 %v2828_v43, %v718_v46 }
 0x596   :  { %722 = vrot.lane.b32.xlu0 %v720_v48, %s2990_s4 }
 0x59a   :  { %741 = vperm.xlu0 %2771, %v3316_v1  }
 0x5a4   :  { %v737_v55 = vpop.permute.xlu1 %736 }
 0x608   :  { %v723_v50 = vpop.permute.xlu0 %722 }
 0x609   :  { %v725_v53 = vadd.f32 %v723_v50, %v3277_v22  ;;  %v2996_v22 = vmov 2  }
 0x60a   :  { %2772 = vset.pattern.permute.xlu0 %v2996_v22  ;;  %2773 = vset.pattern.permute.xlu1 %v2996_v22 }
 0x60b   :  { %2829 = vtanh.f32 %v725_v53 }
 0x615   :  { %v2830_v54 = vpop.eup %2829 }
 0x616   :  { %729 = vrot.lane.b32.xlu1 %v2830_v54, %s2994_s16 }
 0x619   :  { %v742_v60 = vpop.permute.xlu0 %741 }
 0x61a   :  { %v744_v62 = vmul.f32 %v742_v60, %v660_v15 }
 0x688   :  { %v730_v57 = vpop.permute.xlu1 %729 }
 0x689   :  { %v732_v59 = vmul.f32 %v730_v57, %v727_v56 }
 0x68b   :  { %v734_v61 = vadd.f32 %v733_v58, %v732_v59 }
 0x68d   :  { %v739_v63 = vmul.f32 %v737_v55, %v734_v61 }
 0x68f   :  { %v745_v0 = vadd.f32 %v744_v62, %v739_v63 }
 0x691   :  { %v746_v3 = vpack.c.bf16 %v745_v0, %v745_v0 }
 0x693   :  { %748 = vrot.lane.b32.xlu1 %v746_v3, %s2994_s16 }
 0x705   :  { %v749_v4 = vpop.permute.xlu1 %748 }
 0x706   :  { %2625 = vmatmul.mubr.msk.bf16.vlgmr.msra.gmra.mrb[24].mxu1 %vm361_vm9, %v749_v4 }
 0x707   :  { %2629 = vmatpush3.bf16.msra.mxu1 %v3232_v51  ;;  %2632 = vmatprep.mubr.msk.bf16.mxu1 %vm2993_vm8, %v2991_v26 }
 0x708   :  { %2630 = vmatprep.subr.bf16.mxu1 %v2991_v26 }
 0x70b   :  { %2631 = vmatpush3.bf16.msra.mxu1 %v3239_v52 }
 0x70c   :  { %2636 = vmatprep.subr.bf16.mxu1 %v2991_v26 }
 0x7d9   :  { %v787_v5 = vpop.f32.mrb[24].mxu1 }
 0x7da   :  { %v800_v6 = vadd.f32 %v787_v5, %v3212_v44  ;;  %v2626_v7 = vpop.f32.mrb[25].mxu1  ;;  %v793_v10 = vadd.f32 %v787_v5, %v3273_v17 }
 0x7db   :  { %v790_v8 = vpop.f32.mrb[26].mxu1 }
 0x7dc   :  { %802 = vrot.lane.b32.xlu0 %v800_v6, %s2990_s4  ;;  %v2627_v9 = vpop.f32.mrb[27].mxu1  ;;  %v2414_v11 = vmul.f32 -1.442695, %v793_v10 }
 0x7de   :  { %2831 = vpow2.f32 %v2414_v11 }
 0x7e0   :  { %821 = vperm.xlu0 %2772, %v3217_v47  }
 0x7e8   :  { %v2832_v12 = vpop.eup %2831 }
 0x7e9   :  { %v797_v13 = vadd.f32 1.0, %v2832_v12 }
 0x7eb   :  { %2833 = vrcp.f32 %v797_v13 }
 0x7f5   :  { %v2834_v14 = vpop.eup %2833 }
 0x7f6   :  { %v812_v28 = vsub.f32 1.0, %v2834_v14  ;;  %v818_v34 = vmul.f32 %v2834_v14, %v745_v0 }
 0x84e   :  { %v803_v15 = vpop.permute.xlu0 %802 }
 0x84f   :  { %v805_v16 = vmul.f32 %v2834_v14, %v803_v15 }
 0x851   :  { %807 = vrot.lane.b32.xlu1 %v805_v16, %s2990_s4 }
 0x855   :  { %826 = vperm.xlu1 %2773, %v3316_v1  }
 0x85f   :  { %v822_v41 = vpop.permute.xlu0 %821 }
 0x8c3   :  { %v808_v18 = vpop.permute.xlu1 %807 }
 0x8c4   :  { %v810_v21 = vadd.f32 %v808_v18, %v3273_v17  ;;  %v2997_v17 = vmov 3  }
 0x8c5   :  { %2774 = vset.pattern.permute.xlu1 %v2997_v17  ;;  %2775 = vset.pattern.permute.xlu0 %v2997_v17 }
 0x8c6   :  { %2835 = vtanh.f32 %v810_v21 }
 0x8d0   :  { %v2836_v23 = vpop.eup %2835 }
 0x8d1   :  { %814 = vrot.lane.b32.xlu1 %v2836_v23, %s2994_s16 }
 0x8d4   :  { %v827_v25 = vpop.permute.xlu1 %826 }
 0x8d5   :  { %v829_v43 = vmul.f32 %v827_v25, %v745_v0 }
 0x943   :  { %v815_v31 = vpop.permute.xlu1 %814 }
 0x944   :  { %v817_v37 = vmul.f32 %v815_v31, %v812_v28 }
 0x946   :  { %v819_v39 = vadd.f32 %v818_v34, %v817_v37 }
 0x948   :  { %v824_v46 = vmul.f32 %v822_v41, %v819_v39 }
 0x94a   :  { %v830_v48 = vadd.f32 %v829_v43, %v824_v46 }
 0x94c   :  { %v831_v50 = vpack.c.bf16 %v830_v48, %v830_v48 }
 0x94e   :  { %833 = vrot.lane.b32.xlu0 %v831_v50, %s2994_s16 }
 0x9c0   :  { %v834_v53 = vpop.permute.xlu0 %833 }
 0x9c1   :  { %2633 = vmatmul.mubr.msk.bf16.vlgmr.msra.gmra.mrb[28].mxu1 %vm361_vm9, %v834_v53 }
 0x9c2   :  { %2637 = vmatpush3.bf16.msra.mxu1 %v3232_v51  ;;  %2640 = vmatprep.mubr.msk.bf16.mxu1 %vm2993_vm8, %v2991_v26 }
 0x9c3   :  { %2638 = vmatprep.subr.bf16.mxu1 %v2991_v26 }
 0x9c6   :  { %2639 = vmatpush3.bf16.msra.mxu1 %v3239_v52 }
 0x9c7   :  { %2652 = vmatprep.subr.bf16.mxu1 %v2991_v26 }
 0xa94   :  { %v872_v54 = vpop.f32.mrb[28].mxu1 }
 0xa95   :  { %v885_v55 = vadd.f32 %v872_v54, %v3212_v44  ;;  %v2634_v56 = vpop.f32.mrb[29].mxu1  ;;  %v878_v59 = vadd.f32 %v872_v54, %v3275_v20 }
 0xa96   :  { %v875_v57 = vpop.f32.mrb[30].mxu1 }
 0xa97   :  { %887 = vrot.lane.b32.xlu1 %v885_v55, %s2990_s4  ;;  %v2635_v58 = vpop.f32.mrb[31].mxu1  ;;  %v2416_v60 = vmul.f32 -1.442695, %v878_v59 }
 0xa99   :  { %2837 = vpow2.f32 %v2416_v60 }
 0xa9b   :  { %906 = vperm.xlu1 %2774, %v3217_v47  }
 0xaa3   :  { %v2838_v61 = vpop.eup %2837 }
 0xaa4   :  { %v882_v62 = vadd.f32 1.0, %v2838_v61 }
 0xaa6   :  { %2839 = vrcp.f32 %v882_v62 }
 0xab0   :  { %v2840_v63 = vpop.eup %2839 }
 0xab1   :  { %v897_v8 = vsub.f32 1.0, %v2840_v63  ;;  %v903_v10 = vmul.f32 %v2840_v63, %v830_v48 }
 0xb09   :  { %v888_v0 = vpop.permute.xlu1 %887 }
 0xb0a   :  { %v890_v3 = vmul.f32 %v2840_v63, %v888_v0 }
 0xb0c   :  { %892 = vrot.lane.b32.xlu0 %v890_v3, %s2990_s4 }
 0xb10   :  { %911 = vperm.xlu0 %2775, %v3316_v1  }
 0xb1a   :  { %v907_v7 = vpop.permute.xlu1 %906 }
 0xb7e   :  { %v893_v4 = vpop.permute.xlu0 %892 }
 0xb7f   :  { %v895_v5 = vadd.f32 %v893_v4, %v3275_v20  ;;  %v2998_v20 = vmov 4  }
 0xb80   :  { %2776 = vset.pattern.permute.xlu0 %v2998_v20  ;;  %2777 = vset.pattern.permute.xlu1 %v2998_v20 }
 0xb81   :  { %2841 = vtanh.f32 %v895_v5 }
 0xb8b   :  { %v2842_v6 = vpop.eup %2841 }
 0xb8c   :  { %899 = vrot.lane.b32.xlu1 %v2842_v6, %s2994_s16 }
 0xb8f   :  { %v912_v12 = vpop.permute.xlu0 %911 }
 0xb90   :  { %v914_v14 = vmul.f32 %v912_v12, %v830_v48 }
 0xbfe   :  { %v900_v9 = vpop.permute.xlu1 %899 }
 0xbff   :  { %v902_v11 = vmul.f32 %v900_v9, %v897_v8 }
 0xc01   :  { %v904_v13 = vadd.f32 %v903_v10, %v902_v11 }
 0xc03   :  { %v909_v15 = vmul.f32 %v907_v7, %v904_v13 }
 0xc05   :  { %v915_v16 = vadd.f32 %v914_v14, %v909_v15 }
 0xc07   :  { %v916_v18 = vpack.c.bf16 %v915_v16, %v915_v16 }
 0xc09   :  { %918 = vrot.lane.b32.xlu1 %v916_v18, %s2994_s16 }
 0xc7b   :  { %v919_v21 = vpop.permute.xlu1 %918 }
 0xc7c   :  { %2641 = vmatmul.mubr.msk.bf16.vlgmr.msra.gmra.mrb[32].mxu1 %vm361_vm9, %v919_v21 }
 0xc7d   :  { %2653 = vmatpush3.bf16.msra.mxu1 %v3232_v51  ;;  %2656 = vmatprep.mubr.msk.bf16.mxu1 %vm2993_vm8, %v2991_v26 }
 0xc7e   :  { %2654 = vmatprep.subr.bf16.mxu1 %v2991_v26 }
 0xc81   :  { %2655 = vmatpush3.bf16.msra.mxu1 %v3239_v52 }
 0xc82   :  { %2668 = vmatprep.subr.bf16.mxu1 %v2991_v26 }
 0xd4f   :  { %v957_v23 = vpop.f32.mrb[32].mxu1 }
 0xd50   :  { %v970_v25 = vadd.f32 %v957_v23, %v3212_v44  ;;  %v2642_v28 = vpop.f32.mrb[33].mxu1  ;;  %v963_v37 = vadd.f32 %v957_v23, %v3281_v27 }
 0xd51   :  { %v960_v31 = vpop.f32.mrb[34].mxu1 }
 0xd52   :  { %972 = vrot.lane.b32.xlu0 %v970_v25, %s2990_s4  ;;  %v2643_v34 = vpop.f32.mrb[35].mxu1  ;;  %v2418_v39 = vmul.f32 -1.442695, %v963_v37 }
 0xd54   :  { %2843 = vpow2.f32 %v2418_v39 }
 0xd56   :  { %991 = vperm.xlu0 %2776, %v3217_v47  }
 0xd5e   :  { %v2844_v41 = vpop.eup %2843 }
 0xd5f   :  { %v967_v43 = vadd.f32 1.0, %v2844_v41 }
 0xd61   :  { %2845 = vrcp.f32 %v967_v43 }
 0xd6b   :  { %v2846_v46 = vpop.eup %2845 }
 0xd6c   :  { %v982_v57 = vsub.f32 1.0, %v2846_v46  ;;  %v988_v59 = vmul.f32 %v2846_v46, %v915_v16 }
 0xdc4   :  { %v973_v48 = vpop.permute.xlu0 %972 }
 0xdc5   :  { %v975_v50 = vmul.f32 %v2846_v46, %v973_v48 }
 0xdc7   :  { %977 = vrot.lane.b32.xlu1 %v975_v50, %s2990_s4 }
 0xdcb   :  { %996 = vperm.xlu1 %2777, %v3316_v1  }
 0xdd5   :  { %v992_v62 = vpop.permute.xlu0 %991 }
 0xe39   :  { %v978_v53 = vpop.permute.xlu1 %977 }
 0xe3a   :  { %v980_v54 = vadd.f32 %v978_v53, %v3281_v27  ;;  %v2999_v27 = vmov 5  }
 0xe3b   :  { %2778 = vset.pattern.permute.xlu1 %v2999_v27  ;;  %2779 = vset.pattern.permute.xlu0 %v2999_v27 }
 0xe3c   :  { %2847 = vtanh.f32 %v980_v54 }
 0xe46   :  { %v2848_v55 = vpop.eup %2847 }
 0xe47   :  { %984 = vrot.lane.b32.xlu1 %v2848_v55, %s2994_s16 }
 0xe4a   :  { %v997_v56 = vpop.permute.xlu1 %996 }
 0xe4b   :  { %v999_v63 = vmul.f32 %v997_v56, %v915_v16 }
 0xeb9   :  { %v985_v58 = vpop.permute.xlu1 %984 }
 0xeba   :  { %v987_v60 = vmul.f32 %v985_v58, %v982_v57 }
 0xebc   :  { %v989_v61 = vadd.f32 %v988_v59, %v987_v60 }
 0xebe   :  { %v994_v0 = vmul.f32 %v992_v62, %v989_v61 }
 0xec0   :  { %v1000_v3 = vadd.f32 %v999_v63, %v994_v0 }
 0xec2   :  { %v1001_v4 = vpack.c.bf16 %v1000_v3, %v1000_v3 }
 0xec4   :  { %1003 = vrot.lane.b32.xlu0 %v1001_v4, %s2994_s16 }
 0xf36   :  { %v1004_v5 = vpop.permute.xlu0 %1003 }
 0xf37   :  { %2649 = vmatmul.mubr.msk.bf16.vlgmr.msra.gmra.mrb[16].mxu0 %vm361_vm9, %v1004_v5 }
 0xf38   :  { %2661 = vmatpush3.bf16.msra.mxu0 %v3232_v51  ;;  %2664 = vmatprep.mubr.msk.bf16.mxu0 %vm2993_vm8, %v2991_v26 }
 0xf39   :  { %2662 = vmatprep.subr.bf16.mxu0 %v2991_v26 }
 0xf3c   :  { %2663 = vmatpush3.bf16.msra.mxu0 %v3239_v52 }
 0xf3d   :  { %2676 = vmatprep.subr.bf16.mxu0 %v2991_v26 }
0x100a   :  { %v1042_v6 = vpop.f32.mrb[16].mxu0 }
0x100b   :  { %v1055_v7 = vadd.f32 %v1042_v6, %v3212_v44  ;;  %v2650_v8 = vpop.f32.mrb[17].mxu0  ;;  %v1048_v10 = vadd.f32 %v1042_v6, %v3285_v32 }
0x100c   :  { %v1045_v9 = vpop.f32.mrb[18].mxu0 }
0x100d   :  { %1057 = vrot.lane.b32.xlu1 %v1055_v7, %s2990_s4  ;;  %v2651_v51 = vpop.f32.mrb[19].mxu0  ;;  %v2420_v52 = vmul.f32 -1.442695, %v1048_v10 }
0x100f   :  { %2849 = vpow2.f32 %v2420_v52 }
0x1011   :  { %1076 = vperm.xlu1 %2778, %v3217_v47  }
0x1019   :  { %v2850_v11 = vpop.eup %2849 }
0x101a   :  { %v1052_v12 = vadd.f32 1.0, %v2850_v11 }
0x101c   :  { %2851 = vrcp.f32 %v1052_v12 }
0x1026   :  { %v2852_v13 = vpop.eup %2851 }
0x1027   :  { %v1067_v25 = vsub.f32 1.0, %v2852_v13  ;;  %v1073_v31 = vmul.f32 %v2852_v13, %v1000_v3 }
0x107f   :  { %v1058_v14 = vpop.permute.xlu1 %1057 }
0x1080   :  { %v1060_v15 = vmul.f32 %v2852_v13, %v1058_v14 }
0x1082   :  { %1062 = vrot.lane.b32.xlu0 %v1060_v15, %s2990_s4 }
0x1086   :  { %1081 = vperm.xlu0 %2779, %v3316_v1  }
0x1090   :  { %v1077_v23 = vpop.permute.xlu1 %1076 }
0x10f4   :  { %v1063_v16 = vpop.permute.xlu0 %1062 }
0x10f5   :  { %v1065_v18 = vadd.f32 %v1063_v16, %v3285_v32  ;;  %v3000_v32 = vmov 6  }
0x10f6   :  { %2780 = vset.pattern.permute.xlu0 %v3000_v32  ;;  %2781 = vset.pattern.permute.xlu1 %v3000_v32 }
0x10f7   :  { %2853 = vtanh.f32 %v1065_v18 }
0x1101   :  { %v2854_v21 = vpop.eup %2853 }
0x1102   :  { %1069 = vrot.lane.b32.xlu1 %v2854_v21, %s2994_s16 }
0x1105   :  { %v1082_v37 = vpop.permute.xlu0 %1081 }
0x1106   :  { %v1084_v41 = vmul.f32 %v1082_v37, %v1000_v3 }
0x1174   :  { %v1070_v28 = vpop.permute.xlu1 %1069 }
0x1175   :  { %v1072_v34 = vmul.f32 %v1070_v28, %v1067_v25 }
0x1177   :  { %v1074_v39 = vadd.f32 %v1073_v31, %v1072_v34 }
0x1179   :  { %v1079_v43 = vmul.f32 %v1077_v23, %v1074_v39 }
0x117b   :  { %v1085_v46 = vadd.f32 %v1084_v41, %v1079_v43 }
0x117d   :  { %v1086_v48 = vpack.c.bf16 %v1085_v46, %v1085_v46 }
0x117f   :  { %1088 = vrot.lane.b32.xlu1 %v1086_v48, %s2994_s16 }
0x11f1   :  { %v1089_v50 = vpop.permute.xlu1 %1088 }
0x11f2   :  { %2657 = vmatmul.mubr.msk.bf16.vlgmr.msra.gmra.mrb[36].mxu1 %vm361_vm9, %v1089_v50  ;;  %v2813_v50 = vld [vmem:[%s3821_s9 + $0x8] sm:$0xff]  }
0x11f3   :  { %2672 = vmatprep.mubr.msk.bf16.mxu1 %vm2993_vm8, %v2991_v26 }
0x12c5   :  { %v1127_v53 = vpop.f32.mrb[36].mxu1 }
0x12c6   :  { %v1140_v54 = vadd.f32 %v1127_v53, %v3212_v44  ;;  %v2658_v55 = vpop.f32.mrb[37].mxu1  ;;  %v1133_v58 = vadd.f32 %v1127_v53, %v3279_v24 }
0x12c7   :  { %v1130_v56 = vpop.f32.mrb[38].mxu1 }
0x12c8   :  { %1142 = vrot.lane.b32.xlu0 %v1140_v54, %s2990_s4  ;;  %v2659_v57 = vpop.f32.mrb[39].mxu1  ;;  %v2422_v59 = vmul.f32 -1.442695, %v1133_v58 }
0x12ca   :  { %2855 = vpow2.f32 %v2422_v59 }
0x12cc   :  { %1161 = vperm.xlu0 %2780, %v3217_v47  }
0x12d4   :  { %v2856_v60 = vpop.eup %2855 }
0x12d5   :  { %v1137_v61 = vadd.f32 1.0, %v2856_v60 }
0x12d7   :  { %2857 = vrcp.f32 %v1137_v61 }
0x12e1   :  { %v2858_v62 = vpop.eup %2857 }
0x12e2   :  { %v1152_v7 = vsub.f32 1.0, %v2858_v62  ;;  %v1158_v9 = vmul.f32 %v2858_v62, %v1085_v46 }
0x133a   :  { %v1143_v63 = vpop.permute.xlu0 %1142 }
0x133b   :  { %v1145_v0 = vmul.f32 %v2858_v62, %v1143_v63  ;;  %v2437_v62 = vld [vmem:[%s3829_s17] ss:$0 sm:$0xff] }
0x133c   :  { %v2814_v63 = vld [vmem:[%s3824_s12] sm:$0xff]  }
0x133d   :  { %1147 = vrot.lane.b32.xlu1 %v1145_v0, %s2990_s4  ;;  %v545_v0 = vld [vmem:[%s3848_s29] sm:$0xff] }
0x1341   :  { %1166 = vperm.xlu1 %2781, %v3316_v1  }
0x134b   :  { %v1162_v52 = vpop.permute.xlu0 %1161 }
0x13af   :  { %v1148_v3 = vpop.permute.xlu1 %1147 }
0x13b0   :  { %v1150_v4 = vadd.f32 %v1148_v3, %v3279_v24  ;;  %v3001_v24 = vmov 7   ;;  %v2425_v3 = vld [vmem:[%s3822_s10] ss:$0 sm:$0xff]  ;;  %s3002_s10 = smov 112  }
0x13b1   :  { %2782 = vset.pattern.permute.xlu1 %v3001_v24  ;;  %2783 = vset.pattern.permute.xlu0 %v3001_v24 }
0x13b2   :  { %2859 = vtanh.f32 %v1150_v4 }
0x13bc   :  { %v2860_v5 = vpop.eup %2859 }
0x13bd   :  { %1154 = vrot.lane.b32.xlu1 %v2860_v5, %s2994_s16 }
0x13c0   :  { %v1167_v6 = vpop.permute.xlu1 %1166 }
0x13c1   :  { %v1169_v11 = vmul.f32 %v1167_v6, %v1085_v46  ;;  %v2812_v46 = vld [vmem:[%s3821_s9] sm:$0xff]  }
0x13c2   :  { %2669 = vmatpush3.bf16.msra.mxu1 %v2812_v46 }
0x13c3   :  { %2670 = vmatprep.subr.bf16.mxu1 %v2991_v26 }
0x13c6   :  { %2671 = vmatpush3.bf16.msra.mxu1 %v2813_v50  ;;  %v509_v50 = vadd.f32 %v3290_v33, %v3295_v36 }
0x13c7   :  { %2682 = vmatprep.subr.bf16.mxu1 %v2991_v26 }
0x142f   :  { %v1155_v8 = vpop.permute.xlu1 %1154 }
0x1430   :  { %v1157_v51 = vmul.f32 %v1155_v8, %v1152_v7 }
0x1432   :  { %v1159_v10 = vadd.f32 %v1158_v9, %v1157_v51 }
0x1434   :  { %v1164_v12 = vmul.f32 %v1162_v52, %v1159_v10  ;;  %v3468_v10 = vld [vmem:[%s3827_s15] sm:$0xff]  }
0x1436   :  { %v1170_v13 = vadd.f32 %v1169_v11, %v1164_v12 }
0x1438   :  { %v1171_v14 = vpack.c.bf16 %v1170_v13, %v1170_v13 }
0x143a   :  { %1173 = vrot.lane.b32.xlu0 %v1171_v14, %s2994_s16 }
0x14ac   :  { %v1174_v15 = vpop.permute.xlu0 %1173 }
0x14ad   :  { %2665 = vmatmul.mubr.msk.bf16.vlgmr.msra.gmra.mrb[20].mxu0 %vm361_vm9, %v1174_v15  ;;  %v1355_v15 = vld [vmem:[%s3823_s11] sm:$0xff] }
0x14ae   :  { %2678 = vmatprep.mubr.msk.bf16.mxu0 %vm2993_vm8, %v2991_v26  ;;  %2677 = vmatpush3.bf16.msra.mxu0 %v2814_v63 }
0x14af   :  { %2690 = vmatprep.subr.bf16.mxu0 %v2991_v26 }
0x1580   :  { %v1212_v16 = vpop.f32.mrb[20].mxu0 }
0x1581   :  { %v1225_v18 = vadd.f32 %v1212_v16, %v3212_v44  ;;  %v2666_v21 = vpop.f32.mrb[21].mxu0  ;;  %v1218_v28 = vadd.f32 %v1212_v16, %v3283_v29 }
0x1582   :  { %v1215_v23 = vpop.f32.mrb[22].mxu0 }
0x1583   :  { %1227 = vrot.lane.b32.xlu1 %v1225_v18, %s2990_s4  ;;  %v2667_v25 = vpop.f32.mrb[23].mxu0  ;;  %v2424_v31 = vmul.f32 -1.442695, %v1218_v28  ;;  %v3496_v23 = vld [vmem:[%s3827_s15 + $0x8] sm:$0xff]  }
0x1584   :  { %v2430_v25 = vld [vmem:[%s3825_s13] ss:$0 sm:$0xff]  ;;  %s3003_s13 = smov 32  }
0x1585   :  { %2861 = vpow2.f32 %v2424_v31 }
0x1587   :  { %1246 = vperm.xlu1 %2782, %v3217_v47  }
0x158b   :  { %2784 = vset.pattern.permute.xlu1 %v2989_v2 }
0x158f   :  { %v2862_v34 = vpop.eup %2861 }
0x1590   :  { %v1222_v37 = vadd.f32 1.0, %v2862_v34 }
0x1592   :  { %2863 = vrcp.f32 %v1222_v37 }
0x159c   :  { %v2864_v39 = vpop.eup %2863 }
0x159d   :  { %v1243_v53 = vmul.f32 %v2864_v39, %v1170_v13 }
0x15f5   :  { %v1228_v41 = vpop.permute.xlu1 %1227 }
0x15f6   :  { %v1230_v43 = vmul.f32 %v2864_v39, %v1228_v41 }
0x15f8   :  { %1232 = vrot.lane.b32.xlu0 %v1230_v43, %s2990_s4 }
0x15fc   :  { %1251 = vperm.xlu0 %2783, %v3316_v1  }
0x1600   :  { %2785 = vset.pattern.permute.xlu0 %v2989_v2 }
0x1606   :  { %v1247_v1 = vpop.permute.xlu1 %1246 }
0x166a   :  { %v1233_v44 = vpop.permute.xlu0 %1232 }
0x166b   :  { %v1235_v47 = vadd.f32 %v1233_v44, %v3283_v29  ;;  %v1237_v29 = vsub.f32 1.0, %v2864_v39 }
0x166d   :  { %2865 = vtanh.f32 %v1235_v47 }
0x1677   :  { %v2866_v48 = vpop.eup %2865 }
0x1678   :  { %1239 = vrot.lane.b32.xlu1 %v2866_v48, %s2994_s16 }
0x167b   :  { %v1252_v55 = vpop.permute.xlu0 %1251 }
0x167c   :  { %v1254_v57 = vmul.f32 %v1252_v55, %v1170_v13 }
0x16ea   :  { %v1240_v32 = vpop.permute.xlu1 %1239 }
0x16eb   :  { %v1242_v54 = vmul.f32 %v1240_v32, %v1237_v29 }
0x16ed   :  { %v1244_v56 = vadd.f32 %v1243_v53, %v1242_v54 }
0x16ef   :  { %v1249_v58 = vmul.f32 %v1247_v1, %v1244_v56 }
0x16f1   :  { %v1255_v59 = vadd.f32 %v1254_v57, %v1249_v58 }
0x16f3   :  { %v1256_v60 = vpack.c.bf16 %v1255_v59, %v1255_v59 }
0x16f5   :  { %1269 = vrot.lane.b32.xlu1 %v1256_v60, %s2994_s16 }
0x16f9   :  { %1497 = vrot.lane.b32.xlu1 %v2437_v62, %s2990_s4 }
0x16fd   :  { %547 = vperm.xlu1 %2784, %v545_v0  }
0x1767   :  { %v1270_v61 = vpop.permute.xlu1 %1269 }
0x1768   :  { %2673 = vmatmul.mubr.msk.bf16.vlgmr.msra.gmra.mrb[40].mxu1 %vm361_vm9, %v1270_v61 }
0x1769   :  { %2686 = vmatprep.mubr.msk.bf16.mxu1 %vm2993_vm8, %v2991_v26  ;;  %2683 = vmatpush3.bf16.msra.mxu1 %v3468_v10 }
0x176a   :  { %2684 = vmatprep.subr.bf16.mxu1 %v2991_v26 }
0x176b   :  { %v3472_v52 = vpop.permute.xlu1 %1497 }
0x176d   :  { %2685 = vmatpush3.bf16.msra.mxu1 %v3496_v23 }
0x176e   :  { %2698 = vmatprep.subr.bf16.mxu1 %v2991_v26 }
0x177c   :  { %v548_v12 = vpop.permute.xlu1 %547 }
0x177d   :  { %vm549_vm10 = vcmp.gt.s32.totalorder %v548_v12, %v3196_v30 }
0x177e   :  { %v3477_v13 = vsel %vm549_vm10, 1.0, %v2991_v26 }
0x177f   :  { %v3480_v14 = vsub.f32 1.0, %v3477_v13 }
0x1781   :  { %1533 = vperm.xlu1 %2784, %v3480_v14  }
0x1785   :  { %2787 = vset.pattern.permute.xlu1 %v2995_v19 }
0x1800   :  { %v1534_v57 = vpop.permute.xlu1 %1533 }
0x183b   :  { %v1320_v4 = vpop.f32.mrb[40].mxu1 }
0x183c   :  { %v3462_v5 = vadd.f32 %v2425_v3, %v1320_v4  ;;  %v2674_v6 = vpop.f32.mrb[41].mxu1 }
0x183d   :  { %v1323_v7 = vpop.f32.mrb[42].mxu1 }
0x183e   :  { %v1356_v8 = vmul.f32 0.5, %v3462_v5  ;;  %v2675_v9 = vpop.f32.mrb[43].mxu1 }
0x1840   :  { %v1357_v51 = vmul.f32 1.442695, %v1356_v8 }
0x1842   :  { %2867 = vpow2.f32 %v1357_v51 }
0x184c   :  { %v2868_v11 = vpop.eup %2867 }
0x184d   :  { %1360 = vrot.lane.b32.xlu0 %v2868_v11, %s3002_s10 }
0x18bf   :  { %v1361_v24 = vpop.permute.xlu0 %1360 }
0x18c0   :  { %v1363_v16 = vmul.f32 %v1361_v24, %v1355_v15 }
0x18c2   :  { %v1364_v18 = vadd.f32 %v1363_v16, %v3462_v5 }
0x18c4   :  { %v1365_v21 = vpack.c.bf16 %v1364_v18, %v1364_v18 }
0x18c6   :  { %2679 = vmatmul.mubr.msk.bf16.vlgmr.msra.gmra.mrb[24].mxu0 %vm1340_vm11, %v1365_v21 }
0x18c7   :  { %2691 = vmatpush3.bf16.msra.mxu0 %v3468_v10  ;;  %2694 = vmatprep.mubr.msk.bf16.mxu0 %vm2993_vm8, %v2991_v26 }
0x18c8   :  { %2692 = vmatprep.subr.bf16.mxu0 %v2991_v26 }
0x18cb   :  { %2693 = vmatpush3.bf16.msra.mxu0 %v3496_v23 }
0x18cc   :  { %2706 = vmatprep.subr.bf16.mxu0 %v2991_v26 }
0x1999   :  { %v1418_v28 = vpop.f32.mrb[24].mxu0 }
0x199a   :  { %v1419_v31 = vadd.f32 %v2430_v25, %v1418_v28  ;;  %v2680_v34 = vpop.f32.mrb[25].mxu0 }
0x199b   :  { %v1421_v37 = vpop.f32.mrb[26].mxu0 }
0x199c   :  { %v1429_v39 = vpack.c.bf16 %v1419_v31, %v1419_v31  ;;  %v2681_v41 = vpop.f32.mrb[27].mxu0  ;;  %v1536_v58 = vmul.f32 %v1534_v57, %v1419_v31 }
0x199e   :  { %2687 = vmatmul.mubr.msk.bf16.vlgmr.msra.gmra.mrb[44].mxu1 %vm361_vm9, %v1429_v39 }
0x199f   :  { %2699 = vmatpush3.bf16.msra.mxu1 %v3468_v10  ;;  %2702 = vmatprep.mubr.msk.bf16.mxu1 %vm2993_vm8, %v2991_v26 }
0x19a0   :  { %2700 = vmatprep.subr.bf16.mxu1 %v2991_v26 }
0x19a3   :  { %2701 = vmatpush3.bf16.msra.mxu1 %v3496_v23 }
0x19a4   :  { %2714 = vmatprep.subr.bf16.mxu1 %v2991_v26 }
0x1a71   :  { %v1479_v43 = vpop.f32.mrb[44].mxu1 }
0x1a72   :  { %v1500_v44 = vadd.f32 %v3472_v52, %v1479_v43  ;;  %v2688_v47 = vpop.f32.mrb[45].mxu1  ;;  %v1485_v1 = vadd.f32 %v1479_v43, %v509_v50 }
0x1a73   :  { %v1482_v46 = vpop.f32.mrb[46].mxu1 }
0x1a74   :  { %1502 = vrot.lane.b32.xlu0 %v1500_v44, %s2990_s4  ;;  %v2689_v48 = vpop.f32.mrb[47].mxu1  ;;  %v2436_v29 = vmul.f32 -1.442695, %v1485_v1 }
0x1a76   :  { %2869 = vpow2.f32 %v2436_v29 }
0x1a80   :  { %v2870_v32 = vpop.eup %2869 }
0x1a81   :  { %v1489_v53 = vadd.f32 1.0, %v2870_v32 }
0x1a83   :  { %2871 = vrcp.f32 %v1489_v53 }
0x1a8d   :  { %v2872_v54 = vpop.eup %2871 }
0x1a8e   :  { %v1512_v61 = vsub.f32 1.0, %v2872_v54 }
0x1ae6   :  { %v1503_v55 = vpop.permute.xlu0 %1502 }
0x1ae7   :  { %v1505_v56 = vmul.f32 %v2872_v54, %v1503_v55 }
0x1ae9   :  { %1507 = vrot.lane.b32.xlu0 %v1505_v56, %s2990_s4 }
0x1aed   :  { %1526 = vperm.xlu0 %2785, %v3477_v13  }
0x1af1   :  { %1538 = vrot.lane.b32.xlu0 %v1536_v58, %s3003_s13 }
0x1af2   :  { %2786 = vset.pattern.permute.xlu0 %v2995_v19 }
0x1b5b   :  { %v1508_v33 = vpop.permute.xlu0 %1507 }
0x1b5c   :  { %v1510_v36 = vadd.f32 %v1508_v33, %v509_v50 }
0x1b5e   :  { %2873 = vtanh.f32 %v1510_v36 }
0x1b68   :  { %v2874_v59 = vpop.eup %2873 }
0x1b69   :  { %1514 = vrot.lane.b32.xlu1 %v2874_v59, %s2994_s16 }
0x1b6c   :  { %v1527_v62 = vpop.permute.xlu0 %1526 }
0x1b6d   :  { %1519 = vrot.lane.b32.xlu1 %v1419_v31, %s3003_s13 }
0x1b70   :  { %v1539_v7 = vpop.permute.xlu0 %1538 }
0x1bdb   :  { %v1515_v60 = vpop.permute.xlu1 %1514 }
0x1bdc   :  { %v1517_v0 = vmul.f32 %v1515_v60, %v1512_v61 }
0x1bdf   :  { %v1520_v63 = vpop.permute.xlu1 %1519 }
0x1be0   :  { %v1522_v3 = vmul.f32 %v2872_v54, %v1520_v63 }
0x1be2   :  { %v3520_v4 = vadd.f32 %v1522_v3, %v1517_v0 }
0x1be4   :  { %v1529_v6 = vmul.f32 %v1527_v62, %v3520_v4 }
0x1be6   :  { %v1541_v8 = vadd.f32 %v1539_v7, %v1529_v6 }
0x1be8   :  { %v1542_v19 = vpack.c.bf16 %v1541_v8, %v1541_v8 }
0x1bea   :  { %1544 = vrot.lane.b32.xlu1 %v1542_v19, %s2994_s16 }
0x1c5c   :  { %v1545_v9 = vpop.permute.xlu1 %1544 }
0x1c5d   :  { %2695 = vmatmul.mubr.msk.bf16.vlgmr.msra.gmra.mrb[28].mxu0 %vm361_vm9, %v1545_v9 }
0x1c5e   :  { %2707 = vmatpush3.bf16.msra.mxu0 %v3468_v10  ;;  %2710 = vmatprep.mubr.msk.bf16.mxu0 %vm2993_vm8, %v2991_v26 }
0x1c5f   :  { %2708 = vmatprep.subr.bf16.mxu0 %v2991_v26 }
0x1c62   :  { %2709 = vmatpush3.bf16.msra.mxu0 %v3496_v23 }
0x1c63   :  { %2722 = vmatprep.subr.bf16.mxu0 %v2991_v26 }
0x1d30   :  { %v1583_v51 = vpop.f32.mrb[28].mxu0 }
0x1d31   :  { %v1596_v11 = vadd.f32 %v1583_v51, %v3472_v52  ;;  %v2696_v12 = vpop.f32.mrb[29].mxu0  ;;  %v1589_v16 = vadd.f32 %v1583_v51, %v3301_v40 }
0x1d32   :  { %v1586_v15 = vpop.f32.mrb[30].mxu0 }
0x1d33   :  { %1598 = vrot.lane.b32.xlu0 %v1596_v11, %s2990_s4  ;;  %v2697_v24 = vpop.f32.mrb[31].mxu0  ;;  %v2439_v18 = vmul.f32 -1.442695, %v1589_v16 }
0x1d35   :  { %2875 = vpow2.f32 %v2439_v18 }
0x1d37   :  { %1617 = vperm.xlu0 %2786, %v3477_v13  }
0x1d3b   :  { %2789 = vset.pattern.permute.xlu0 %v2996_v22 }
0x1d3f   :  { %v2876_v21 = vpop.eup %2875 }
0x1d40   :  { %v1593_v25 = vadd.f32 1.0, %v2876_v21 }
0x1d42   :  { %2877 = vrcp.f32 %v1593_v25 }
0x1d4c   :  { %v2878_v28 = vpop.eup %2877 }
0x1d4d   :  { %v1608_v44 = vsub.f32 1.0, %v2878_v28  ;;  %v1614_v46 = vmul.f32 %v2878_v28, %v1541_v8 }
0x1da5   :  { %v1599_v31 = vpop.permute.xlu0 %1598 }
0x1da6   :  { %v1601_v34 = vmul.f32 %v2878_v28, %v1599_v31 }
0x1da8   :  { %1603 = vrot.lane.b32.xlu1 %v1601_v34, %s2990_s4 }
0x1dac   :  { %1622 = vperm.xlu1 %2787, %v3480_v14  }
0x1db0   :  { %2788 = vset.pattern.permute.xlu1 %v2996_v22 }
0x1db6   :  { %v1618_v1 = vpop.permute.xlu0 %1617 }
0x1e1a   :  { %v1604_v37 = vpop.permute.xlu1 %1603 }
0x1e1b   :  { %v1606_v39 = vadd.f32 %v1604_v37, %v3301_v40 }
0x1e1d   :  { %2879 = vtanh.f32 %v1606_v39 }
0x1e27   :  { %v2880_v41 = vpop.eup %2879 }
0x1e28   :  { %1610 = vrot.lane.b32.xlu1 %v2880_v41, %s2994_s16 }
0x1e2b   :  { %v1623_v43 = vpop.permute.xlu1 %1622 }
0x1e2c   :  { %v1625_v29 = vmul.f32 %v1623_v43, %v1541_v8 }
0x1e9a   :  { %v1611_v47 = vpop.permute.xlu1 %1610 }
0x1e9b   :  { %v1613_v48 = vmul.f32 %v1611_v47, %v1608_v44 }
0x1e9d   :  { %v3541_v50 = vadd.f32 %v1614_v46, %v1613_v48 }
0x1e9f   :  { %v1620_v32 = vmul.f32 %v1618_v1, %v3541_v50 }
0x1ea1   :  { %v1626_v53 = vadd.f32 %v1625_v29, %v1620_v32 }
0x1ea3   :  { %v1627_v22 = vpack.c.bf16 %v1626_v53, %v1626_v53 }
0x1ea5   :  { %1629 = vrot.lane.b32.xlu0 %v1627_v22, %s2994_s16 }
0x1f17   :  { %v1630_v40 = vpop.permute.xlu0 %1629 }
0x1f18   :  { %2703 = vmatmul.mubr.msk.bf16.vlgmr.msra.gmra.mrb[48].mxu1 %vm361_vm9, %v1630_v40 }
0x1f19   :  { %2715 = vmatpush3.bf16.msra.mxu1 %v3468_v10  ;;  %2718 = vmatprep.mubr.msk.bf16.mxu1 %vm2993_vm8, %v2991_v26 }
0x1f1a   :  { %2716 = vmatprep.subr.bf16.mxu1 %v2991_v26 }
0x1f1d   :  { %2717 = vmatpush3.bf16.msra.mxu1 %v3496_v23 }
0x1f1e   :  { %2730 = vmatprep.subr.bf16.mxu1 %v2991_v26 }
0x1feb   :  { %v1668_v54 = vpop.f32.mrb[48].mxu1 }
0x1fec   :  { %v1681_v55 = vadd.f32 %v1668_v54, %v3472_v52  ;;  %v2704_v56 = vpop.f32.mrb[49].mxu1  ;;  %v1674_v33 = vadd.f32 %v1668_v54, %v3293_v35 }
0x1fed   :  { %v1671_v57 = vpop.f32.mrb[50].mxu1 }
0x1fee   :  { %1683 = vrot.lane.b32.xlu1 %v1681_v55, %s2990_s4  ;;  %v2705_v58 = vpop.f32.mrb[51].mxu1  ;;  %v2441_v36 = vmul.f32 -1.442695, %v1674_v33 }
0x1ff0   :  { %2881 = vpow2.f32 %v2441_v36 }
0x1ff2   :  { %1702 = vperm.xlu1 %2788, %v3477_v13  }
0x1ff6   :  { %2791 = vset.pattern.permute.xlu1 %v2997_v17 }
0x1ffa   :  { %v2882_v59 = vpop.eup %2881 }
0x1ffb   :  { %v1678_v60 = vadd.f32 1.0, %v2882_v59 }
0x1ffd   :  { %2883 = vrcp.f32 %v1678_v60 }
0x2007   :  { %v2884_v61 = vpop.eup %2883 }
0x2008   :  { %v1693_v8 = vsub.f32 1.0, %v2884_v61  ;;  %v1699_v9 = vmul.f32 %v2884_v61, %v1626_v53 }
0x2060   :  { %v1684_v62 = vpop.permute.xlu1 %1683 }
0x2061   :  { %v1686_v63 = vmul.f32 %v2884_v61, %v1684_v62 }
0x2063   :  { %1688 = vrot.lane.b32.xlu0 %v1686_v63, %s2990_s4 }
0x2067   :  { %1707 = vperm.xlu0 %2789, %v3480_v14  }
0x206b   :  { %2790 = vset.pattern.permute.xlu0 %v2997_v17 }
0x2071   :  { %v1703_v7 = vpop.permute.xlu1 %1702 }
0x20d5   :  { %v1689_v0 = vpop.permute.xlu0 %1688 }
0x20d6   :  { %v1691_v3 = vadd.f32 %v1689_v0, %v3293_v35 }
0x20d8   :  { %2885 = vtanh.f32 %v1691_v3 }
0x20e2   :  { %v2886_v6 = vpop.eup %2885 }
0x20e3   :  { %1695 = vrot.lane.b32.xlu1 %v2886_v6, %s2994_s16 }
0x20e6   :  { %v1708_v11 = vpop.permute.xlu0 %1707 }
0x20e7   :  { %v1710_v15 = vmul.f32 %v1708_v11, %v1626_v53 }
0x2155   :  { %v1696_v19 = vpop.permute.xlu1 %1695 }
0x2156   :  { %v1698_v51 = vmul.f32 %v1696_v19, %v1693_v8 }
0x2158   :  { %v3562_v12 = vadd.f32 %v1699_v9, %v1698_v51 }
0x215a   :  { %v1705_v24 = vmul.f32 %v1703_v7, %v3562_v12 }
0x215c   :  { %v1711_v16 = vadd.f32 %v1710_v15, %v1705_v24 }
0x215e   :  { %v1712_v17 = vpack.c.bf16 %v1711_v16, %v1711_v16 }
0x2160   :  { %1714 = vrot.lane.b32.xlu1 %v1712_v17, %s2994_s16 }
0x21d2   :  { %v1715_v35 = vpop.permute.xlu1 %1714 }
0x21d3   :  { %2711 = vmatmul.mubr.msk.bf16.vlgmr.msra.gmra.mrb[32].mxu0 %vm361_vm9, %v1715_v35 }
0x21d4   :  { %2723 = vmatpush3.bf16.msra.mxu0 %v3468_v10  ;;  %2726 = vmatprep.mubr.msk.bf16.mxu0 %vm2993_vm8, %v2991_v26 }
0x21d5   :  { %2724 = vmatprep.subr.bf16.mxu0 %v2991_v26 }
0x21d8   :  { %2725 = vmatpush3.bf16.msra.mxu0 %v3496_v23 }
0x22a6   :  { %v1753_v18 = vpop.f32.mrb[32].mxu0 }
0x22a7   :  { %v1766_v21 = vadd.f32 %v1753_v18, %v3472_v52  ;;  %v2712_v25 = vpop.f32.mrb[33].mxu0  ;;  %v1759_v34 = vadd.f32 %v1753_v18, %v3298_v38 }
0x22a8   :  { %v1756_v28 = vpop.f32.mrb[34].mxu0 }
0x22a9   :  { %1768 = vrot.lane.b32.xlu0 %v1766_v21, %s2990_s4  ;;  %v2713_v31 = vpop.f32.mrb[35].mxu0  ;;  %v2443_v37 = vmul.f32 -1.442695, %v1759_v34 }
0x22ab   :  { %2887 = vpow2.f32 %v2443_v37 }
0x22ad   :  { %1787 = vperm.xlu0 %2790, %v3477_v13  }
0x22b1   :  { %2793 = vset.pattern.permute.xlu0 %v2998_v20 }
0x22b5   :  { %v2888_v39 = vpop.eup %2887 }
0x22b6   :  { %v1763_v41 = vadd.f32 1.0, %v2888_v39 }
0x22b8   :  { %2889 = vrcp.f32 %v1763_v41 }
0x22c2   :  { %v2890_v43 = vpop.eup %2889 }
0x22c3   :  { %v1778_v32 = vsub.f32 1.0, %v2890_v43  ;;  %v1784_v22 = vmul.f32 %v2890_v43, %v1711_v16 }
0x231b   :  { %v1769_v44 = vpop.permute.xlu0 %1768 }
0x231c   :  { %v1771_v47 = vmul.f32 %v2890_v43, %v1769_v44 }
0x231e   :  { %1773 = vrot.lane.b32.xlu1 %v1771_v47, %s2990_s4 }
0x2322   :  { %1792 = vperm.xlu1 %2791, %v3480_v14  }
0x2326   :  { %2792 = vset.pattern.permute.xlu1 %v2998_v20 }
0x232c   :  { %v1788_v55 = vpop.permute.xlu0 %1787 }
0x2390   :  { %v1774_v46 = vpop.permute.xlu1 %1773 }
0x2391   :  { %v1776_v48 = vadd.f32 %v1774_v46, %v3298_v38 }
0x2393   :  { %2891 = vtanh.f32 %v1776_v48 }
0x239d   :  { %v2892_v1 = vpop.eup %2891 }
0x239e   :  { %1780 = vrot.lane.b32.xlu1 %v2892_v1, %s2994_s16 }
0x23a1   :  { %v1793_v29 = vpop.permute.xlu1 %1792 }
0x23a2   :  { %v1795_v56 = vmul.f32 %v1793_v29, %v1711_v16 }
0x2410   :  { %v1781_v53 = vpop.permute.xlu1 %1780 }
0x2411   :  { %v1783_v40 = vmul.f32 %v1781_v53, %v1778_v32 }
0x2413   :  { %v3582_v54 = vadd.f32 %v1784_v22, %v1783_v40 }
0x2415   :  { %v1790_v57 = vmul.f32 %v1788_v55, %v3582_v54 }
0x2417   :  { %v1796_v58 = vadd.f32 %v1795_v56, %v1790_v57 }
0x2419   :  { %v1797_v20 = vpack.c.bf16 %v1796_v58, %v1796_v58 }
0x241b   :  { %1799 = vrot.lane.b32.xlu0 %v1797_v20, %s2994_s16 }
0x248d   :  { %v1800_v38 = vpop.permute.xlu0 %1799 }
0x248e   :  { %2719 = vmatmul.mubr.msk.bf16.vlgmr.msra.gmra.mrb[52].mxu1 %vm361_vm9, %v1800_v38 }
0x248f   :  { %2731 = vmatpush3.bf16.msra.mxu1 %v3468_v10  ;;  %2734 = vmatprep.mubr.msk.bf16.mxu1 %vm2993_vm8, %v2991_v26 }
0x2490   :  { %2732 = vmatprep.subr.bf16.mxu1 %v2991_v26 }
0x2493   :  { %2733 = vmatpush3.bf16.msra.mxu1 %v3496_v23 }
0x2561   :  { %v1838_v33 = vpop.f32.mrb[52].mxu1 }
0x2562   :  { %v1851_v36 = vadd.f32 %v1838_v33, %v3472_v52  ;;  %v2720_v59 = vpop.f32.mrb[53].mxu1  ;;  %v1844_v10 = vadd.f32 %v1838_v33, %v3307_v45 }
0x2563   :  { %v1841_v60 = vpop.f32.mrb[54].mxu1 }
0x2564   :  { %1853 = vrot.lane.b32.xlu1 %v1851_v36, %s2990_s4  ;;  %v2721_v61 = vpop.f32.mrb[55].mxu1  ;;  %v2445_v62 = vmul.f32 -1.442695, %v1844_v10 }
0x2566   :  { %2893 = vpow2.f32 %v2445_v62 }
0x2568   :  { %1872 = vperm.xlu1 %2792, %v3477_v13  }
0x256c   :  { %2795 = vset.pattern.permute.xlu1 %v2999_v27 }
0x2570   :  { %v2894_v63 = vpop.eup %2893 }
0x2571   :  { %v1848_v0 = vadd.f32 1.0, %v2894_v63 }
0x2573   :  { %2895 = vrcp.f32 %v1848_v0 }
0x257d   :  { %v2896_v23 = vpop.eup %2895 }
0x257e   :  { %v1863_v51 = vsub.f32 1.0, %v2896_v23  ;;  %v1869_v15 = vmul.f32 %v2896_v23, %v1796_v58 }
0x25d6   :  { %v1854_v3 = vpop.permute.xlu1 %1853 }
0x25d7   :  { %v1856_v6 = vmul.f32 %v2896_v23, %v1854_v3 }
0x25d9   :  { %1858 = vrot.lane.b32.xlu0 %v1856_v6, %s2990_s4  ;;  %v2817_v6 = vld [vmem:[%s3830_s18] sm:$0xff]  }
0x25da   :  { %2738 = vmatprep.subr.bf16.mxu0 %v2817_v6 }
0x25dd   :  { %1877 = vperm.xlu0 %2793, %v3480_v14  }
0x25e1   :  { %2794 = vset.pattern.permute.xlu0 %v2999_v27 }
0x25e7   :  { %v1873_v9 = vpop.permute.xlu1 %1872 }
0x264b   :  { %v1859_v7 = vpop.permute.xlu0 %1858 }
0x264c   :  { %v1861_v8 = vadd.f32 %v1859_v7, %v3307_v45 }
0x264e   :  { %2897 = vtanh.f32 %v1861_v8  ;;  %v1328_v8 = vmul.f32 %v3462_v5, %v3462_v5 }
0x2658   :  { %v2898_v19 = vpop.eup %2897 }
0x2659   :  { %1865 = vrot.lane.b32.xlu1 %v2898_v19, %s2994_s16 }
0x265c   :  { %v1878_v16 = vpop.permute.xlu0 %1877 }
0x265d   :  { %v1880_v35 = vmul.f32 %v1878_v16, %v1796_v58 }
0x26cb   :  { %v1866_v11 = vpop.permute.xlu1 %1865 }
0x26cc   :  { %v1868_v24 = vmul.f32 %v1866_v11, %v1863_v51  ;;  %v2042_v11 = vpack.c.bf16 %v3582_v54, %v3562_v12  ;;  %v2450_v12 = vld [vmem:[%s3831_s19] ss:$0 sm:$0xff] }
0x26ce   :  { %v3602_v17 = vadd.f32 %v1869_v15, %v1868_v24 }
0x26d0   :  { %v1875_v18 = vmul.f32 %v1873_v9, %v3602_v17 }
0x26d2   :  { %v1881_v21 = vadd.f32 %v1880_v35, %v1875_v18 }
0x26d4   :  { %v1882_v27 = vpack.c.bf16 %v1881_v21, %v1881_v21 }
0x26d6   :  { %1884 = vrot.lane.b32.xlu1 %v1882_v27, %s2994_s16 }
0x2748   :  { %v1885_v45 = vpop.permute.xlu1 %1884 }
0x2749   :  { %2727 = vmatmul.mubr.msk.bf16.vlgmr.msra.gmra.mrb[36].mxu0 %vm361_vm9, %v1885_v45 }
0x274a   :  { %2739 = vmatpush3.bf16.msra.mxu0 %v2817_v6 }
0x281c   :  { %v1923_v25 = vpop.f32.mrb[36].mxu0 }
0x281d   :  { %v1936_v28 = vadd.f32 %v1923_v25, %v3472_v52  ;;  %v2728_v31 = vpop.f32.mrb[37].mxu0  ;;  %v1929_v39 = vadd.f32 %v1923_v25, %v3310_v49 }
0x281e   :  { %v1926_v34 = vpop.f32.mrb[38].mxu0 }
0x281f   :  { %1938 = vrot.lane.b32.xlu0 %v1936_v28, %s2990_s4  ;;  %v2729_v37 = vpop.f32.mrb[39].mxu0  ;;  %v2447_v41 = vmul.f32 -1.442695, %v1929_v39 }
0x2821   :  { %2899 = vpow2.f32 %v2447_v41  ;;  %v3664_v41 = vld [vmem:[%s3849_s1] sm:$0xff] }
0x2822   :  { %vm2289_vm3 = vcmp.ne.s32.totalorder %v3664_v41, 0 }
0x2823   :  { %1957 = vperm.xlu0 %2794, %v3477_v13  }
0x2827   :  { %2797 = vset.pattern.permute.xlu0 %v2989_v2 }
0x282b   :  { %v2900_v43 = vpop.eup %2899 }
0x282c   :  { %v1933_v44 = vadd.f32 1.0, %v2900_v43  ;;  %v3670_v43 = vld [vmem:[%s3849_s1 + $0x10] sm:$0xff] }
0x282d   :  { %vm2291_vm4 = vcmp.ne.s32.totalorder %v3670_v43, 0 }
0x282e   :  { %2901 = vrcp.f32 %v1933_v44  ;;  %v3676_v44 = vld [vmem:[%s3849_s1 + $0x18] sm:$0xff] }
0x282f   :  { %vm2292_vm6 = vcmp.ne.s32.totalorder %v3676_v44, 0 }
0x2838   :  { %v2902_v47 = vpop.eup %2901 }
0x2839   :  { %v1948_v53 = vsub.f32 1.0, %v2902_v47  ;;  %v1954_v40 = vmul.f32 %v2902_v47, %v1881_v21 }
0x2891   :  { %v1939_v46 = vpop.permute.xlu0 %1938 }
0x2892   :  { %v1941_v48 = vmul.f32 %v2902_v47, %v1939_v46  ;;  %v3682_v47 = vld [vmem:[%s3849_s1 + $0x20] sm:$0xff] }
0x2893   :  { %vm2293_vm8 = vcmp.ne.s32.totalorder %v3682_v47, 0 }
0x2894   :  { %1943 = vrot.lane.b32.xlu1 %v1941_v48, %s2990_s4 }
0x2898   :  { %1962 = vperm.xlu1 %2795, %v3480_v14  }
0x289c   :  { %2796 = vset.pattern.permute.xlu1 %v2989_v2 }
0x28a2   :  { %v1958_v57 = vpop.permute.xlu0 %1957 }
0x2906   :  { %v1944_v1 = vpop.permute.xlu1 %1943 }
0x2907   :  { %v1946_v13 = vadd.f32 %v1944_v1, %v3310_v49 }
0x2909   :  { %2903 = vtanh.f32 %v1946_v13 }
0x2913   :  { %v2904_v29 = vpop.eup %2903 }
0x2914   :  { %1950 = vrot.lane.b32.xlu1 %v2904_v29, %s2994_s16 }
0x2917   :  { %v1963_v32 = vpop.permute.xlu1 %1962 }
0x2918   :  { %v1965_v58 = vmul.f32 %v1963_v32, %v1881_v21 }
0x2986   :  { %v1951_v22 = vpop.permute.xlu1 %1950 }
0x2987   :  { %v1953_v55 = vmul.f32 %v1951_v22, %v1948_v53  ;;  %v1326_v22 = vmul.f32 1.442695, %v3462_v5 }
0x2989   :  { %v1955_v56 = vadd.f32 %v1954_v40, %v1953_v55 }
0x298b   :  { %v1960_v20 = vmul.f32 %v1958_v57, %v1955_v56  ;;  %v2043_v7 = vpack.c.bf16 %v1955_v56, %v3602_v17  ;;  %v3698_v56 = vld [vmem:[%s3849_s1 + $0x28] sm:$0xff] }
0x298d   :  { %v1966_v38 = vadd.f32 %v1965_v58, %v1960_v20  ;;  %v3704_v58 = vld [vmem:[%s3849_s1 + $0x30] sm:$0xff] }
0x298e   :  { %vm2295_vm10 = vcmp.ne.s32.totalorder %v3704_v58, 0 }
0x298f   :  { %v1967_v14 = vpack.c.bf16 %v1966_v38, %v1966_v38 }
0x2991   :  { %1969 = vrot.lane.b32.xlu0 %v1967_v14, %s2994_s16 }
0x2a03   :  { %v1970_v2 = vpop.permute.xlu0 %1969 }
0x2a04   :  { %2735 = vmatmul.mubr.msk.bf16.vlgmr.msra.gmra.mrb[56].mxu1 %vm361_vm9, %v1970_v2 }
0x2ad7   :  { %v2008_v49 = vpop.f32.mrb[56].mxu1 }
0x2ad8   :  { %v2021_v33 = vadd.f32 %v2008_v49, %v3472_v52  ;;  %v2736_v36 = vpop.f32.mrb[57].mxu1  ;;  %v2014_v61 = vadd.f32 %v2008_v49, %v3304_v42  ;;  %v2041_v52 = vpack.c.bf16 %v3541_v50, %v3520_v4  ;;  %v2818_v4 = vld [vmem:[%s3830_s18 + $0x8] sm:$0xff]  }
0x2ad9   :  { %v2011_v59 = vpop.f32.mrb[58].mxu1  ;;  %2740 = vmatprep.subr.bf16.mxu0 %v2818_v4 }
0x2ada   :  { %2023 = vrot.lane.b32.xlu1 %v2021_v33, %s2990_s4  ;;  %v2737_v60 = vpop.f32.mrb[59].mxu1  ;;  %v2449_v10 = vmul.f32 -1.442695, %v2014_v61  ;;  %2741 = vmatpush3.bf16.msra.mxu0 %v2818_v4 }
0x2adc   :  { %2905 = vpow2.f32 %v2449_v10 }
0x2ae6   :  { %v2906_v62 = vpop.eup %2905 }
0x2ae7   :  { %v2018_v63 = vadd.f32 1.0, %v2906_v62 }
0x2ae9   :  { %2907 = vrcp.f32 %v2018_v63 }
0x2af3   :  { %v2908_v0 = vpop.eup %2907 }
0x2af4   :  { %v2033_v15 = vsub.f32 1.0, %v2908_v0  ;;  %v2039_v16 = vmul.f32 %v2908_v0, %v1966_v38  ;;  %v3709_v38 = vld [vmem:[%s3849_s1 + $0x8] sm:$0xff] }
0x2af5   :  { %vm2290_vm5 = vcmp.ne.s32.totalorder %v3709_v38, 0 }
0x2b4c   :  { %v2024_v23 = vpop.permute.xlu1 %2023 }
0x2b4d   :  { %v2026_v3 = vmul.f32 %v2908_v0, %v2024_v23 }
0x2b4f   :  { %2028 = vrot.lane.b32.xlu0 %v2026_v3, %s2990_s4 }
0x2b53   :  { %2060 = vrot.lane.b32.xlu0 %v2041_v52, %s2994_s16 }
0x2b57   :  { %2064 = vrot.lane.b32.xlu0 %v2043_v7, %s2994_s16 }
0x2b5b   :  { %1330 = vrot.lane.b32.xlu0 %v1328_v8, %s3004_s23 }
0x2bc1   :  { %v2029_v50 = vpop.permute.xlu0 %2028 }
0x2bc2   :  { %v2031_v19 = vadd.f32 %v2029_v50, %v3304_v42 }
0x2bc4   :  { %2909 = vtanh.f32 %v2031_v19 }
0x2bc5   :  { %v2061_v9 = vpop.permute.xlu0 %2060  ;;  %2911 = vpow2.f32 %v1326_v22 }
0x2bc6   :  { %2742 = vmatprep.mubr.msk.bf16.mxu0 %vm361_vm9, %v2061_v9 }
0x2bc9   :  { %v2065_v18 = vpop.permute.xlu0 %2064 }
0x2bcd   :  { %v1331_v40 = vpop.permute.xlu0 %1330 }
0x2bce   :  { %v2910_v51 = vpop.eup %2909 }
0x2bcf   :  { %2035 = vrot.lane.b32.xlu1 %v2910_v51, %s2994_s16  ;;  %v2912_v55 = vpop.eup %2911 }
0x2bd0   :  { %v1333_v57 = vadd.f32 %v2912_v55, %v1331_v40 }
0x2bd2   :  { %v2429_v20 = vadd.f32 -1.0, %v1333_v57 }
0x2bd3   :  { %2062 = vrot.lane.b32.xlu1 %v2042_v11, %s2994_s16 }
0x2bd4   :  { %v1335_v14 = vsub.f32 %v2429_v20, %v3462_v5 }
0x2c41   :  { %v2036_v24 = vpop.permute.xlu1 %2035 }
0x2c42   :  { %v2038_v17 = vmul.f32 %v2036_v24, %v2033_v15 }
0x2c44   :  { %v2040_v35 = vadd.f32 %v2039_v16, %v2038_v17 }
0x2c45   :  { %v2063_v42 = vpop.permute.xlu1 %2062 }
0x2c46   :  { %v2044_v21 = vpack.c.bf16 %v2040_v35, %v2040_v35  ;;  %2743 = vmatmul.mubr.msk.bf16.vlgmr.msra.gmra.mrb[40].mxu0 %vm361_vm9, %v2063_v42 }
0x2c47   :  { %2746 = vmatprep.mubr.msk.bf16.mxu0 %vm361_vm9, %v2065_v18 }
0x2c48   :  { %2066 = vrot.lane.b32.xlu1 %v2044_v21, %s2994_s16 }
0x2cba   :  { %v2067_v27 = vpop.permute.xlu1 %2066 }
0x2cbb   :  { %2747 = vmatmul.mubr.msk.bf16.gmra.mrb[44].mxu0 %vm361_vm9, %v2067_v27  ;;  %vm2294_vm9 = vcmp.ne.s32.totalorder %v3698_v56, 0 }
0x2d19   :  { %v2744_v54 = vpop.f32.mrb[40].mxu0 }
0x2d1a   :  { %v2126_v45 = vpop.f32.mrb[41].mxu0  ;;  %v3657_v39 = vadd.f32 %v2744_v54, %v2450_v12 }
0x2d1b   :  { %v3649_v25 = vadd.f32 %v2450_v12, %v2126_v45  ;;  %v2745_v28 = vpop.f32.mrb[42].mxu0 }
0x2d1c   :  { %v2129_v31 = vpop.f32.mrb[43].mxu0  ;;  %v3654_v37 = vadd.f32 %v2745_v28, %v2450_v12 }
0x2d1d   :  { %v3651_v34 = vadd.f32 %v2450_v12, %v2129_v31  ;;  %2156 = vmax.xlane.f32.xlu1 %v3649_v25 }
0x2d1f   :  { %2158 = vmax.xlane.f32.xlu0 %v3651_v34 }
0x2d21   :  { %2162 = vmax.xlane.f32.xlu1 %v3654_v37 }
0x2d23   :  { %2160 = vmax.xlane.f32.xlu0 %v3657_v39 }
0x2d32   :  { %2234 = vperm.xlu1 %2796, %v3664_v41   ;;  %v2459_v41 = vsel %vm2291_vm4, 1.0, %v2991_v26 }
0x2d36   :  { %2240 = vperm.xlu1 %2796, %v3670_v43  }
0x2d3a   :  { %2243 = vperm.xlu1 %2796, %v3676_v44  }
0x2d3e   :  { %2246 = vperm.xlu1 %2796, %v3682_v47   ;;  %v2461_v47 = vsel %vm2293_vm8, 1.0, %v2991_v26 }
0x2d8e   :  { %v2748_v46 = vpop.f32.mrb[44].mxu0 }
0x2d8f   :  { %v3685_v48 = vadd.f32 %v2748_v46, %v2450_v12  ;;  %v2142_v1 = vpop.f32.mrb[45].mxu0 }
0x2d90   :  { %v2749_v13 = vpop.f32.mrb[46].mxu0  ;;  %v3690_v53 = vadd.f32 %v2450_v12, %v2142_v1 }
0x2d91   :  { %v2145_v29 = vpop.f32.mrb[47].mxu0  ;;  %2168 = vmax.xlane.f32.xlu0 %v3685_v48 }
0x2d92   :  { %v3688_v32 = vadd.f32 %v2450_v12, %v2145_v29 }
0x2d94   :  { %2166 = vmax.xlane.f32.xlu1 %v3688_v32 }
0x2d95   :  { %2164 = vmax.xlane.f32.xlu0 %v3690_v53 }
0x2da5   :  { %2249 = vperm.xlu1 %2796, %v3698_v56  }
0x2da9   :  { %2252 = vperm.xlu1 %2796, %v3704_v58  }
0x2daa   :  { %v3715_v2 = vpop.xlane.xlu1 %2156 }
0x2dab   :  { %2237 = vperm.xlu0 %2797, %v3709_v38   ;;  %v2170_v5 = vsub.f32 %v3649_v25, %v3715_v2 }
0x2dac   :  { %v3717_v49 = vpop.xlane.xlu0 %2158 }
0x2dad   :  { %1337 = vrot.lane.b32.xlu1 %v1335_v14, %s3002_s10  ;;  %v2171_v33 = vsub.f32 %v3651_v34, %v3717_v49  ;;  %v2177_v62 = vmul.f32 1.442695, %v2170_v5  ;;  %s3005_s10 = smov [#allocation4]  }
0x2dae   :  { %v3721_v36 = vpop.xlane.xlu1 %2162  ;;  %s2355_s22 = sshll.u32 %s3005_s10, 4  ;;  %s2356_s22 = int_to_ptr.vmem [resolvable:$true] %s2355_s22 }
0x2daf   :  { %v2179_v59 = vmul.f32 1.442695, %v2171_v33  ;;  %v2173_v60 = vsub.f32 %v3654_v37, %v3721_v36  ;;  %s2941_s11 = scalar_lea.vmem %s2356_s22, 16  ;;  %s2945_s7 = scalar_lea.vmem %s2356_s22, 32 }
0x2db0   :  { %v3727_v10 = vpop.xlane.xlu0 %2160  ;;  %p2942_p0 = scmp.ne.s32.totalorder %s2356_s22, %s2941_s11  ;;  %p2946_p1 = scmp.lt.s32.totalorder %s2356_s22, %s2356_s22 }
0x2db1   :  { %2913 = vpow2.f32 %v2179_v59  ;;  %v2183_v61 = vmul.f32 1.442695, %v2173_v60  ;;  %v2172_v63 = vsub.f32 %v3657_v39, %v3727_v10  ;;  %p2947_p2 = scmp.lt.s32.totalorder %s2945_s7, %s2941_s11 }
0x2db2   :  { %v2235_v7 = vpop.permute.xlu1 %2234 }
0x2db3   :  { %2915 = vpow2.f32 %v2183_v61  ;;  %v2181_v0 = vmul.f32 1.442695, %v2172_v63  ;;  %vm2254_vm12 = vcmp.eq.s32.totalorder %v3196_v30, %v2235_v7  ;;  %p2948_p3 = por %p2947_p2, %p2946_p1 }
0x2db4   :  { %2917 = vpow2.f32 %v2177_v62  ;;  %v2261_v27 = vsel %vm2254_vm12, %v3649_v25, 0.0  ;;  %v2457_v62 = vsel %vm2289_vm3, 1.0, %v2991_v26 }
0x2db5   :  { %2919 = vpow2.f32 %v2181_v0  ;;  %p2949_p4 = pnand %p2948_p3, %p2942_p0 }
0x2db6   :  { %v2241_v8 = vpop.permute.xlu1 %2240 }
0x2db7   :  { %vm2256_vm13 = vcmp.eq.s32.totalorder %v3196_v30, %v2241_v8 }
0x2db8   :  { %v2263_v45 = vsel %vm2256_vm13, %v3657_v39, 0.0 }
0x2dba   :  { %v2244_v4 = vpop.permute.xlu1 %2243 }
0x2dbb   :  { %v2914_v23 = vpop.eup %2913  ;;  %vm2257_vm0 = vcmp.eq.s32.totalorder %v3196_v30, %v2244_v4 }
0x2dbc   :  { %v2264_v46 = vsel %vm2257_vm0, %v3654_v37, 0.0 }
0x2dbd   :  { %v2916_v3 = vpop.eup %2915 }
0x2dbe   :  { %v2918_v52 = vpop.eup %2917  ;;  %v2247_v50 = vpop.permute.xlu1 %2246 }
0x2dbf   :  { %v2920_v6 = vpop.eup %2919  ;;  %vm2258_vm15 = vcmp.eq.s32.totalorder %v3196_v30, %v2247_v50 }
0x2dc0   :  { %v2265_v25 = vsel %vm2258_vm15, %v3690_v53, 0.0 }
0x2dca   :  { %2193 = vadd.xlane.f32.xlu0 %v2914_v23 }
0x2dce   :  { %2197 = vadd.xlane.f32.xlu0 %v2916_v3 }
0x2dd1   :  { %2191 = vadd.xlane.f32.xlu1 %v2918_v52 }
0x2dd5   :  { %2195 = vadd.xlane.f32.xlu1 %v2920_v6 }
0x2e1e   :  { %v3731_v19 = vpop.xlane.xlu0 %2168 }
0x2e1f   :  { %v2176_v15 = vsub.f32 %v3685_v48, %v3731_v19 }
0x2e21   :  { %v3733_v9 = vpop.xlane.xlu1 %2166  ;;  %v2189_v35 = vmul.f32 1.442695, %v2176_v15  ;;  %v2460_v15 = vsel %vm2292_vm6, 1.0, %v2991_v26 }
0x2e22   :  { %v2175_v51 = vsub.f32 %v3688_v32, %v3733_v9  ;;  %v3737_v11 = vpop.xlane.xlu0 %2164 }
0x2e23   :  { %v2174_v24 = vsub.f32 %v3690_v53, %v3737_v11 }
0x2e24   :  { %v2187_v16 = vmul.f32 1.442695, %v2175_v51 }
0x2e25   :  { %v2185_v17 = vmul.f32 1.442695, %v2174_v24  ;;  %v2250_v12 = vpop.permute.xlu1 %2249 }
0x2e26   :  { %2921 = vpow2.f32 %v2187_v16  ;;  %vm2259_vm2 = vcmp.eq.s32.totalorder %v3196_v30, %v2250_v12 }
0x2e27   :  { %2923 = vpow2.f32 %v2185_v17  ;;  %v2266_v1 = vsel %vm2259_vm2, %v3688_v32, 0.0 }
0x2e28   :  { %2925 = vpow2.f32 %v2189_v35 }
0x2e29   :  { %v2253_v31 = vpop.permute.xlu1 %2252 }
0x2e2a   :  { %v2238_v21 = vpop.permute.xlu0 %2237  ;;  %vm2260_vm1 = vcmp.eq.s32.totalorder %v3196_v30, %v2253_v31 }
0x2e2b   :  { %vm2255_vm14 = vcmp.eq.s32.totalorder %v3196_v30, %v2238_v21  ;;  %v2267_v39 = vsel %vm2260_vm1, %v3685_v48, 0.0 }
0x2e2c   :  { %v2262_v28 = vsel %vm2255_vm14, %v3651_v34, 0.0 }
0x2e2d   :  { %v1338_v34 = vpop.permute.xlu1 %1337 }
0x2e2e   :  { %v1341_v13 = vsel %vm1340_vm11, %v1338_v34, 0.0  ;;  %v2463_v34 = vsel %vm2295_vm10, 1.0, %v2991_v26  ;;  %vm1353_vm11 = vcmask 0  }
0x2e30   :  { %v2922_v42 = vpop.eup %2921 }
0x2e31   :  { %v2924_v18 = vpop.eup %2923  ;;  %2201 = vadd.xlane.f32.xlu0 %v2922_v42 }
0x2e32   :  { %2199 = vadd.xlane.f32.xlu1 %v2924_v18  ;;  %v2926_v54 = vpop.eup %2925 }
0x2e35   :  { %2268 = vadd.xlane.f32.xlu0 %v2261_v27 }
0x2e36   :  { %2203 = vadd.xlane.f32.xlu1 %v2926_v54  ;;  %v2462_v54 = vsel %vm2294_vm9, 1.0, %v2991_v26 }
0x2e39   :  { %2272 = vadd.xlane.f32.xlu0 %v2263_v45 }
0x2e3a   :  { %2270 = vadd.xlane.f32.xlu1 %v2262_v28 }
0x2e3d   :  { %2276 = vadd.xlane.f32.xlu0 %v2265_v25 }
0x2e3e   :  { %2274 = vadd.xlane.f32.xlu1 %v2264_v46 }
0x2e41   :  { %2280 = vadd.xlane.f32.xlu0 %v2267_v39 }
0x2e42   :  { %2278 = vadd.xlane.f32.xlu1 %v2266_v1 }
0x2e46   :  { %1342 = vadd.xlane.f32.xlu1 %v1341_v13 }
0x2e57   :  { %v2194_v53 = vpop.xlane.xlu0 %2193 }
0x2e5b   :  { %v2198_v22 = vpop.xlane.xlu0 %2197 }
0x2e5e   :  { %v2192_v29 = vpop.xlane.xlu1 %2191 }
0x2e5f   :  { %2927 = vlog2.f32 %v2192_v29 }
0x2e62   :  { %v2196_v37 = vpop.xlane.xlu1 %2195 }
0x2e63   :  { %2929 = vlog2.f32 %v2196_v37 }
0x2e64   :  { %2931 = vlog2.f32 %v2194_v53 }
0x2e65   :  { %2933 = vlog2.f32 %v2198_v22 }
0x2e69   :  { %v2928_v30 = vpop.eup %2927 }
0x2e6a   :  { %v2206_v55 = vmul.f32 0.6931472, %v2928_v30 }
0x2e6c   :  { %v2219_v59 = vadd.f32 %v2206_v55, %v3715_v2  ;;  %v2458_v2 = vsel %vm2290_vm5, 1.0, %v2991_v26 }
0x2e6d   :  { %v2930_v40 = vpop.eup %2929 }
0x2e6e   :  { %v2932_v57 = vpop.eup %2931  ;;  %v2210_v20 = vmul.f32 0.6931472, %v2930_v40 }
0x2e6f   :  { %v2208_v14 = vmul.f32 0.6931472, %v2932_v57  ;;  %v2934_v60 = vpop.eup %2933 }
0x2e70   :  { %v2221_v63 = vadd.f32 %v2210_v20, %v3727_v10  ;;  %v2212_v0 = vmul.f32 0.6931472, %v2934_v60 }
0x2e71   :  { %v2220_v3 = vadd.f32 %v2208_v14, %v3717_v49 }
0x2e72   :  { %v2222_v49 = vadd.f32 %v2212_v0, %v3721_v36 }
0x2ebe   :  { %v2202_v48 = vpop.xlane.xlu0 %2201 }
0x2ebf   :  { %2935 = vlog2.f32 %v2202_v48  ;;  %v2200_v32 = vpop.xlane.xlu1 %2199 }
0x2ec0   :  { %2937 = vlog2.f32 %v2200_v32 }
0x2ec2   :  { %v2269_v33 = vpop.xlane.xlu0 %2268 }
0x2ec3   :  { %v2204_v5 = vpop.xlane.xlu1 %2203  ;;  %v2282_v61 = vsub.f32 %v2219_v59, %v2269_v33 }
0x2ec4   :  { %2939 = vlog2.f32 %v2204_v5 }
0x2ec5   :  { %v2310_v7 = vmul.f32 %v2457_v62, %v2282_v61 }
0x2ec6   :  { %v2273_v23 = vpop.xlane.xlu0 %2272 }
0x2ec7   :  { %v2284_v52 = vsub.f32 %v2221_v63, %v2273_v23  ;;  %v2271_v6 = vpop.xlane.xlu1 %2270  ;;  %v2318_v16 = vsel %vm2317_vm7, %v2310_v7, 0.0 }
0x2ec8   :  { %v2283_v8 = vsub.f32 %v2220_v3, %v2271_v6 }
0x2ec9   :  { %v2936_v43 = vpop.eup %2935  ;;  %v2312_v4 = vmul.f32 %v2459_v41, %v2284_v52 }
0x2eca   :  { %v2938_v38 = vpop.eup %2937  ;;  %v2216_v10 = vmul.f32 0.6931472, %v2936_v43  ;;  %v2311_v50 = vmul.f32 %v2458_v2, %v2283_v8  ;;  %v2277_v17 = vpop.xlane.xlu0 %2276 }
0x2ecb   :  { %v2214_v51 = vmul.f32 0.6931472, %v2938_v38  ;;  %v2275_v24 = vpop.xlane.xlu1 %2274  ;;  %v2321_v36 = vsel %vm2317_vm7, %v2312_v4, 0.0 }
0x2ecc   :  { %v2319_v44 = vsel %vm2317_vm7, %v2311_v50, 0.0  ;;  %v2285_v35 = vsub.f32 %v2222_v49, %v2275_v24  ;;  %v2224_v12 = vadd.f32 %v2216_v10, %v3733_v9 }
0x2ecd   :  { %v2320_v42 = vadd.f32 %v2319_v44, %v2318_v16  ;;  %v2223_v18 = vadd.f32 %v2214_v51, %v3737_v11 }
0x2ece   :  { %v2940_v21 = vpop.eup %2939  ;;  %v2313_v27 = vmul.f32 %v2460_v15, %v2285_v35  ;;  %v2281_v13 = vpop.xlane.xlu0 %2280 }
0x2ecf   :  { %v2218_v56 = vmul.f32 0.6931472, %v2940_v21  ;;  %v2286_v45 = vsub.f32 %v2223_v18, %v2277_v17  ;;  %v2322_v28 = vadd.f32 %v2321_v36, %v2320_v42  ;;  %v2279_v31 = vpop.xlane.xlu1 %2278 }
0x2ed0   :  { %v2323_v25 = vsel %vm2317_vm7, %v2313_v27, 0.0  ;;  %v2287_v46 = vsub.f32 %v2224_v12, %v2279_v31 }
0x2ed1   :  { %v2314_v39 = vmul.f32 %v2461_v47, %v2286_v45  ;;  %v2324_v1 = vadd.f32 %v2323_v25, %v2322_v28  ;;  %v2225_v11 = vadd.f32 %v2218_v56, %v3731_v19 }
0x2ed2   :  { %v2315_v29 = vmul.f32 %v2462_v54, %v2287_v46 }
0x2ed3   :  { %v2325_v9 = vsel %vm2317_vm7, %v2314_v39, 0.0  ;;  %v2288_v53 = vsub.f32 %v2225_v11, %v2281_v13  ;;  %v1343_v37 = vpop.xlane.xlu1 %1342 }
0x2ed4   :  { %v2326_v22 = vadd.f32 %v2325_v9, %v2324_v1  ;;  %v2327_v30 = vsel %vm2317_vm7, %v2315_v29, 0.0  ;;  %v1344_v58 = vmul.f32 0.5, %v1343_v37 }
0x2ed5   :  { %v2316_v40 = vmul.f32 %v2463_v34, %v2288_v53 }
0x2ed6   :  { %v2328_v55 = vadd.f32 %v2327_v30, %v2326_v22  ;;  %v1345_v48 = vrot.slane %v1344_v58, 4 }
0x2ed7   :  { %v2329_v57 = vsel %vm2317_vm7, %v2316_v40, 0.0 }
0x2ed8   :  { %v2330_v32 = vadd.f32 %v2329_v57, %v2328_v55  ;;  %v1346_v20 = vadd.f32 %v1345_v48, %v1344_v58 }
0x2eda   :  { %v1347_v19 = vrot.slane %v1346_v20, 2  ;;  %v2331_v14 = vrot.slane %v2330_v32, 4 }
0x2edc   :  { %v1348_v26 = vadd.f32 %v1347_v19, %v1346_v20  ;;  %v2332_v33 = vadd.f32 %v2331_v14, %v2330_v32 }
0x2ede   :  { %v1349_v59 = vrot.slane %v1348_v26, 1  ;;  %v2333_v60 = vrot.slane %v2332_v33, 2 }
0x2ee0   :  { %v2334_v5 = vadd.f32 %v2333_v60, %v2332_v33  ;;  %v1350_v61 = vadd.f32 %v1349_v59, %v1348_v26 }
0x2ee2   :  { %v2335_v62 = vrot.slane %v2334_v5, 1  ;;  %v1352_v63 = vmul.f32 0.125, %v1350_v61 }
0x2ee4   :  { %v2336_v0 = vadd.f32 %v2335_v62, %v2334_v5  ;;  %1354 = vst.msk [vmem:[#allocation4] sm:$0x1] %vm1353_vm11, %v1352_v63 }
0x2ee5   :  { %2952 = shalt.err (!%p2949_p4)
}
0x2ee6   :  { %s2953_s8 = scalar_lea.hbm %s3833_s21, 16 }
0x2ee7   :  { %p2954_p5 = scmp.ne.s32.totalorder %s3833_s21, %s2953_s8  ;;  %p2957_p6 = scmp.lt.u32.totalorder %s2953_s8, %s3833_s21 }
0x2ee9   :  { %p2959_p7 = pnand %p2957_p6, %p2954_p5 }
0x2eeb   :  { %2962 = shalt.err (!%p2959_p7)
}
0x2eec   :  { %2358 = dma.vmem_to_hbm [thread:$0]  %s2356_s22, 16, %s3833_s21, [#allocation5]   ;;  %v2337_v23 = vmul.f32 0.125, %v2336_v0 }
0x2eed   :  { %s2963_s16 = scalar_lea.vmem %s2346_s14, 16  ;;  %s2967_s1 = scalar_lea.vmem %s2346_s14, 32 }
0x2eee   :  { %2338 = vst.msk [vmem:[#allocation2] sm:$0x1] %vm1353_vm11, %v2337_v23  ;;  %p2964_p8 = scmp.ne.s32.totalorder %s2346_s14, %s2963_s16  ;;  %p2968_p9 = scmp.lt.s32.totalorder %s2346_s14, %s2346_s14 }
0x2eef   :  { %p2969_p10 = scmp.lt.s32.totalorder %s2967_s1, %s2963_s16 }
0x2ef1   :  { %p2970_p11 = por %p2969_p10, %p2968_p9 }
0x2ef3   :  { %p2971_p12 = pnand %p2970_p11, %p2964_p8 }
0x2ef5   :  { %2974 = shalt.err (!%p2971_p12)
}
0x2ef6   :  { %s2975_s25 = scalar_lea.hbm %s3832_s20, 16 }
0x2ef7   :  { %p2976_p13 = scmp.ne.s32.totalorder %s3832_s20, %s2975_s25  ;;  %p2979_p0 = scmp.lt.u32.totalorder %s2975_s25, %s3832_s20 }
0x2ef9   :  { %p2981_p1 = pnand %p2979_p0, %p2976_p13 }
0x2efb   :  { %2984 = shalt.err (!%p2981_p1)
}
0x2efc   :  { %2348 = dma.vmem_to_hbm [thread:$0]  %s2346_s14, 16, %s3832_s20, [#allocation3]  }
0x2efd   :  { %2985 = dma.done.wait [#allocation3], 16  }
0x2efe   :  { %2986 = vsyncadd [#allocation3], 4294967280 }
0x2eff   :  { %2987 = dma.done.wait [#allocation5], 16  }
0x2f00   :  { %2988 = vsyncadd [#allocation5], 4294967280 }
0x2f01   :  { %2365 = vsyncpa [#allocation3], 1 }
0x2f02   :  { %2366 = vsyncpa [#allocation5], 1 }

</bundles_post_ra>
